<compile_context>
chip_gen: v7x
topology: tpu7x:2x2x1
jax: 0.10.0
libtpu: 0.0.40
codegen_flags: <defaults>
</compile_context>

<pallas_src>
import functools

import jax
import jax.numpy as jnp
from jax.experimental import pallas as pl
from jax.experimental.pallas import tpu as pltpu

K = 7      # conv kernel size
PAD = 3    # conv padding


def _conv7x7_sigmoid_flat(w_ref, bias, mean_row, max_row, *, H, W, OFF, HWp):
    """2->1 channel 7x7 'same' conv + sigmoid computed on flat (1, H*W) rows.

    mean_row / max_row are (1, H*W) f32 values.  Each is embedded at lane offset OFF
    inside a (1, HWp) zero row; tap (kh, kw) is a lane roll by (kh-PAD)*W + (kw-PAD).
    Vertical out-of-range taps read the zero halo; horizontal row-crossing taps are
    killed by a column-validity mask, so the result equals the zero-padded conv.
    Returns the (1, H*W) f32 gate.
    """
    HW = H * W
    zl = jnp.zeros((1, OFF), jnp.float32)
    zr = jnp.zeros((1, HWp - OFF - HW), jnp.float32)
    padded = (jnp.concatenate([zl, mean_row, zr], axis=1),   # aligned at lane OFF
              jnp.concatenate([zl, max_row, zr], axis=1))

    col = jax.lax.broadcasted_iota(jnp.int32, (1, HWp), 1)
    colw = (col - OFF) % W                                   # column-within-row index
    col_ok = [jnp.logical_and(colw + (kw - PAD) >= 0, colw + (kw - PAD) < W)
              for kw in range(K)]

    acc = jnp.zeros((1, HWp), jnp.float32)
    for ci in range(2):                                      # 0: mean map, 1: max map
        src = padded[ci]
        for kh in range(K):
            for kw in range(K):
                s = (kh - PAD) * W + (kw - PAD)              # flat tap shift, |s| <= 3W+3
                rolled = src if s == 0 else pltpu.roll(src, shift=(-s) % HWp, axis=1)
                tap = rolled if kw == PAD else jnp.where(col_ok[kw], rolled, 0.0)
                acc = acc + w_ref[ci * K * K + kh * K + kw] * tap
    return jax.nn.sigmoid(acc[:, OFF:OFF + HW] + bias)       # (1, H*W) f32


def _fused_kernel(w_ref, b_ref, x_ref, o_ref, *, H, W, OFF, HWp):
    # w_ref: SMEM (2*K*K,) f32;  b_ref: SMEM (1,) f32
    # x_ref / o_ref: VMEM (1, C, H*W) — one batch element, lane-dense
    xin = x_ref[0]                                           # (C, HW)
    xf = xin.astype(jnp.float32)
    mean_row = jnp.mean(xf, axis=0, keepdims=True)           # (1, HW)
    max_row = jnp.max(xf, axis=0, keepdims=True)             # (1, HW)
    gate = _conv7x7_sigmoid_flat(w_ref, b_ref[0], mean_row, max_row,
                                 H=H, W=W, OFF=OFF, HWp=HWp)
    # multiply in x's dtype: no f32 upcast of the big tile on the store path
    o_ref[0] = (xin * gate.astype(o_ref.dtype)).astype(o_ref.dtype)


def _reduce_conv_kernel(w_ref, b_ref, x_ref, gate_ref, sum_ref, max_ref,
                        *, C, H, W, OFF, HWp):
    # grid = (B, nC): b is "parallel", c is a reduction accumulated in VMEM scratch.
    c = pl.program_id(1)
    xf = x_ref[0].astype(jnp.float32)                        # (Ct, HW)
    psum = jnp.sum(xf, axis=0, keepdims=True)
    pmax = jnp.max(xf, axis=0, keepdims=True)

    @pl.when(c == 0)
    def _():
        sum_ref[...] = psum
        max_ref[...] = pmax

    @pl.when(c != 0)
    def _():
        sum_ref[...] = sum_ref[...] + psum
        max_ref[...] = jnp.maximum(max_ref[...], pmax)

    # conv + sigmoid fused into the last reduction step (no mean/max HBM round trip)
    @pl.when(c == pl.num_programs(1) - 1)
    def _():
        gate_ref[0] = _conv7x7_sigmoid_flat(
            w_ref, b_ref[0], sum_ref[...] * (1.0 / C), max_ref[...],
            H=H, W=W, OFF=OFF, HWp=HWp)


def _apply_kernel(x_ref, g_ref, o_ref):
    # x_ref: (1, Ct, HW); g_ref: (1, 1, HW) f32; o_ref: (1, Ct, HW) — all lane-dense
    o_ref[0] = (x_ref[0] * g_ref[0].astype(o_ref.dtype)).astype(o_ref.dtype)


def _vmem_budget_bytes():
    """Generation-aware VMEM budget that stays under every scoped default."""
    try:
        phys = pltpu.get_tpu_info().vmem_capacity_bytes
    except Exception:
        return 12 << 20                    # unknown part: be conservative
    # v5e/v6e: 128 MiB physical, scoped defaults 16/32 MiB -> stay under 16 MiB.
    # v7x:     64 MiB physical, scoped default 32 MiB      -> 24 MiB is safe.
    return (12 << 20) if phys >= (128 << 20) else (24 << 20)


def _channel_tile(C, HW, itemsize, block_budget):
    """Channel tile that divides C exactly, is a multiple of 8 when possible, and
    keeps one block under block_budget bytes (double-buffering handled by caller)."""
    if C % 8 != 0:
        return C
    ct = max(8, min(C, (block_budget // max(1, HW * itemsize)) // 8 * 8))
    while C % ct:
        ct -= 8
    return ct


def spatial_attention(x, weight, bias, *, force_streaming=False):
    """x: (B, C, H, W); weight: (1, 2, 7, 7) OIHW; bias: (1,)."""
    B, C, H, W = x.shape
    assert weight.shape == (1, 2, K, K) and bias.shape == (1,)
    HW = H * W

    # flat-conv geometry: zero halo of >= 3W+3 lanes on both sides, 128-aligned, so
    # rolls never wrap data into the output region and vertical OOB taps read zeros.
    halo = -(-(PAD * W + PAD) // 128) * 128
    OFF, HWp = halo, halo + HW + halo
    assert OFF >= PAD * W + PAD and HWp - OFF - HW >= PAD * W + PAD

    x_flat = x.reshape(B, C, HW)                          # spatial on the lane axis
    w_flat = weight.reshape(-1).astype(jnp.float32)       # (2*K*K,) scalars for SMEM
    b_flat = bias.reshape(-1).astype(jnp.float32)
    smem = pl.BlockSpec(memory_space=pltpu.MemorySpace.SMEM)

    budget = _vmem_budget_bytes()
    slab = C * HW * x.dtype.itemsize
    fused_work = 4 * slab + 4 * C * HW * 4                # 2x-buffered in/out + f32 temps

    if not force_streaming and fused_work <= budget:
        # ---- single fused call: reduce + conv + gate + apply, x resident in VMEM ----
        y_flat = pl.pallas_call(
            functools.partial(_fused_kernel, H=H, W=W, OFF=OFF, HWp=HWp),
            out_shape=jax.ShapeDtypeStruct((B, C, HW), x.dtype),
            grid=(B,),
            in_specs=[smem, smem,
                      pl.BlockSpec((1, C, HW), lambda b: (b, 0, 0))],
            out_specs=pl.BlockSpec((1, C, HW), lambda b: (b, 0, 0)),
            compiler_params=pltpu.CompilerParams(dimension_semantics=("parallel",)),
        )(w_flat, b_flat, x_flat)
        return y_flat.reshape(B, C, H, W)

    # ---- streaming fallback: (a) C-tiled reduce + conv epilogue, (b) gate*x stream ----
    Ct = _channel_tile(C, HW, x.dtype.itemsize, budget // 8)
    nC = C // Ct

    gate = pl.pallas_call(
        functools.partial(_reduce_conv_kernel, C=C, H=H, W=W, OFF=OFF, HWp=HWp),
        out_shape=jax.ShapeDtypeStruct((B, 1, HW), jnp.float32),
        grid=(B, nC),
        in_specs=[smem, smem,
                  pl.BlockSpec((1, Ct, HW), lambda b, c: (b, c, 0))],
        out_specs=pl.BlockSpec((1, 1, HW), lambda b, c: (b, 0, 0)),
        scratch_shapes=[pltpu.VMEM((1, HW), jnp.float32),
                        pltpu.VMEM((1, HW), jnp.float32)],
        compiler_params=pltpu.CompilerParams(
            dimension_semantics=("parallel", "arbitrary")),
    )(w_flat, b_flat, x_flat)

    y_flat = pl.pallas_call(
        _apply_kernel,
        out_shape=jax.ShapeDtypeStruct((B, C, HW), x.dtype),
        grid=(B, nC),
        in_specs=[pl.BlockSpec((1, Ct, HW), lambda b, c: (b, c, 0)),
                  pl.BlockSpec((1, 1, HW), lambda b, c: (b, 0, 0))],
        out_specs=pl.BlockSpec((1, Ct, HW), lambda b, c: (b, c, 0)),
        compiler_params=pltpu.CompilerParams(
            dimension_semantics=("parallel", "parallel")),
    )(x_flat, gate)
    return y_flat.reshape(B, C, H, W)


def _reference(x, weight, bias):
    """Pure-JAX reference mirroring the PyTorch forward."""
    x1 = jnp.mean(x, axis=1, keepdims=True)
    x2 = jnp.max(x, axis=1, keepdims=True)
    x3 = jnp.concatenate([x1, x2], axis=1)
    conv = jax.lax.conv_general_dilated(
        x3, weight, window_strides=(1, 1), padding=((PAD, PAD), (PAD, PAD)),
        dimension_numbers=("NCHW", "OIHW", "NCHW"))
    x4 = jax.nn.sigmoid(conv + bias.reshape(1, 1, 1, 1))
    return x4 * x


if __name__ == "__main__":
    key = jax.random.PRNGKey(0)
    kx, kw_key, kb = jax.random.split(key, 3)

    B, C, H, W = 2, 4, 16, 16
    x = jax.random.normal(kx, (B, C, H, W), dtype=jnp.float32)

    # deterministic init matching nn.Conv2d(2, 1, 7) shapes
    fan_in = 2 * K * K
    bound = 1.0 / (fan_in ** 0.5)
    weight = jax.random.uniform(kw_key, (1, 2, K, K), jnp.float32, -bound, bound)
    bias = jax.random.uniform(kb, (1,), jnp.float32, -bound, bound)

    ref = _reference(x, weight, bias)

    # primary fused path (single pallas_call)
    out = jax.block_until_ready(jax.jit(spatial_attention)(x, weight, bias))
    assert out.shape == (B, C, H, W)
    err = float(jnp.max(jnp.abs(out - ref)))
    assert jnp.allclose(out, ref, atol=1e-4, rtol=1e-4), f"fused max_err={err}"

    # streaming fallback path (exercised explicitly so both code paths are validated)
    out2 = jax.block_until_ready(
        jax.jit(functools.partial(spatial_attention, force_streaming=True))(
            x, weight, bias))
    err2 = float(jnp.max(jnp.abs(out2 - ref)))
    assert jnp.allclose(out2, ref, atol=1e-4, rtol=1e-4), f"streaming max_err={err2}"

    print("KERNEL_OK")
</pallas_src>

<mosaic_0001>
module attributes {stable_mosaic.version = 11 : i64} {
  func.func @_fused_kernel(%arg0: i32, %arg1: memref<98xf32, #tpu.memory_space<smem>>, %arg2: memref<1xf32, #tpu.memory_space<smem>>, %arg3: memref<1x4x256xf32, #tpu.memory_space<vmem>>, %arg4: memref<1x4x256xf32, #tpu.memory_space<vmem>>) attributes {dimension_semantics = [#tpu.dimension_semantics<parallel>], iteration_bounds = array<i64: 2>, scalar_prefetch = 0 : i64, scratch_operands = 0 : i64, tpu.core_type = #tpu.core_type<tc>, window_params = [{transform_indices = @transform_0, window_bounds = array<i64: 98>}, {transform_indices = @transform_1, window_bounds = array<i64: 1>}, {transform_indices = @transform_2, window_bounds = array<i64: 1, 4, 256>}, {transform_indices = @transform_3, window_bounds = array<i64: 1, 4, 256>}]} {
    %c0 = arith.constant 0 : index
    %c0_0 = arith.constant 0 : index
    %c0_1 = arith.constant 0 : index
    %0 = vector.load %arg3[%c0, %c0_0, %c0_1] : memref<1x4x256xf32, #tpu.memory_space<vmem>>, vector<1x4x256xf32>
    %1 = vector.shape_cast %0 : vector<1x4x256xf32> to vector<4x256xf32>
    %cst = arith.constant dense<0.000000e+00> : vector<256xf32>
    %2 = vector.multi_reduction <add>, %1, %cst [0] : vector<4x256xf32> to vector<256xf32>
    %3 = vector.shape_cast %2 : vector<256xf32> to vector<1x256xf32>
    %cst_2 = arith.constant 4.000000e+00 : f32
    %4 = vector.broadcast %cst_2 : f32 to vector<1x256xf32>
    %5 = arith.divf %3, %4 : vector<1x256xf32>
    %cst_3 = arith.constant dense<0xFF800000> : vector<256xf32>
    %6 = vector.multi_reduction <maximumf>, %1, %cst_3 [0] : vector<4x256xf32> to vector<256xf32>
    %7 = vector.shape_cast %6 : vector<256xf32> to vector<1x256xf32>
    %c0_4 = arith.constant 0 : index
    %8 = memref.load %arg2[%c0_4] : memref<1xf32, #tpu.memory_space<smem>>
    %cst_5 = arith.constant 0.000000e+00 : f32
    %9 = vector.broadcast %cst_5 : f32 to vector<1x128xf32>
    %cst_6 = arith.constant 0.000000e+00 : f32
    %10 = vector.broadcast %cst_6 : f32 to vector<1x128xf32>
    %11 = tpu.concatenate %9, %5, %10 in 1 : vector<1x128xf32>, vector<1x256xf32>, vector<1x128xf32> -> vector<1x512xf32>
    %12 = tpu.concatenate %9, %7, %10 in 1 : vector<1x128xf32>, vector<1x256xf32>, vector<1x128xf32> -> vector<1x512xf32>
    %13 = tpu.iota {dimensions = array<i32: 1>} : vector<1x512xi32>
    %c128_i32 = arith.constant 128 : i32
    %14 = vector.broadcast %c128_i32 : i32 to vector<1x512xi32>
    %15 = arith.subi %13, %14 : vector<1x512xi32>
    %c16_i32 = arith.constant 16 : i32
    %c0_i32 = arith.constant 0 : i32
    %16 = arith.cmpi eq, %c16_i32, %c0_i32 : i32
    %c1_i32 = arith.constant 1 : i32
    %17 = arith.select %16, %c1_i32, %c16_i32 : i32
    %18 = vector.broadcast %17 : i32 to vector<1x512xi32>
    %19 = arith.remsi %15, %18 : vector<1x512xi32>
    %c0_i32_7 = arith.constant 0 : i32
    %20 = vector.broadcast %c0_i32_7 : i32 to vector<1x512xi32>
    %21 = arith.cmpi ne, %19, %20 : vector<1x512xi32>
    %c0_i32_8 = arith.constant 0 : i32
    %22 = vector.broadcast %c0_i32_8 : i32 to vector<1x512xi32>
    %23 = arith.cmpi slt, %19, %22 : vector<1x512xi32>
    %c0_i32_9 = arith.constant 0 : i32
    %24 = arith.cmpi slt, %17, %c0_i32_9 : i32
    %25 = vector.broadcast %24 : i1 to vector<1x512xi1>
    %26 = vector.broadcast %25 : vector<1x512xi1> to vector<1x512xi1>
    %27 = arith.xori %23, %26 : vector<1x512xi1>
    %28 = arith.andi %27, %21 : vector<1x512xi1>
    %29 = vector.broadcast %17 : i32 to vector<1x512xi32>
    %30 = arith.addi %19, %29 : vector<1x512xi32>
    %31 = arith.select %28, %30, %19 : vector<1x512xi1>, vector<1x512xi32>
    %c-3_i32 = arith.constant -3 : i32
    %32 = vector.broadcast %c-3_i32 : i32 to vector<1x512xi32>
    %33 = arith.addi %31, %32 : vector<1x512xi32>
    %c0_i32_10 = arith.constant 0 : i32
    %34 = vector.broadcast %c0_i32_10 : i32 to vector<1x512xi32>
    %35 = arith.cmpi sge, %33, %34 : vector<1x512xi32>
    %c-3_i32_11 = arith.constant -3 : i32
    %36 = vector.broadcast %c-3_i32_11 : i32 to vector<1x512xi32>
    %37 = arith.addi %31, %36 : vector<1x512xi32>
    %c16_i32_12 = arith.constant 16 : i32
    %38 = vector.broadcast %c16_i32_12 : i32 to vector<1x512xi32>
    %39 = arith.cmpi slt, %37, %38 : vector<1x512xi32>
    %40 = arith.andi %35, %39 : vector<1x512xi1>
    %c-2_i32 = arith.constant -2 : i32
    %41 = vector.broadcast %c-2_i32 : i32 to vector<1x512xi32>
    %42 = arith.addi %31, %41 : vector<1x512xi32>
    %c0_i32_13 = arith.constant 0 : i32
    %43 = vector.broadcast %c0_i32_13 : i32 to vector<1x512xi32>
    %44 = arith.cmpi sge, %42, %43 : vector<1x512xi32>
    %c-2_i32_14 = arith.constant -2 : i32
    %45 = vector.broadcast %c-2_i32_14 : i32 to vector<1x512xi32>
    %46 = arith.addi %31, %45 : vector<1x512xi32>
    %c16_i32_15 = arith.constant 16 : i32
    %47 = vector.broadcast %c16_i32_15 : i32 to vector<1x512xi32>
    %48 = arith.cmpi slt, %46, %47 : vector<1x512xi32>
    %49 = arith.andi %44, %48 : vector<1x512xi1>
    %c-1_i32 = arith.constant -1 : i32
    %50 = vector.broadcast %c-1_i32 : i32 to vector<1x512xi32>
    %51 = arith.addi %31, %50 : vector<1x512xi32>
    %c0_i32_16 = arith.constant 0 : i32
    %52 = vector.broadcast %c0_i32_16 : i32 to vector<1x512xi32>
    %53 = arith.cmpi sge, %51, %52 : vector<1x512xi32>
    %c-1_i32_17 = arith.constant -1 : i32
    %54 = vector.broadcast %c-1_i32_17 : i32 to vector<1x512xi32>
    %55 = arith.addi %31, %54 : vector<1x512xi32>
    %c16_i32_18 = arith.constant 16 : i32
    %56 = vector.broadcast %c16_i32_18 : i32 to vector<1x512xi32>
    %57 = arith.cmpi slt, %55, %56 : vector<1x512xi32>
    %58 = arith.andi %53, %57 : vector<1x512xi1>
    %c1_i32_19 = arith.constant 1 : i32
    %59 = vector.broadcast %c1_i32_19 : i32 to vector<1x512xi32>
    %60 = arith.addi %31, %59 : vector<1x512xi32>
    %c0_i32_20 = arith.constant 0 : i32
    %61 = vector.broadcast %c0_i32_20 : i32 to vector<1x512xi32>
    %62 = arith.cmpi sge, %60, %61 : vector<1x512xi32>
    %c1_i32_21 = arith.constant 1 : i32
    %63 = vector.broadcast %c1_i32_21 : i32 to vector<1x512xi32>
    %64 = arith.addi %31, %63 : vector<1x512xi32>
    %c16_i32_22 = arith.constant 16 : i32
    %65 = vector.broadcast %c16_i32_22 : i32 to vector<1x512xi32>
    %66 = arith.cmpi slt, %64, %65 : vector<1x512xi32>
    %67 = arith.andi %62, %66 : vector<1x512xi1>
    %c2_i32 = arith.constant 2 : i32
    %68 = vector.broadcast %c2_i32 : i32 to vector<1x512xi32>
    %69 = arith.addi %31, %68 : vector<1x512xi32>
    %c0_i32_23 = arith.constant 0 : i32
    %70 = vector.broadcast %c0_i32_23 : i32 to vector<1x512xi32>
    %71 = arith.cmpi sge, %69, %70 : vector<1x512xi32>
    %c2_i32_24 = arith.constant 2 : i32
    %72 = vector.broadcast %c2_i32_24 : i32 to vector<1x512xi32>
    %73 = arith.addi %31, %72 : vector<1x512xi32>
    %c16_i32_25 = arith.constant 16 : i32
    %74 = vector.broadcast %c16_i32_25 : i32 to vector<1x512xi32>
    %75 = arith.cmpi slt, %73, %74 : vector<1x512xi32>
    %76 = arith.andi %71, %75 : vector<1x512xi1>
    %c3_i32 = arith.constant 3 : i32
    %77 = vector.broadcast %c3_i32 : i32 to vector<1x512xi32>
    %78 = arith.addi %31, %77 : vector<1x512xi32>
    %c0_i32_26 = arith.constant 0 : i32
    %79 = vector.broadcast %c0_i32_26 : i32 to vector<1x512xi32>
    %80 = arith.cmpi sge, %78, %79 : vector<1x512xi32>
    %c3_i32_27 = arith.constant 3 : i32
    %81 = vector.broadcast %c3_i32_27 : i32 to vector<1x512xi32>
    %82 = arith.addi %31, %81 : vector<1x512xi32>
    %c16_i32_28 = arith.constant 16 : i32
    %83 = vector.broadcast %c16_i32_28 : i32 to vector<1x512xi32>
    %84 = arith.cmpi slt, %82, %83 : vector<1x512xi32>
    %85 = arith.andi %80, %84 : vector<1x512xi1>
    %cst_29 = arith.constant 0.000000e+00 : f32
    %86 = vector.broadcast %cst_29 : f32 to vector<1x512xf32>
    %c51_i32 = arith.constant 51 : i32
    %87 = tpu.dynamic_rotate %11 by %c51_i32 dim 1 : vector<1x512xf32>, i32 -> vector<1x512xf32>
    %cst_30 = arith.constant 0.000000e+00 : f32
    %88 = vector.broadcast %cst_30 : f32 to vector<1x512xf32>
    %89 = arith.select %40, %87, %88 : vector<1x512xi1>, vector<1x512xf32>
    %c0_31 = arith.constant 0 : index
    %90 = memref.load %arg1[%c0_31] : memref<98xf32, #tpu.memory_space<smem>>
    %91 = vector.broadcast %90 : f32 to vector<1x512xf32>
    %92 = arith.mulf %91, %89 : vector<1x512xf32>
    %93 = arith.addf %86, %92 : vector<1x512xf32>
    %c50_i32 = arith.constant 50 : i32
    %94 = tpu.dynamic_rotate %11 by %c50_i32 dim 1 : vector<1x512xf32>, i32 -> vector<1x512xf32>
    %cst_32 = arith.constant 0.000000e+00 : f32
    %95 = vector.broadcast %cst_32 : f32 to vector<1x512xf32>
    %96 = arith.select %49, %94, %95 : vector<1x512xi1>, vector<1x512xf32>
    %c1 = arith.constant 1 : index
    %97 = memref.load %arg1[%c1] : memref<98xf32, #tpu.memory_space<smem>>
    %98 = vector.broadcast %97 : f32 to vector<1x512xf32>
    %99 = arith.mulf %98, %96 : vector<1x512xf32>
    %100 = arith.addf %93, %99 : vector<1x512xf32>
    %c49_i32 = arith.constant 49 : i32
    %101 = tpu.dynamic_rotate %11 by %c49_i32 dim 1 : vector<1x512xf32>, i32 -> vector<1x512xf32>
    %cst_33 = arith.constant 0.000000e+00 : f32
    %102 = vector.broadcast %cst_33 : f32 to vector<1x512xf32>
    %103 = arith.select %58, %101, %102 : vector<1x512xi1>, vector<1x512xf32>
    %c2 = arith.constant 2 : index
    %104 = memref.load %arg1[%c2] : memref<98xf32, #tpu.memory_space<smem>>
    %105 = vector.broadcast %104 : f32 to vector<1x512xf32>
    %106 = arith.mulf %105, %103 : vector<1x512xf32>
    %107 = arith.addf %100, %106 : vector<1x512xf32>
    %c48_i32 = arith.constant 48 : i32
    %108 = tpu.dynamic_rotate %11 by %c48_i32 dim 1 : vector<1x512xf32>, i32 -> vector<1x512xf32>
    %c3 = arith.constant 3 : index
    %109 = memref.load %arg1[%c3] : memref<98xf32, #tpu.memory_space<smem>>
    %110 = vector.broadcast %109 : f32 to vector<1x512xf32>
    %111 = arith.mulf %110, %108 : vector<1x512xf32>
    %112 = arith.addf %107, %111 : vector<1x512xf32>
    %c47_i32 = arith.constant 47 : i32
    %113 = tpu.dynamic_rotate %11 by %c47_i32 dim 1 : vector<1x512xf32>, i32 -> vector<1x512xf32>
    %cst_34 = arith.constant 0.000000e+00 : f32
    %114 = vector.broadcast %cst_34 : f32 to vector<1x512xf32>
    %115 = arith.select %67, %113, %114 : vector<1x512xi1>, vector<1x512xf32>
    %c4 = arith.constant 4 : index
    %116 = memref.load %arg1[%c4] : memref<98xf32, #tpu.memory_space<smem>>
    %117 = vector.broadcast %116 : f32 to vector<1x512xf32>
    %118 = arith.mulf %117, %115 : vector<1x512xf32>
    %119 = arith.addf %112, %118 : vector<1x512xf32>
    %c46_i32 = arith.constant 46 : i32
    %120 = tpu.dynamic_rotate %11 by %c46_i32 dim 1 : vector<1x512xf32>, i32 -> vector<1x512xf32>
    %cst_35 = arith.constant 0.000000e+00 : f32
    %121 = vector.broadcast %cst_35 : f32 to vector<1x512xf32>
    %122 = arith.select %76, %120, %121 : vector<1x512xi1>, vector<1x512xf32>
    %c5 = arith.constant 5 : index
    %123 = memref.load %arg1[%c5] : memref<98xf32, #tpu.memory_space<smem>>
    %124 = vector.broadcast %123 : f32 to vector<1x512xf32>
    %125 = arith.mulf %124, %122 : vector<1x512xf32>
    %126 = arith.addf %119, %125 : vector<1x512xf32>
    %c45_i32 = arith.constant 45 : i32
    %127 = tpu.dynamic_rotate %11 by %c45_i32 dim 1 : vector<1x512xf32>, i32 -> vector<1x512xf32>
    %cst_36 = arith.constant 0.000000e+00 : f32
    %128 = vector.broadcast %cst_36 : f32 to vector<1x512xf32>
    %129 = arith.select %85, %127, %128 : vector<1x512xi1>, vector<1x512xf32>
    %c6 = arith.constant 6 : index
    %130 = memref.load %arg1[%c6] : memref<98xf32, #tpu.memory_space<smem>>
    %131 = vector.broadcast %130 : f32 to vector<1x512xf32>
    %132 = arith.mulf %131, %129 : vector<1x512xf32>
    %133 = arith.addf %126, %132 : vector<1x512xf32>
    %c35_i32 = arith.constant 35 : i32
    %134 = tpu.dynamic_rotate %11 by %c35_i32 dim 1 : vector<1x512xf32>, i32 -> vector<1x512xf32>
    %cst_37 = arith.constant 0.000000e+00 : f32
    %135 = vector.broadcast %cst_37 : f32 to vector<1x512xf32>
    %136 = arith.select %40, %134, %135 : vector<1x512xi1>, vector<1x512xf32>
    %c7 = arith.constant 7 : index
    %137 = memref.load %arg1[%c7] : memref<98xf32, #tpu.memory_space<smem>>
    %138 = vector.broadcast %137 : f32 to vector<1x512xf32>
    %139 = arith.mulf %138, %136 : vector<1x512xf32>
    %140 = arith.addf %133, %139 : vector<1x512xf32>
    %c34_i32 = arith.constant 34 : i32
    %141 = tpu.dynamic_rotate %11 by %c34_i32 dim 1 : vector<1x512xf32>, i32 -> vector<1x512xf32>
    %cst_38 = arith.constant 0.000000e+00 : f32
    %142 = vector.broadcast %cst_38 : f32 to vector<1x512xf32>
    %143 = arith.select %49, %141, %142 : vector<1x512xi1>, vector<1x512xf32>
    %c8 = arith.constant 8 : index
    %144 = memref.load %arg1[%c8] : memref<98xf32, #tpu.memory_space<smem>>
    %145 = vector.broadcast %144 : f32 to vector<1x512xf32>
    %146 = arith.mulf %145, %143 : vector<1x512xf32>
    %147 = arith.addf %140, %146 : vector<1x512xf32>
    %c33_i32 = arith.constant 33 : i32
    %148 = tpu.dynamic_rotate %11 by %c33_i32 dim 1 : vector<1x512xf32>, i32 -> vector<1x512xf32>
    %cst_39 = arith.constant 0.000000e+00 : f32
    %149 = vector.broadcast %cst_39 : f32 to vector<1x512xf32>
    %150 = arith.select %58, %148, %149 : vector<1x512xi1>, vector<1x512xf32>
    %c9 = arith.constant 9 : index
    %151 = memref.load %arg1[%c9] : memref<98xf32, #tpu.memory_space<smem>>
    %152 = vector.broadcast %151 : f32 to vector<1x512xf32>
    %153 = arith.mulf %152, %150 : vector<1x512xf32>
    %154 = arith.addf %147, %153 : vector<1x512xf32>
    %c32_i32 = arith.constant 32 : i32
    %155 = tpu.dynamic_rotate %11 by %c32_i32 dim 1 : vector<1x512xf32>, i32 -> vector<1x512xf32>
    %c10 = arith.constant 10 : index
    %156 = memref.load %arg1[%c10] : memref<98xf32, #tpu.memory_space<smem>>
    %157 = vector.broadcast %156 : f32 to vector<1x512xf32>
    %158 = arith.mulf %157, %155 : vector<1x512xf32>
    %159 = arith.addf %154, %158 : vector<1x512xf32>
    %c31_i32 = arith.constant 31 : i32
    %160 = tpu.dynamic_rotate %11 by %c31_i32 dim 1 : vector<1x512xf32>, i32 -> vector<1x512xf32>
    %cst_40 = arith.constant 0.000000e+00 : f32
    %161 = vector.broadcast %cst_40 : f32 to vector<1x512xf32>
    %162 = arith.select %67, %160, %161 : vector<1x512xi1>, vector<1x512xf32>
    %c11 = arith.constant 11 : index
    %163 = memref.load %arg1[%c11] : memref<98xf32, #tpu.memory_space<smem>>
    %164 = vector.broadcast %163 : f32 to vector<1x512xf32>
    %165 = arith.mulf %164, %162 : vector<1x512xf32>
    %166 = arith.addf %159, %165 : vector<1x512xf32>
    %c30_i32 = arith.constant 30 : i32
    %167 = tpu.dynamic_rotate %11 by %c30_i32 dim 1 : vector<1x512xf32>, i32 -> vector<1x512xf32>
    %cst_41 = arith.constant 0.000000e+00 : f32
    %168 = vector.broadcast %cst_41 : f32 to vector<1x512xf32>
    %169 = arith.select %76, %167, %168 : vector<1x512xi1>, vector<1x512xf32>
    %c12 = arith.constant 12 : index
    %170 = memref.load %arg1[%c12] : memref<98xf32, #tpu.memory_space<smem>>
    %171 = vector.broadcast %170 : f32 to vector<1x512xf32>
    %172 = arith.mulf %171, %169 : vector<1x512xf32>
    %173 = arith.addf %166, %172 : vector<1x512xf32>
    %c29_i32 = arith.constant 29 : i32
    %174 = tpu.dynamic_rotate %11 by %c29_i32 dim 1 : vector<1x512xf32>, i32 -> vector<1x512xf32>
    %cst_42 = arith.constant 0.000000e+00 : f32
    %175 = vector.broadcast %cst_42 : f32 to vector<1x512xf32>
    %176 = arith.select %85, %174, %175 : vector<1x512xi1>, vector<1x512xf32>
    %c13 = arith.constant 13 : index
    %177 = memref.load %arg1[%c13] : memref<98xf32, #tpu.memory_space<smem>>
    %178 = vector.broadcast %177 : f32 to vector<1x512xf32>
    %179 = arith.mulf %178, %176 : vector<1x512xf32>
    %180 = arith.addf %173, %179 : vector<1x512xf32>
    %c19_i32 = arith.constant 19 : i32
    %181 = tpu.dynamic_rotate %11 by %c19_i32 dim 1 : vector<1x512xf32>, i32 -> vector<1x512xf32>
    %cst_43 = arith.constant 0.000000e+00 : f32
    %182 = vector.broadcast %cst_43 : f32 to vector<1x512xf32>
    %183 = arith.select %40, %181, %182 : vector<1x512xi1>, vector<1x512xf32>
    %c14 = arith.constant 14 : index
    %184 = memref.load %arg1[%c14] : memref<98xf32, #tpu.memory_space<smem>>
    %185 = vector.broadcast %184 : f32 to vector<1x512xf32>
    %186 = arith.mulf %185, %183 : vector<1x512xf32>
    %187 = arith.addf %180, %186 : vector<1x512xf32>
    %c18_i32 = arith.constant 18 : i32
    %188 = tpu.dynamic_rotate %11 by %c18_i32 dim 1 : vector<1x512xf32>, i32 -> vector<1x512xf32>
    %cst_44 = arith.constant 0.000000e+00 : f32
    %189 = vector.broadcast %cst_44 : f32 to vector<1x512xf32>
    %190 = arith.select %49, %188, %189 : vector<1x512xi1>, vector<1x512xf32>
    %c15 = arith.constant 15 : index
    %191 = memref.load %arg1[%c15] : memref<98xf32, #tpu.memory_space<smem>>
    %192 = vector.broadcast %191 : f32 to vector<1x512xf32>
    %193 = arith.mulf %192, %190 : vector<1x512xf32>
    %194 = arith.addf %187, %193 : vector<1x512xf32>
    %c17_i32 = arith.constant 17 : i32
    %195 = tpu.dynamic_rotate %11 by %c17_i32 dim 1 : vector<1x512xf32>, i32 -> vector<1x512xf32>
    %cst_45 = arith.constant 0.000000e+00 : f32
    %196 = vector.broadcast %cst_45 : f32 to vector<1x512xf32>
    %197 = arith.select %58, %195, %196 : vector<1x512xi1>, vector<1x512xf32>
    %c16 = arith.constant 16 : index
    %198 = memref.load %arg1[%c16] : memref<98xf32, #tpu.memory_space<smem>>
    %199 = vector.broadcast %198 : f32 to vector<1x512xf32>
    %200 = arith.mulf %199, %197 : vector<1x512xf32>
    %201 = arith.addf %194, %200 : vector<1x512xf32>
    %c16_i32_46 = arith.constant 16 : i32
    %202 = tpu.dynamic_rotate %11 by %c16_i32_46 dim 1 : vector<1x512xf32>, i32 -> vector<1x512xf32>
    %c17 = arith.constant 17 : index
    %203 = memref.load %arg1[%c17] : memref<98xf32, #tpu.memory_space<smem>>
    %204 = vector.broadcast %203 : f32 to vector<1x512xf32>
    %205 = arith.mulf %204, %202 : vector<1x512xf32>
    %206 = arith.addf %201, %205 : vector<1x512xf32>
    %c15_i32 = arith.constant 15 : i32
    %207 = tpu.dynamic_rotate %11 by %c15_i32 dim 1 : vector<1x512xf32>, i32 -> vector<1x512xf32>
    %cst_47 = arith.constant 0.000000e+00 : f32
    %208 = vector.broadcast %cst_47 : f32 to vector<1x512xf32>
    %209 = arith.select %67, %207, %208 : vector<1x512xi1>, vector<1x512xf32>
    %c18 = arith.constant 18 : index
    %210 = memref.load %arg1[%c18] : memref<98xf32, #tpu.memory_space<smem>>
    %211 = vector.broadcast %210 : f32 to vector<1x512xf32>
    %212 = arith.mulf %211, %209 : vector<1x512xf32>
    %213 = arith.addf %206, %212 : vector<1x512xf32>
    %c14_i32 = arith.constant 14 : i32
    %214 = tpu.dynamic_rotate %11 by %c14_i32 dim 1 : vector<1x512xf32>, i32 -> vector<1x512xf32>
    %cst_48 = arith.constant 0.000000e+00 : f32
    %215 = vector.broadcast %cst_48 : f32 to vector<1x512xf32>
    %216 = arith.select %76, %214, %215 : vector<1x512xi1>, vector<1x512xf32>
    %c19 = arith.constant 19 : index
    %217 = memref.load %arg1[%c19] : memref<98xf32, #tpu.memory_space<smem>>
    %218 = vector.broadcast %217 : f32 to vector<1x512xf32>
    %219 = arith.mulf %218, %216 : vector<1x512xf32>
    %220 = arith.addf %213, %219 : vector<1x512xf32>
    %c13_i32 = arith.constant 13 : i32
    %221 = tpu.dynamic_rotate %11 by %c13_i32 dim 1 : vector<1x512xf32>, i32 -> vector<1x512xf32>
    %cst_49 = arith.constant 0.000000e+00 : f32
    %222 = vector.broadcast %cst_49 : f32 to vector<1x512xf32>
    %223 = arith.select %85, %221, %222 : vector<1x512xi1>, vector<1x512xf32>
    %c20 = arith.constant 20 : index
    %224 = memref.load %arg1[%c20] : memref<98xf32, #tpu.memory_space<smem>>
    %225 = vector.broadcast %224 : f32 to vector<1x512xf32>
    %226 = arith.mulf %225, %223 : vector<1x512xf32>
    %227 = arith.addf %220, %226 : vector<1x512xf32>
    %c3_i32_50 = arith.constant 3 : i32
    %228 = tpu.dynamic_rotate %11 by %c3_i32_50 dim 1 : vector<1x512xf32>, i32 -> vector<1x512xf32>
    %cst_51 = arith.constant 0.000000e+00 : f32
    %229 = vector.broadcast %cst_51 : f32 to vector<1x512xf32>
    %230 = arith.select %40, %228, %229 : vector<1x512xi1>, vector<1x512xf32>
    %c21 = arith.constant 21 : index
    %231 = memref.load %arg1[%c21] : memref<98xf32, #tpu.memory_space<smem>>
    %232 = vector.broadcast %231 : f32 to vector<1x512xf32>
    %233 = arith.mulf %232, %230 : vector<1x512xf32>
    %234 = arith.addf %227, %233 : vector<1x512xf32>
    %c2_i32_52 = arith.constant 2 : i32
    %235 = tpu.dynamic_rotate %11 by %c2_i32_52 dim 1 : vector<1x512xf32>, i32 -> vector<1x512xf32>
    %cst_53 = arith.constant 0.000000e+00 : f32
    %236 = vector.broadcast %cst_53 : f32 to vector<1x512xf32>
    %237 = arith.select %49, %235, %236 : vector<1x512xi1>, vector<1x512xf32>
    %c22 = arith.constant 22 : index
    %238 = memref.load %arg1[%c22] : memref<98xf32, #tpu.memory_space<smem>>
    %239 = vector.broadcast %238 : f32 to vector<1x512xf32>
    %240 = arith.mulf %239, %237 : vector<1x512xf32>
    %241 = arith.addf %234, %240 : vector<1x512xf32>
    %c1_i32_54 = arith.constant 1 : i32
    %242 = tpu.dynamic_rotate %11 by %c1_i32_54 dim 1 : vector<1x512xf32>, i32 -> vector<1x512xf32>
    %cst_55 = arith.constant 0.000000e+00 : f32
    %243 = vector.broadcast %cst_55 : f32 to vector<1x512xf32>
    %244 = arith.select %58, %242, %243 : vector<1x512xi1>, vector<1x512xf32>
    %c23 = arith.constant 23 : index
    %245 = memref.load %arg1[%c23] : memref<98xf32, #tpu.memory_space<smem>>
    %246 = vector.broadcast %245 : f32 to vector<1x512xf32>
    %247 = arith.mulf %246, %244 : vector<1x512xf32>
    %248 = arith.addf %241, %247 : vector<1x512xf32>
    %c24 = arith.constant 24 : index
    %249 = memref.load %arg1[%c24] : memref<98xf32, #tpu.memory_space<smem>>
    %250 = vector.broadcast %249 : f32 to vector<1x512xf32>
    %251 = arith.mulf %250, %11 : vector<1x512xf32>
    %252 = arith.addf %248, %251 : vector<1x512xf32>
    %c511_i32 = arith.constant 511 : i32
    %253 = tpu.dynamic_rotate %11 by %c511_i32 dim 1 : vector<1x512xf32>, i32 -> vector<1x512xf32>
    %cst_56 = arith.constant 0.000000e+00 : f32
    %254 = vector.broadcast %cst_56 : f32 to vector<1x512xf32>
    %255 = arith.select %67, %253, %254 : vector<1x512xi1>, vector<1x512xf32>
    %c25 = arith.constant 25 : index
    %256 = memref.load %arg1[%c25] : memref<98xf32, #tpu.memory_space<smem>>
    %257 = vector.broadcast %256 : f32 to vector<1x512xf32>
    %258 = arith.mulf %257, %255 : vector<1x512xf32>
    %259 = arith.addf %252, %258 : vector<1x512xf32>
    %c510_i32 = arith.constant 510 : i32
    %260 = tpu.dynamic_rotate %11 by %c510_i32 dim 1 : vector<1x512xf32>, i32 -> vector<1x512xf32>
    %cst_57 = arith.constant 0.000000e+00 : f32
    %261 = vector.broadcast %cst_57 : f32 to vector<1x512xf32>
    %262 = arith.select %76, %260, %261 : vector<1x512xi1>, vector<1x512xf32>
    %c26 = arith.constant 26 : index
    %263 = memref.load %arg1[%c26] : memref<98xf32, #tpu.memory_space<smem>>
    %264 = vector.broadcast %263 : f32 to vector<1x512xf32>
    %265 = arith.mulf %264, %262 : vector<1x512xf32>
    %266 = arith.addf %259, %265 : vector<1x512xf32>
    %c509_i32 = arith.constant 509 : i32
    %267 = tpu.dynamic_rotate %11 by %c509_i32 dim 1 : vector<1x512xf32>, i32 -> vector<1x512xf32>
    %cst_58 = arith.constant 0.000000e+00 : f32
    %268 = vector.broadcast %cst_58 : f32 to vector<1x512xf32>
    %269 = arith.select %85, %267, %268 : vector<1x512xi1>, vector<1x512xf32>
    %c27 = arith.constant 27 : index
    %270 = memref.load %arg1[%c27] : memref<98xf32, #tpu.memory_space<smem>>
    %271 = vector.broadcast %270 : f32 to vector<1x512xf32>
    %272 = arith.mulf %271, %269 : vector<1x512xf32>
    %273 = arith.addf %266, %272 : vector<1x512xf32>
    %c499_i32 = arith.constant 499 : i32
    %274 = tpu.dynamic_rotate %11 by %c499_i32 dim 1 : vector<1x512xf32>, i32 -> vector<1x512xf32>
    %cst_59 = arith.constant 0.000000e+00 : f32
    %275 = vector.broadcast %cst_59 : f32 to vector<1x512xf32>
    %276 = arith.select %40, %274, %275 : vector<1x512xi1>, vector<1x512xf32>
    %c28 = arith.constant 28 : index
    %277 = memref.load %arg1[%c28] : memref<98xf32, #tpu.memory_space<smem>>
    %278 = vector.broadcast %277 : f32 to vector<1x512xf32>
    %279 = arith.mulf %278, %276 : vector<1x512xf32>
    %280 = arith.addf %273, %279 : vector<1x512xf32>
    %c498_i32 = arith.constant 498 : i32
    %281 = tpu.dynamic_rotate %11 by %c498_i32 dim 1 : vector<1x512xf32>, i32 -> vector<1x512xf32>
    %cst_60 = arith.constant 0.000000e+00 : f32
    %282 = vector.broadcast %cst_60 : f32 to vector<1x512xf32>
    %283 = arith.select %49, %281, %282 : vector<1x512xi1>, vector<1x512xf32>
    %c29 = arith.constant 29 : index
    %284 = memref.load %arg1[%c29] : memref<98xf32, #tpu.memory_space<smem>>
    %285 = vector.broadcast %284 : f32 to vector<1x512xf32>
    %286 = arith.mulf %285, %283 : vector<1x512xf32>
    %287 = arith.addf %280, %286 : vector<1x512xf32>
    %c497_i32 = arith.constant 497 : i32
    %288 = tpu.dynamic_rotate %11 by %c497_i32 dim 1 : vector<1x512xf32>, i32 -> vector<1x512xf32>
    %cst_61 = arith.constant 0.000000e+00 : f32
    %289 = vector.broadcast %cst_61 : f32 to vector<1x512xf32>
    %290 = arith.select %58, %288, %289 : vector<1x512xi1>, vector<1x512xf32>
    %c30 = arith.constant 30 : index
    %291 = memref.load %arg1[%c30] : memref<98xf32, #tpu.memory_space<smem>>
    %292 = vector.broadcast %291 : f32 to vector<1x512xf32>
    %293 = arith.mulf %292, %290 : vector<1x512xf32>
    %294 = arith.addf %287, %293 : vector<1x512xf32>
    %c496_i32 = arith.constant 496 : i32
    %295 = tpu.dynamic_rotate %11 by %c496_i32 dim 1 : vector<1x512xf32>, i32 -> vector<1x512xf32>
    %c31 = arith.constant 31 : index
    %296 = memref.load %arg1[%c31] : memref<98xf32, #tpu.memory_space<smem>>
    %297 = vector.broadcast %296 : f32 to vector<1x512xf32>
    %298 = arith.mulf %297, %295 : vector<1x512xf32>
    %299 = arith.addf %294, %298 : vector<1x512xf32>
    %c495_i32 = arith.constant 495 : i32
    %300 = tpu.dynamic_rotate %11 by %c495_i32 dim 1 : vector<1x512xf32>, i32 -> vector<1x512xf32>
    %cst_62 = arith.constant 0.000000e+00 : f32
    %301 = vector.broadcast %cst_62 : f32 to vector<1x512xf32>
    %302 = arith.select %67, %300, %301 : vector<1x512xi1>, vector<1x512xf32>
    %c32 = arith.constant 32 : index
    %303 = memref.load %arg1[%c32] : memref<98xf32, #tpu.memory_space<smem>>
    %304 = vector.broadcast %303 : f32 to vector<1x512xf32>
    %305 = arith.mulf %304, %302 : vector<1x512xf32>
    %306 = arith.addf %299, %305 : vector<1x512xf32>
    %c494_i32 = arith.constant 494 : i32
    %307 = tpu.dynamic_rotate %11 by %c494_i32 dim 1 : vector<1x512xf32>, i32 -> vector<1x512xf32>
    %cst_63 = arith.constant 0.000000e+00 : f32
    %308 = vector.broadcast %cst_63 : f32 to vector<1x512xf32>
    %309 = arith.select %76, %307, %308 : vector<1x512xi1>, vector<1x512xf32>
    %c33 = arith.constant 33 : index
    %310 = memref.load %arg1[%c33] : memref<98xf32, #tpu.memory_space<smem>>
    %311 = vector.broadcast %310 : f32 to vector<1x512xf32>
    %312 = arith.mulf %311, %309 : vector<1x512xf32>
    %313 = arith.addf %306, %312 : vector<1x512xf32>
    %c493_i32 = arith.constant 493 : i32
    %314 = tpu.dynamic_rotate %11 by %c493_i32 dim 1 : vector<1x512xf32>, i32 -> vector<1x512xf32>
    %cst_64 = arith.constant 0.000000e+00 : f32
    %315 = vector.broadcast %cst_64 : f32 to vector<1x512xf32>
    %316 = arith.select %85, %314, %315 : vector<1x512xi1>, vector<1x512xf32>
    %c34 = arith.constant 34 : index
    %317 = memref.load %arg1[%c34] : memref<98xf32, #tpu.memory_space<smem>>
    %318 = vector.broadcast %317 : f32 to vector<1x512xf32>
    %319 = arith.mulf %318, %316 : vector<1x512xf32>
    %320 = arith.addf %313, %319 : vector<1x512xf32>
    %c483_i32 = arith.constant 483 : i32
    %321 = tpu.dynamic_rotate %11 by %c483_i32 dim 1 : vector<1x512xf32>, i32 -> vector<1x512xf32>
    %cst_65 = arith.constant 0.000000e+00 : f32
    %322 = vector.broadcast %cst_65 : f32 to vector<1x512xf32>
    %323 = arith.select %40, %321, %322 : vector<1x512xi1>, vector<1x512xf32>
    %c35 = arith.constant 35 : index
    %324 = memref.load %arg1[%c35] : memref<98xf32, #tpu.memory_space<smem>>
    %325 = vector.broadcast %324 : f32 to vector<1x512xf32>
    %326 = arith.mulf %325, %323 : vector<1x512xf32>
    %327 = arith.addf %320, %326 : vector<1x512xf32>
    %c482_i32 = arith.constant 482 : i32
    %328 = tpu.dynamic_rotate %11 by %c482_i32 dim 1 : vector<1x512xf32>, i32 -> vector<1x512xf32>
    %cst_66 = arith.constant 0.000000e+00 : f32
    %329 = vector.broadcast %cst_66 : f32 to vector<1x512xf32>
    %330 = arith.select %49, %328, %329 : vector<1x512xi1>, vector<1x512xf32>
    %c36 = arith.constant 36 : index
    %331 = memref.load %arg1[%c36] : memref<98xf32, #tpu.memory_space<smem>>
    %332 = vector.broadcast %331 : f32 to vector<1x512xf32>
    %333 = arith.mulf %332, %330 : vector<1x512xf32>
    %334 = arith.addf %327, %333 : vector<1x512xf32>
    %c481_i32 = arith.constant 481 : i32
    %335 = tpu.dynamic_rotate %11 by %c481_i32 dim 1 : vector<1x512xf32>, i32 -> vector<1x512xf32>
    %cst_67 = arith.constant 0.000000e+00 : f32
    %336 = vector.broadcast %cst_67 : f32 to vector<1x512xf32>
    %337 = arith.select %58, %335, %336 : vector<1x512xi1>, vector<1x512xf32>
    %c37 = arith.constant 37 : index
    %338 = memref.load %arg1[%c37] : memref<98xf32, #tpu.memory_space<smem>>
    %339 = vector.broadcast %338 : f32 to vector<1x512xf32>
    %340 = arith.mulf %339, %337 : vector<1x512xf32>
    %341 = arith.addf %334, %340 : vector<1x512xf32>
    %c480_i32 = arith.constant 480 : i32
    %342 = tpu.dynamic_rotate %11 by %c480_i32 dim 1 : vector<1x512xf32>, i32 -> vector<1x512xf32>
    %c38 = arith.constant 38 : index
    %343 = memref.load %arg1[%c38] : memref<98xf32, #tpu.memory_space<smem>>
    %344 = vector.broadcast %343 : f32 to vector<1x512xf32>
    %345 = arith.mulf %344, %342 : vector<1x512xf32>
    %346 = arith.addf %341, %345 : vector<1x512xf32>
    %c479_i32 = arith.constant 479 : i32
    %347 = tpu.dynamic_rotate %11 by %c479_i32 dim 1 : vector<1x512xf32>, i32 -> vector<1x512xf32>
    %cst_68 = arith.constant 0.000000e+00 : f32
    %348 = vector.broadcast %cst_68 : f32 to vector<1x512xf32>
    %349 = arith.select %67, %347, %348 : vector<1x512xi1>, vector<1x512xf32>
    %c39 = arith.constant 39 : index
    %350 = memref.load %arg1[%c39] : memref<98xf32, #tpu.memory_space<smem>>
    %351 = vector.broadcast %350 : f32 to vector<1x512xf32>
    %352 = arith.mulf %351, %349 : vector<1x512xf32>
    %353 = arith.addf %346, %352 : vector<1x512xf32>
    %c478_i32 = arith.constant 478 : i32
    %354 = tpu.dynamic_rotate %11 by %c478_i32 dim 1 : vector<1x512xf32>, i32 -> vector<1x512xf32>
    %cst_69 = arith.constant 0.000000e+00 : f32
    %355 = vector.broadcast %cst_69 : f32 to vector<1x512xf32>
    %356 = arith.select %76, %354, %355 : vector<1x512xi1>, vector<1x512xf32>
    %c40 = arith.constant 40 : index
    %357 = memref.load %arg1[%c40] : memref<98xf32, #tpu.memory_space<smem>>
    %358 = vector.broadcast %357 : f32 to vector<1x512xf32>
    %359 = arith.mulf %358, %356 : vector<1x512xf32>
    %360 = arith.addf %353, %359 : vector<1x512xf32>
    %c477_i32 = arith.constant 477 : i32
    %361 = tpu.dynamic_rotate %11 by %c477_i32 dim 1 : vector<1x512xf32>, i32 -> vector<1x512xf32>
    %cst_70 = arith.constant 0.000000e+00 : f32
    %362 = vector.broadcast %cst_70 : f32 to vector<1x512xf32>
    %363 = arith.select %85, %361, %362 : vector<1x512xi1>, vector<1x512xf32>
    %c41 = arith.constant 41 : index
    %364 = memref.load %arg1[%c41] : memref<98xf32, #tpu.memory_space<smem>>
    %365 = vector.broadcast %364 : f32 to vector<1x512xf32>
    %366 = arith.mulf %365, %363 : vector<1x512xf32>
    %367 = arith.addf %360, %366 : vector<1x512xf32>
    %c467_i32 = arith.constant 467 : i32
    %368 = tpu.dynamic_rotate %11 by %c467_i32 dim 1 : vector<1x512xf32>, i32 -> vector<1x512xf32>
    %cst_71 = arith.constant 0.000000e+00 : f32
    %369 = vector.broadcast %cst_71 : f32 to vector<1x512xf32>
    %370 = arith.select %40, %368, %369 : vector<1x512xi1>, vector<1x512xf32>
    %c42 = arith.constant 42 : index
    %371 = memref.load %arg1[%c42] : memref<98xf32, #tpu.memory_space<smem>>
    %372 = vector.broadcast %371 : f32 to vector<1x512xf32>
    %373 = arith.mulf %372, %370 : vector<1x512xf32>
    %374 = arith.addf %367, %373 : vector<1x512xf32>
    %c466_i32 = arith.constant 466 : i32
    %375 = tpu.dynamic_rotate %11 by %c466_i32 dim 1 : vector<1x512xf32>, i32 -> vector<1x512xf32>
    %cst_72 = arith.constant 0.000000e+00 : f32
    %376 = vector.broadcast %cst_72 : f32 to vector<1x512xf32>
    %377 = arith.select %49, %375, %376 : vector<1x512xi1>, vector<1x512xf32>
    %c43 = arith.constant 43 : index
    %378 = memref.load %arg1[%c43] : memref<98xf32, #tpu.memory_space<smem>>
    %379 = vector.broadcast %378 : f32 to vector<1x512xf32>
    %380 = arith.mulf %379, %377 : vector<1x512xf32>
    %381 = arith.addf %374, %380 : vector<1x512xf32>
    %c465_i32 = arith.constant 465 : i32
    %382 = tpu.dynamic_rotate %11 by %c465_i32 dim 1 : vector<1x512xf32>, i32 -> vector<1x512xf32>
    %cst_73 = arith.constant 0.000000e+00 : f32
    %383 = vector.broadcast %cst_73 : f32 to vector<1x512xf32>
    %384 = arith.select %58, %382, %383 : vector<1x512xi1>, vector<1x512xf32>
    %c44 = arith.constant 44 : index
    %385 = memref.load %arg1[%c44] : memref<98xf32, #tpu.memory_space<smem>>
    %386 = vector.broadcast %385 : f32 to vector<1x512xf32>
    %387 = arith.mulf %386, %384 : vector<1x512xf32>
    %388 = arith.addf %381, %387 : vector<1x512xf32>
    %c464_i32 = arith.constant 464 : i32
    %389 = tpu.dynamic_rotate %11 by %c464_i32 dim 1 : vector<1x512xf32>, i32 -> vector<1x512xf32>
    %c45 = arith.constant 45 : index
    %390 = memref.load %arg1[%c45] : memref<98xf32, #tpu.memory_space<smem>>
    %391 = vector.broadcast %390 : f32 to vector<1x512xf32>
    %392 = arith.mulf %391, %389 : vector<1x512xf32>
    %393 = arith.addf %388, %392 : vector<1x512xf32>
    %c463_i32 = arith.constant 463 : i32
    %394 = tpu.dynamic_rotate %11 by %c463_i32 dim 1 : vector<1x512xf32>, i32 -> vector<1x512xf32>
    %cst_74 = arith.constant 0.000000e+00 : f32
    %395 = vector.broadcast %cst_74 : f32 to vector<1x512xf32>
    %396 = arith.select %67, %394, %395 : vector<1x512xi1>, vector<1x512xf32>
    %c46 = arith.constant 46 : index
    %397 = memref.load %arg1[%c46] : memref<98xf32, #tpu.memory_space<smem>>
    %398 = vector.broadcast %397 : f32 to vector<1x512xf32>
    %399 = arith.mulf %398, %396 : vector<1x512xf32>
    %400 = arith.addf %393, %399 : vector<1x512xf32>
    %c462_i32 = arith.constant 462 : i32
    %401 = tpu.dynamic_rotate %11 by %c462_i32 dim 1 : vector<1x512xf32>, i32 -> vector<1x512xf32>
    %cst_75 = arith.constant 0.000000e+00 : f32
    %402 = vector.broadcast %cst_75 : f32 to vector<1x512xf32>
    %403 = arith.select %76, %401, %402 : vector<1x512xi1>, vector<1x512xf32>
    %c47 = arith.constant 47 : index
    %404 = memref.load %arg1[%c47] : memref<98xf32, #tpu.memory_space<smem>>
    %405 = vector.broadcast %404 : f32 to vector<1x512xf32>
    %406 = arith.mulf %405, %403 : vector<1x512xf32>
    %407 = arith.addf %400, %406 : vector<1x512xf32>
    %c461_i32 = arith.constant 461 : i32
    %408 = tpu.dynamic_rotate %11 by %c461_i32 dim 1 : vector<1x512xf32>, i32 -> vector<1x512xf32>
    %cst_76 = arith.constant 0.000000e+00 : f32
    %409 = vector.broadcast %cst_76 : f32 to vector<1x512xf32>
    %410 = arith.select %85, %408, %409 : vector<1x512xi1>, vector<1x512xf32>
    %c48 = arith.constant 48 : index
    %411 = memref.load %arg1[%c48] : memref<98xf32, #tpu.memory_space<smem>>
    %412 = vector.broadcast %411 : f32 to vector<1x512xf32>
    %413 = arith.mulf %412, %410 : vector<1x512xf32>
    %414 = arith.addf %407, %413 : vector<1x512xf32>
    %c51_i32_77 = arith.constant 51 : i32
    %415 = tpu.dynamic_rotate %12 by %c51_i32_77 dim 1 : vector<1x512xf32>, i32 -> vector<1x512xf32>
    %cst_78 = arith.constant 0.000000e+00 : f32
    %416 = vector.broadcast %cst_78 : f32 to vector<1x512xf32>
    %417 = arith.select %40, %415, %416 : vector<1x512xi1>, vector<1x512xf32>
    %c49 = arith.constant 49 : index
    %418 = memref.load %arg1[%c49] : memref<98xf32, #tpu.memory_space<smem>>
    %419 = vector.broadcast %418 : f32 to vector<1x512xf32>
    %420 = arith.mulf %419, %417 : vector<1x512xf32>
    %421 = arith.addf %414, %420 : vector<1x512xf32>
    %c50_i32_79 = arith.constant 50 : i32
    %422 = tpu.dynamic_rotate %12 by %c50_i32_79 dim 1 : vector<1x512xf32>, i32 -> vector<1x512xf32>
    %cst_80 = arith.constant 0.000000e+00 : f32
    %423 = vector.broadcast %cst_80 : f32 to vector<1x512xf32>
    %424 = arith.select %49, %422, %423 : vector<1x512xi1>, vector<1x512xf32>
    %c50 = arith.constant 50 : index
    %425 = memref.load %arg1[%c50] : memref<98xf32, #tpu.memory_space<smem>>
    %426 = vector.broadcast %425 : f32 to vector<1x512xf32>
    %427 = arith.mulf %426, %424 : vector<1x512xf32>
    %428 = arith.addf %421, %427 : vector<1x512xf32>
    %c49_i32_81 = arith.constant 49 : i32
    %429 = tpu.dynamic_rotate %12 by %c49_i32_81 dim 1 : vector<1x512xf32>, i32 -> vector<1x512xf32>
    %cst_82 = arith.constant 0.000000e+00 : f32
    %430 = vector.broadcast %cst_82 : f32 to vector<1x512xf32>
    %431 = arith.select %58, %429, %430 : vector<1x512xi1>, vector<1x512xf32>
    %c51 = arith.constant 51 : index
    %432 = memref.load %arg1[%c51] : memref<98xf32, #tpu.memory_space<smem>>
    %433 = vector.broadcast %432 : f32 to vector<1x512xf32>
    %434 = arith.mulf %433, %431 : vector<1x512xf32>
    %435 = arith.addf %428, %434 : vector<1x512xf32>
    %c48_i32_83 = arith.constant 48 : i32
    %436 = tpu.dynamic_rotate %12 by %c48_i32_83 dim 1 : vector<1x512xf32>, i32 -> vector<1x512xf32>
    %c52 = arith.constant 52 : index
    %437 = memref.load %arg1[%c52] : memref<98xf32, #tpu.memory_space<smem>>
    %438 = vector.broadcast %437 : f32 to vector<1x512xf32>
    %439 = arith.mulf %438, %436 : vector<1x512xf32>
    %440 = arith.addf %435, %439 : vector<1x512xf32>
    %c47_i32_84 = arith.constant 47 : i32
    %441 = tpu.dynamic_rotate %12 by %c47_i32_84 dim 1 : vector<1x512xf32>, i32 -> vector<1x512xf32>
    %cst_85 = arith.constant 0.000000e+00 : f32
    %442 = vector.broadcast %cst_85 : f32 to vector<1x512xf32>
    %443 = arith.select %67, %441, %442 : vector<1x512xi1>, vector<1x512xf32>
    %c53 = arith.constant 53 : index
    %444 = memref.load %arg1[%c53] : memref<98xf32, #tpu.memory_space<smem>>
    %445 = vector.broadcast %444 : f32 to vector<1x512xf32>
    %446 = arith.mulf %445, %443 : vector<1x512xf32>
    %447 = arith.addf %440, %446 : vector<1x512xf32>
    %c46_i32_86 = arith.constant 46 : i32
    %448 = tpu.dynamic_rotate %12 by %c46_i32_86 dim 1 : vector<1x512xf32>, i32 -> vector<1x512xf32>
    %cst_87 = arith.constant 0.000000e+00 : f32
    %449 = vector.broadcast %cst_87 : f32 to vector<1x512xf32>
    %450 = arith.select %76, %448, %449 : vector<1x512xi1>, vector<1x512xf32>
    %c54 = arith.constant 54 : index
    %451 = memref.load %arg1[%c54] : memref<98xf32, #tpu.memory_space<smem>>
    %452 = vector.broadcast %451 : f32 to vector<1x512xf32>
    %453 = arith.mulf %452, %450 : vector<1x512xf32>
    %454 = arith.addf %447, %453 : vector<1x512xf32>
    %c45_i32_88 = arith.constant 45 : i32
    %455 = tpu.dynamic_rotate %12 by %c45_i32_88 dim 1 : vector<1x512xf32>, i32 -> vector<1x512xf32>
    %cst_89 = arith.constant 0.000000e+00 : f32
    %456 = vector.broadcast %cst_89 : f32 to vector<1x512xf32>
    %457 = arith.select %85, %455, %456 : vector<1x512xi1>, vector<1x512xf32>
    %c55 = arith.constant 55 : index
    %458 = memref.load %arg1[%c55] : memref<98xf32, #tpu.memory_space<smem>>
    %459 = vector.broadcast %458 : f32 to vector<1x512xf32>
    %460 = arith.mulf %459, %457 : vector<1x512xf32>
    %461 = arith.addf %454, %460 : vector<1x512xf32>
    %c35_i32_90 = arith.constant 35 : i32
    %462 = tpu.dynamic_rotate %12 by %c35_i32_90 dim 1 : vector<1x512xf32>, i32 -> vector<1x512xf32>
    %cst_91 = arith.constant 0.000000e+00 : f32
    %463 = vector.broadcast %cst_91 : f32 to vector<1x512xf32>
    %464 = arith.select %40, %462, %463 : vector<1x512xi1>, vector<1x512xf32>
    %c56 = arith.constant 56 : index
    %465 = memref.load %arg1[%c56] : memref<98xf32, #tpu.memory_space<smem>>
    %466 = vector.broadcast %465 : f32 to vector<1x512xf32>
    %467 = arith.mulf %466, %464 : vector<1x512xf32>
    %468 = arith.addf %461, %467 : vector<1x512xf32>
    %c34_i32_92 = arith.constant 34 : i32
    %469 = tpu.dynamic_rotate %12 by %c34_i32_92 dim 1 : vector<1x512xf32>, i32 -> vector<1x512xf32>
    %cst_93 = arith.constant 0.000000e+00 : f32
    %470 = vector.broadcast %cst_93 : f32 to vector<1x512xf32>
    %471 = arith.select %49, %469, %470 : vector<1x512xi1>, vector<1x512xf32>
    %c57 = arith.constant 57 : index
    %472 = memref.load %arg1[%c57] : memref<98xf32, #tpu.memory_space<smem>>
    %473 = vector.broadcast %472 : f32 to vector<1x512xf32>
    %474 = arith.mulf %473, %471 : vector<1x512xf32>
    %475 = arith.addf %468, %474 : vector<1x512xf32>
    %c33_i32_94 = arith.constant 33 : i32
    %476 = tpu.dynamic_rotate %12 by %c33_i32_94 dim 1 : vector<1x512xf32>, i32 -> vector<1x512xf32>
    %cst_95 = arith.constant 0.000000e+00 : f32
    %477 = vector.broadcast %cst_95 : f32 to vector<1x512xf32>
    %478 = arith.select %58, %476, %477 : vector<1x512xi1>, vector<1x512xf32>
    %c58 = arith.constant 58 : index
    %479 = memref.load %arg1[%c58] : memref<98xf32, #tpu.memory_space<smem>>
    %480 = vector.broadcast %479 : f32 to vector<1x512xf32>
    %481 = arith.mulf %480, %478 : vector<1x512xf32>
    %482 = arith.addf %475, %481 : vector<1x512xf32>
    %c32_i32_96 = arith.constant 32 : i32
    %483 = tpu.dynamic_rotate %12 by %c32_i32_96 dim 1 : vector<1x512xf32>, i32 -> vector<1x512xf32>
    %c59 = arith.constant 59 : index
    %484 = memref.load %arg1[%c59] : memref<98xf32, #tpu.memory_space<smem>>
    %485 = vector.broadcast %484 : f32 to vector<1x512xf32>
    %486 = arith.mulf %485, %483 : vector<1x512xf32>
    %487 = arith.addf %482, %486 : vector<1x512xf32>
    %c31_i32_97 = arith.constant 31 : i32
    %488 = tpu.dynamic_rotate %12 by %c31_i32_97 dim 1 : vector<1x512xf32>, i32 -> vector<1x512xf32>
    %cst_98 = arith.constant 0.000000e+00 : f32
    %489 = vector.broadcast %cst_98 : f32 to vector<1x512xf32>
    %490 = arith.select %67, %488, %489 : vector<1x512xi1>, vector<1x512xf32>
    %c60 = arith.constant 60 : index
    %491 = memref.load %arg1[%c60] : memref<98xf32, #tpu.memory_space<smem>>
    %492 = vector.broadcast %491 : f32 to vector<1x512xf32>
    %493 = arith.mulf %492, %490 : vector<1x512xf32>
    %494 = arith.addf %487, %493 : vector<1x512xf32>
    %c30_i32_99 = arith.constant 30 : i32
    %495 = tpu.dynamic_rotate %12 by %c30_i32_99 dim 1 : vector<1x512xf32>, i32 -> vector<1x512xf32>
    %cst_100 = arith.constant 0.000000e+00 : f32
    %496 = vector.broadcast %cst_100 : f32 to vector<1x512xf32>
    %497 = arith.select %76, %495, %496 : vector<1x512xi1>, vector<1x512xf32>
    %c61 = arith.constant 61 : index
    %498 = memref.load %arg1[%c61] : memref<98xf32, #tpu.memory_space<smem>>
    %499 = vector.broadcast %498 : f32 to vector<1x512xf32>
    %500 = arith.mulf %499, %497 : vector<1x512xf32>
    %501 = arith.addf %494, %500 : vector<1x512xf32>
    %c29_i32_101 = arith.constant 29 : i32
    %502 = tpu.dynamic_rotate %12 by %c29_i32_101 dim 1 : vector<1x512xf32>, i32 -> vector<1x512xf32>
    %cst_102 = arith.constant 0.000000e+00 : f32
    %503 = vector.broadcast %cst_102 : f32 to vector<1x512xf32>
    %504 = arith.select %85, %502, %503 : vector<1x512xi1>, vector<1x512xf32>
    %c62 = arith.constant 62 : index
    %505 = memref.load %arg1[%c62] : memref<98xf32, #tpu.memory_space<smem>>
    %506 = vector.broadcast %505 : f32 to vector<1x512xf32>
    %507 = arith.mulf %506, %504 : vector<1x512xf32>
    %508 = arith.addf %501, %507 : vector<1x512xf32>
    %c19_i32_103 = arith.constant 19 : i32
    %509 = tpu.dynamic_rotate %12 by %c19_i32_103 dim 1 : vector<1x512xf32>, i32 -> vector<1x512xf32>
    %cst_104 = arith.constant 0.000000e+00 : f32
    %510 = vector.broadcast %cst_104 : f32 to vector<1x512xf32>
    %511 = arith.select %40, %509, %510 : vector<1x512xi1>, vector<1x512xf32>
    %c63 = arith.constant 63 : index
    %512 = memref.load %arg1[%c63] : memref<98xf32, #tpu.memory_space<smem>>
    %513 = vector.broadcast %512 : f32 to vector<1x512xf32>
    %514 = arith.mulf %513, %511 : vector<1x512xf32>
    %515 = arith.addf %508, %514 : vector<1x512xf32>
    %c18_i32_105 = arith.constant 18 : i32
    %516 = tpu.dynamic_rotate %12 by %c18_i32_105 dim 1 : vector<1x512xf32>, i32 -> vector<1x512xf32>
    %cst_106 = arith.constant 0.000000e+00 : f32
    %517 = vector.broadcast %cst_106 : f32 to vector<1x512xf32>
    %518 = arith.select %49, %516, %517 : vector<1x512xi1>, vector<1x512xf32>
    %c64 = arith.constant 64 : index
    %519 = memref.load %arg1[%c64] : memref<98xf32, #tpu.memory_space<smem>>
    %520 = vector.broadcast %519 : f32 to vector<1x512xf32>
    %521 = arith.mulf %520, %518 : vector<1x512xf32>
    %522 = arith.addf %515, %521 : vector<1x512xf32>
    %c17_i32_107 = arith.constant 17 : i32
    %523 = tpu.dynamic_rotate %12 by %c17_i32_107 dim 1 : vector<1x512xf32>, i32 -> vector<1x512xf32>
    %cst_108 = arith.constant 0.000000e+00 : f32
    %524 = vector.broadcast %cst_108 : f32 to vector<1x512xf32>
    %525 = arith.select %58, %523, %524 : vector<1x512xi1>, vector<1x512xf32>
    %c65 = arith.constant 65 : index
    %526 = memref.load %arg1[%c65] : memref<98xf32, #tpu.memory_space<smem>>
    %527 = vector.broadcast %526 : f32 to vector<1x512xf32>
    %528 = arith.mulf %527, %525 : vector<1x512xf32>
    %529 = arith.addf %522, %528 : vector<1x512xf32>
    %c16_i32_109 = arith.constant 16 : i32
    %530 = tpu.dynamic_rotate %12 by %c16_i32_109 dim 1 : vector<1x512xf32>, i32 -> vector<1x512xf32>
    %c66 = arith.constant 66 : index
    %531 = memref.load %arg1[%c66] : memref<98xf32, #tpu.memory_space<smem>>
    %532 = vector.broadcast %531 : f32 to vector<1x512xf32>
    %533 = arith.mulf %532, %530 : vector<1x512xf32>
    %534 = arith.addf %529, %533 : vector<1x512xf32>
    %c15_i32_110 = arith.constant 15 : i32
    %535 = tpu.dynamic_rotate %12 by %c15_i32_110 dim 1 : vector<1x512xf32>, i32 -> vector<1x512xf32>
    %cst_111 = arith.constant 0.000000e+00 : f32
    %536 = vector.broadcast %cst_111 : f32 to vector<1x512xf32>
    %537 = arith.select %67, %535, %536 : vector<1x512xi1>, vector<1x512xf32>
    %c67 = arith.constant 67 : index
    %538 = memref.load %arg1[%c67] : memref<98xf32, #tpu.memory_space<smem>>
    %539 = vector.broadcast %538 : f32 to vector<1x512xf32>
    %540 = arith.mulf %539, %537 : vector<1x512xf32>
    %541 = arith.addf %534, %540 : vector<1x512xf32>
    %c14_i32_112 = arith.constant 14 : i32
    %542 = tpu.dynamic_rotate %12 by %c14_i32_112 dim 1 : vector<1x512xf32>, i32 -> vector<1x512xf32>
    %cst_113 = arith.constant 0.000000e+00 : f32
    %543 = vector.broadcast %cst_113 : f32 to vector<1x512xf32>
    %544 = arith.select %76, %542, %543 : vector<1x512xi1>, vector<1x512xf32>
    %c68 = arith.constant 68 : index
    %545 = memref.load %arg1[%c68] : memref<98xf32, #tpu.memory_space<smem>>
    %546 = vector.broadcast %545 : f32 to vector<1x512xf32>
    %547 = arith.mulf %546, %544 : vector<1x512xf32>
    %548 = arith.addf %541, %547 : vector<1x512xf32>
    %c13_i32_114 = arith.constant 13 : i32
    %549 = tpu.dynamic_rotate %12 by %c13_i32_114 dim 1 : vector<1x512xf32>, i32 -> vector<1x512xf32>
    %cst_115 = arith.constant 0.000000e+00 : f32
    %550 = vector.broadcast %cst_115 : f32 to vector<1x512xf32>
    %551 = arith.select %85, %549, %550 : vector<1x512xi1>, vector<1x512xf32>
    %c69 = arith.constant 69 : index
    %552 = memref.load %arg1[%c69] : memref<98xf32, #tpu.memory_space<smem>>
    %553 = vector.broadcast %552 : f32 to vector<1x512xf32>
    %554 = arith.mulf %553, %551 : vector<1x512xf32>
    %555 = arith.addf %548, %554 : vector<1x512xf32>
    %c3_i32_116 = arith.constant 3 : i32
    %556 = tpu.dynamic_rotate %12 by %c3_i32_116 dim 1 : vector<1x512xf32>, i32 -> vector<1x512xf32>
    %cst_117 = arith.constant 0.000000e+00 : f32
    %557 = vector.broadcast %cst_117 : f32 to vector<1x512xf32>
    %558 = arith.select %40, %556, %557 : vector<1x512xi1>, vector<1x512xf32>
    %c70 = arith.constant 70 : index
    %559 = memref.load %arg1[%c70] : memref<98xf32, #tpu.memory_space<smem>>
    %560 = vector.broadcast %559 : f32 to vector<1x512xf32>
    %561 = arith.mulf %560, %558 : vector<1x512xf32>
    %562 = arith.addf %555, %561 : vector<1x512xf32>
    %c2_i32_118 = arith.constant 2 : i32
    %563 = tpu.dynamic_rotate %12 by %c2_i32_118 dim 1 : vector<1x512xf32>, i32 -> vector<1x512xf32>
    %cst_119 = arith.constant 0.000000e+00 : f32
    %564 = vector.broadcast %cst_119 : f32 to vector<1x512xf32>
    %565 = arith.select %49, %563, %564 : vector<1x512xi1>, vector<1x512xf32>
    %c71 = arith.constant 71 : index
    %566 = memref.load %arg1[%c71] : memref<98xf32, #tpu.memory_space<smem>>
    %567 = vector.broadcast %566 : f32 to vector<1x512xf32>
    %568 = arith.mulf %567, %565 : vector<1x512xf32>
    %569 = arith.addf %562, %568 : vector<1x512xf32>
    %c1_i32_120 = arith.constant 1 : i32
    %570 = tpu.dynamic_rotate %12 by %c1_i32_120 dim 1 : vector<1x512xf32>, i32 -> vector<1x512xf32>
    %cst_121 = arith.constant 0.000000e+00 : f32
    %571 = vector.broadcast %cst_121 : f32 to vector<1x512xf32>
    %572 = arith.select %58, %570, %571 : vector<1x512xi1>, vector<1x512xf32>
    %c72 = arith.constant 72 : index
    %573 = memref.load %arg1[%c72] : memref<98xf32, #tpu.memory_space<smem>>
    %574 = vector.broadcast %573 : f32 to vector<1x512xf32>
    %575 = arith.mulf %574, %572 : vector<1x512xf32>
    %576 = arith.addf %569, %575 : vector<1x512xf32>
    %c73 = arith.constant 73 : index
    %577 = memref.load %arg1[%c73] : memref<98xf32, #tpu.memory_space<smem>>
    %578 = vector.broadcast %577 : f32 to vector<1x512xf32>
    %579 = arith.mulf %578, %12 : vector<1x512xf32>
    %580 = arith.addf %576, %579 : vector<1x512xf32>
    %c511_i32_122 = arith.constant 511 : i32
    %581 = tpu.dynamic_rotate %12 by %c511_i32_122 dim 1 : vector<1x512xf32>, i32 -> vector<1x512xf32>
    %cst_123 = arith.constant 0.000000e+00 : f32
    %582 = vector.broadcast %cst_123 : f32 to vector<1x512xf32>
    %583 = arith.select %67, %581, %582 : vector<1x512xi1>, vector<1x512xf32>
    %c74 = arith.constant 74 : index
    %584 = memref.load %arg1[%c74] : memref<98xf32, #tpu.memory_space<smem>>
    %585 = vector.broadcast %584 : f32 to vector<1x512xf32>
    %586 = arith.mulf %585, %583 : vector<1x512xf32>
    %587 = arith.addf %580, %586 : vector<1x512xf32>
    %c510_i32_124 = arith.constant 510 : i32
    %588 = tpu.dynamic_rotate %12 by %c510_i32_124 dim 1 : vector<1x512xf32>, i32 -> vector<1x512xf32>
    %cst_125 = arith.constant 0.000000e+00 : f32
    %589 = vector.broadcast %cst_125 : f32 to vector<1x512xf32>
    %590 = arith.select %76, %588, %589 : vector<1x512xi1>, vector<1x512xf32>
    %c75 = arith.constant 75 : index
    %591 = memref.load %arg1[%c75] : memref<98xf32, #tpu.memory_space<smem>>
    %592 = vector.broadcast %591 : f32 to vector<1x512xf32>
    %593 = arith.mulf %592, %590 : vector<1x512xf32>
    %594 = arith.addf %587, %593 : vector<1x512xf32>
    %c509_i32_126 = arith.constant 509 : i32
    %595 = tpu.dynamic_rotate %12 by %c509_i32_126 dim 1 : vector<1x512xf32>, i32 -> vector<1x512xf32>
    %cst_127 = arith.constant 0.000000e+00 : f32
    %596 = vector.broadcast %cst_127 : f32 to vector<1x512xf32>
    %597 = arith.select %85, %595, %596 : vector<1x512xi1>, vector<1x512xf32>
    %c76 = arith.constant 76 : index
    %598 = memref.load %arg1[%c76] : memref<98xf32, #tpu.memory_space<smem>>
    %599 = vector.broadcast %598 : f32 to vector<1x512xf32>
    %600 = arith.mulf %599, %597 : vector<1x512xf32>
    %601 = arith.addf %594, %600 : vector<1x512xf32>
    %c499_i32_128 = arith.constant 499 : i32
    %602 = tpu.dynamic_rotate %12 by %c499_i32_128 dim 1 : vector<1x512xf32>, i32 -> vector<1x512xf32>
    %cst_129 = arith.constant 0.000000e+00 : f32
    %603 = vector.broadcast %cst_129 : f32 to vector<1x512xf32>
    %604 = arith.select %40, %602, %603 : vector<1x512xi1>, vector<1x512xf32>
    %c77 = arith.constant 77 : index
    %605 = memref.load %arg1[%c77] : memref<98xf32, #tpu.memory_space<smem>>
    %606 = vector.broadcast %605 : f32 to vector<1x512xf32>
    %607 = arith.mulf %606, %604 : vector<1x512xf32>
    %608 = arith.addf %601, %607 : vector<1x512xf32>
    %c498_i32_130 = arith.constant 498 : i32
    %609 = tpu.dynamic_rotate %12 by %c498_i32_130 dim 1 : vector<1x512xf32>, i32 -> vector<1x512xf32>
    %cst_131 = arith.constant 0.000000e+00 : f32
    %610 = vector.broadcast %cst_131 : f32 to vector<1x512xf32>
    %611 = arith.select %49, %609, %610 : vector<1x512xi1>, vector<1x512xf32>
    %c78 = arith.constant 78 : index
    %612 = memref.load %arg1[%c78] : memref<98xf32, #tpu.memory_space<smem>>
    %613 = vector.broadcast %612 : f32 to vector<1x512xf32>
    %614 = arith.mulf %613, %611 : vector<1x512xf32>
    %615 = arith.addf %608, %614 : vector<1x512xf32>
    %c497_i32_132 = arith.constant 497 : i32
    %616 = tpu.dynamic_rotate %12 by %c497_i32_132 dim 1 : vector<1x512xf32>, i32 -> vector<1x512xf32>
    %cst_133 = arith.constant 0.000000e+00 : f32
    %617 = vector.broadcast %cst_133 : f32 to vector<1x512xf32>
    %618 = arith.select %58, %616, %617 : vector<1x512xi1>, vector<1x512xf32>
    %c79 = arith.constant 79 : index
    %619 = memref.load %arg1[%c79] : memref<98xf32, #tpu.memory_space<smem>>
    %620 = vector.broadcast %619 : f32 to vector<1x512xf32>
    %621 = arith.mulf %620, %618 : vector<1x512xf32>
    %622 = arith.addf %615, %621 : vector<1x512xf32>
    %c496_i32_134 = arith.constant 496 : i32
    %623 = tpu.dynamic_rotate %12 by %c496_i32_134 dim 1 : vector<1x512xf32>, i32 -> vector<1x512xf32>
    %c80 = arith.constant 80 : index
    %624 = memref.load %arg1[%c80] : memref<98xf32, #tpu.memory_space<smem>>
    %625 = vector.broadcast %624 : f32 to vector<1x512xf32>
    %626 = arith.mulf %625, %623 : vector<1x512xf32>
    %627 = arith.addf %622, %626 : vector<1x512xf32>
    %c495_i32_135 = arith.constant 495 : i32
    %628 = tpu.dynamic_rotate %12 by %c495_i32_135 dim 1 : vector<1x512xf32>, i32 -> vector<1x512xf32>
    %cst_136 = arith.constant 0.000000e+00 : f32
    %629 = vector.broadcast %cst_136 : f32 to vector<1x512xf32>
    %630 = arith.select %67, %628, %629 : vector<1x512xi1>, vector<1x512xf32>
    %c81 = arith.constant 81 : index
    %631 = memref.load %arg1[%c81] : memref<98xf32, #tpu.memory_space<smem>>
    %632 = vector.broadcast %631 : f32 to vector<1x512xf32>
    %633 = arith.mulf %632, %630 : vector<1x512xf32>
    %634 = arith.addf %627, %633 : vector<1x512xf32>
    %c494_i32_137 = arith.constant 494 : i32
    %635 = tpu.dynamic_rotate %12 by %c494_i32_137 dim 1 : vector<1x512xf32>, i32 -> vector<1x512xf32>
    %cst_138 = arith.constant 0.000000e+00 : f32
    %636 = vector.broadcast %cst_138 : f32 to vector<1x512xf32>
    %637 = arith.select %76, %635, %636 : vector<1x512xi1>, vector<1x512xf32>
    %c82 = arith.constant 82 : index
    %638 = memref.load %arg1[%c82] : memref<98xf32, #tpu.memory_space<smem>>
    %639 = vector.broadcast %638 : f32 to vector<1x512xf32>
    %640 = arith.mulf %639, %637 : vector<1x512xf32>
    %641 = arith.addf %634, %640 : vector<1x512xf32>
    %c493_i32_139 = arith.constant 493 : i32
    %642 = tpu.dynamic_rotate %12 by %c493_i32_139 dim 1 : vector<1x512xf32>, i32 -> vector<1x512xf32>
    %cst_140 = arith.constant 0.000000e+00 : f32
    %643 = vector.broadcast %cst_140 : f32 to vector<1x512xf32>
    %644 = arith.select %85, %642, %643 : vector<1x512xi1>, vector<1x512xf32>
    %c83 = arith.constant 83 : index
    %645 = memref.load %arg1[%c83] : memref<98xf32, #tpu.memory_space<smem>>
    %646 = vector.broadcast %645 : f32 to vector<1x512xf32>
    %647 = arith.mulf %646, %644 : vector<1x512xf32>
    %648 = arith.addf %641, %647 : vector<1x512xf32>
    %c483_i32_141 = arith.constant 483 : i32
    %649 = tpu.dynamic_rotate %12 by %c483_i32_141 dim 1 : vector<1x512xf32>, i32 -> vector<1x512xf32>
    %cst_142 = arith.constant 0.000000e+00 : f32
    %650 = vector.broadcast %cst_142 : f32 to vector<1x512xf32>
    %651 = arith.select %40, %649, %650 : vector<1x512xi1>, vector<1x512xf32>
    %c84 = arith.constant 84 : index
    %652 = memref.load %arg1[%c84] : memref<98xf32, #tpu.memory_space<smem>>
    %653 = vector.broadcast %652 : f32 to vector<1x512xf32>
    %654 = arith.mulf %653, %651 : vector<1x512xf32>
    %655 = arith.addf %648, %654 : vector<1x512xf32>
    %c482_i32_143 = arith.constant 482 : i32
    %656 = tpu.dynamic_rotate %12 by %c482_i32_143 dim 1 : vector<1x512xf32>, i32 -> vector<1x512xf32>
    %cst_144 = arith.constant 0.000000e+00 : f32
    %657 = vector.broadcast %cst_144 : f32 to vector<1x512xf32>
    %658 = arith.select %49, %656, %657 : vector<1x512xi1>, vector<1x512xf32>
    %c85 = arith.constant 85 : index
    %659 = memref.load %arg1[%c85] : memref<98xf32, #tpu.memory_space<smem>>
    %660 = vector.broadcast %659 : f32 to vector<1x512xf32>
    %661 = arith.mulf %660, %658 : vector<1x512xf32>
    %662 = arith.addf %655, %661 : vector<1x512xf32>
    %c481_i32_145 = arith.constant 481 : i32
    %663 = tpu.dynamic_rotate %12 by %c481_i32_145 dim 1 : vector<1x512xf32>, i32 -> vector<1x512xf32>
    %cst_146 = arith.constant 0.000000e+00 : f32
    %664 = vector.broadcast %cst_146 : f32 to vector<1x512xf32>
    %665 = arith.select %58, %663, %664 : vector<1x512xi1>, vector<1x512xf32>
    %c86 = arith.constant 86 : index
    %666 = memref.load %arg1[%c86] : memref<98xf32, #tpu.memory_space<smem>>
    %667 = vector.broadcast %666 : f32 to vector<1x512xf32>
    %668 = arith.mulf %667, %665 : vector<1x512xf32>
    %669 = arith.addf %662, %668 : vector<1x512xf32>
    %c480_i32_147 = arith.constant 480 : i32
    %670 = tpu.dynamic_rotate %12 by %c480_i32_147 dim 1 : vector<1x512xf32>, i32 -> vector<1x512xf32>
    %c87 = arith.constant 87 : index
    %671 = memref.load %arg1[%c87] : memref<98xf32, #tpu.memory_space<smem>>
    %672 = vector.broadcast %671 : f32 to vector<1x512xf32>
    %673 = arith.mulf %672, %670 : vector<1x512xf32>
    %674 = arith.addf %669, %673 : vector<1x512xf32>
    %c479_i32_148 = arith.constant 479 : i32
    %675 = tpu.dynamic_rotate %12 by %c479_i32_148 dim 1 : vector<1x512xf32>, i32 -> vector<1x512xf32>
    %cst_149 = arith.constant 0.000000e+00 : f32
    %676 = vector.broadcast %cst_149 : f32 to vector<1x512xf32>
    %677 = arith.select %67, %675, %676 : vector<1x512xi1>, vector<1x512xf32>
    %c88 = arith.constant 88 : index
    %678 = memref.load %arg1[%c88] : memref<98xf32, #tpu.memory_space<smem>>
    %679 = vector.broadcast %678 : f32 to vector<1x512xf32>
    %680 = arith.mulf %679, %677 : vector<1x512xf32>
    %681 = arith.addf %674, %680 : vector<1x512xf32>
    %c478_i32_150 = arith.constant 478 : i32
    %682 = tpu.dynamic_rotate %12 by %c478_i32_150 dim 1 : vector<1x512xf32>, i32 -> vector<1x512xf32>
    %cst_151 = arith.constant 0.000000e+00 : f32
    %683 = vector.broadcast %cst_151 : f32 to vector<1x512xf32>
    %684 = arith.select %76, %682, %683 : vector<1x512xi1>, vector<1x512xf32>
    %c89 = arith.constant 89 : index
    %685 = memref.load %arg1[%c89] : memref<98xf32, #tpu.memory_space<smem>>
    %686 = vector.broadcast %685 : f32 to vector<1x512xf32>
    %687 = arith.mulf %686, %684 : vector<1x512xf32>
    %688 = arith.addf %681, %687 : vector<1x512xf32>
    %c477_i32_152 = arith.constant 477 : i32
    %689 = tpu.dynamic_rotate %12 by %c477_i32_152 dim 1 : vector<1x512xf32>, i32 -> vector<1x512xf32>
    %cst_153 = arith.constant 0.000000e+00 : f32
    %690 = vector.broadcast %cst_153 : f32 to vector<1x512xf32>
    %691 = arith.select %85, %689, %690 : vector<1x512xi1>, vector<1x512xf32>
    %c90 = arith.constant 90 : index
    %692 = memref.load %arg1[%c90] : memref<98xf32, #tpu.memory_space<smem>>
    %693 = vector.broadcast %692 : f32 to vector<1x512xf32>
    %694 = arith.mulf %693, %691 : vector<1x512xf32>
    %695 = arith.addf %688, %694 : vector<1x512xf32>
    %c467_i32_154 = arith.constant 467 : i32
    %696 = tpu.dynamic_rotate %12 by %c467_i32_154 dim 1 : vector<1x512xf32>, i32 -> vector<1x512xf32>
    %cst_155 = arith.constant 0.000000e+00 : f32
    %697 = vector.broadcast %cst_155 : f32 to vector<1x512xf32>
    %698 = arith.select %40, %696, %697 : vector<1x512xi1>, vector<1x512xf32>
    %c91 = arith.constant 91 : index
    %699 = memref.load %arg1[%c91] : memref<98xf32, #tpu.memory_space<smem>>
    %700 = vector.broadcast %699 : f32 to vector<1x512xf32>
    %701 = arith.mulf %700, %698 : vector<1x512xf32>
    %702 = arith.addf %695, %701 : vector<1x512xf32>
    %c466_i32_156 = arith.constant 466 : i32
    %703 = tpu.dynamic_rotate %12 by %c466_i32_156 dim 1 : vector<1x512xf32>, i32 -> vector<1x512xf32>
    %cst_157 = arith.constant 0.000000e+00 : f32
    %704 = vector.broadcast %cst_157 : f32 to vector<1x512xf32>
    %705 = arith.select %49, %703, %704 : vector<1x512xi1>, vector<1x512xf32>
    %c92 = arith.constant 92 : index
    %706 = memref.load %arg1[%c92] : memref<98xf32, #tpu.memory_space<smem>>
    %707 = vector.broadcast %706 : f32 to vector<1x512xf32>
    %708 = arith.mulf %707, %705 : vector<1x512xf32>
    %709 = arith.addf %702, %708 : vector<1x512xf32>
    %c465_i32_158 = arith.constant 465 : i32
    %710 = tpu.dynamic_rotate %12 by %c465_i32_158 dim 1 : vector<1x512xf32>, i32 -> vector<1x512xf32>
    %cst_159 = arith.constant 0.000000e+00 : f32
    %711 = vector.broadcast %cst_159 : f32 to vector<1x512xf32>
    %712 = arith.select %58, %710, %711 : vector<1x512xi1>, vector<1x512xf32>
    %c93 = arith.constant 93 : index
    %713 = memref.load %arg1[%c93] : memref<98xf32, #tpu.memory_space<smem>>
    %714 = vector.broadcast %713 : f32 to vector<1x512xf32>
    %715 = arith.mulf %714, %712 : vector<1x512xf32>
    %716 = arith.addf %709, %715 : vector<1x512xf32>
    %c464_i32_160 = arith.constant 464 : i32
    %717 = tpu.dynamic_rotate %12 by %c464_i32_160 dim 1 : vector<1x512xf32>, i32 -> vector<1x512xf32>
    %c94 = arith.constant 94 : index
    %718 = memref.load %arg1[%c94] : memref<98xf32, #tpu.memory_space<smem>>
    %719 = vector.broadcast %718 : f32 to vector<1x512xf32>
    %720 = arith.mulf %719, %717 : vector<1x512xf32>
    %721 = arith.addf %716, %720 : vector<1x512xf32>
    %c463_i32_161 = arith.constant 463 : i32
    %722 = tpu.dynamic_rotate %12 by %c463_i32_161 dim 1 : vector<1x512xf32>, i32 -> vector<1x512xf32>
    %cst_162 = arith.constant 0.000000e+00 : f32
    %723 = vector.broadcast %cst_162 : f32 to vector<1x512xf32>
    %724 = arith.select %67, %722, %723 : vector<1x512xi1>, vector<1x512xf32>
    %c95 = arith.constant 95 : index
    %725 = memref.load %arg1[%c95] : memref<98xf32, #tpu.memory_space<smem>>
    %726 = vector.broadcast %725 : f32 to vector<1x512xf32>
    %727 = arith.mulf %726, %724 : vector<1x512xf32>
    %728 = arith.addf %721, %727 : vector<1x512xf32>
    %c462_i32_163 = arith.constant 462 : i32
    %729 = tpu.dynamic_rotate %12 by %c462_i32_163 dim 1 : vector<1x512xf32>, i32 -> vector<1x512xf32>
    %cst_164 = arith.constant 0.000000e+00 : f32
    %730 = vector.broadcast %cst_164 : f32 to vector<1x512xf32>
    %731 = arith.select %76, %729, %730 : vector<1x512xi1>, vector<1x512xf32>
    %c96 = arith.constant 96 : index
    %732 = memref.load %arg1[%c96] : memref<98xf32, #tpu.memory_space<smem>>
    %733 = vector.broadcast %732 : f32 to vector<1x512xf32>
    %734 = arith.mulf %733, %731 : vector<1x512xf32>
    %735 = arith.addf %728, %734 : vector<1x512xf32>
    %c461_i32_165 = arith.constant 461 : i32
    %736 = tpu.dynamic_rotate %12 by %c461_i32_165 dim 1 : vector<1x512xf32>, i32 -> vector<1x512xf32>
    %cst_166 = arith.constant 0.000000e+00 : f32
    %737 = vector.broadcast %cst_166 : f32 to vector<1x512xf32>
    %738 = arith.select %85, %736, %737 : vector<1x512xi1>, vector<1x512xf32>
    %c97 = arith.constant 97 : index
    %739 = memref.load %arg1[%c97] : memref<98xf32, #tpu.memory_space<smem>>
    %740 = vector.broadcast %739 : f32 to vector<1x512xf32>
    %741 = arith.mulf %740, %738 : vector<1x512xf32>
    %742 = arith.addf %735, %741 : vector<1x512xf32>
    %743 = vector.extract_strided_slice %742 {offsets = [0, 128], sizes = [1, 256], strides = [1, 1]} : vector<1x512xf32> to vector<1x256xf32>
    %744 = vector.broadcast %8 : f32 to vector<1x256xf32>
    %745 = arith.addf %743, %744 : vector<1x256xf32>
    %746 = arith.negf %745 : vector<1x256xf32>
    %747 = math.exp %746 : vector<1x256xf32>
    %cst_167 = arith.constant 1.000000e+00 : f32
    %748 = vector.broadcast %cst_167 : f32 to vector<1x256xf32>
    %749 = arith.addf %748, %747 : vector<1x256xf32>
    %750 = arith.divf %748, %749 : vector<1x256xf32>
    %751 = vector.broadcast %750 : vector<1x256xf32> to vector<4x256xf32>
    %752 = arith.mulf %1, %751 : vector<4x256xf32>
    %c0_168 = arith.constant 0 : index
    %c0_169 = arith.constant 0 : index
    %c0_170 = arith.constant 0 : index
    %753 = vector.load %arg4[%c0_168, %c0_169, %c0_170] : memref<1x4x256xf32, #tpu.memory_space<vmem>>, vector<1x4x256xf32>
    %754 = vector.shape_cast %753 : vector<1x4x256xf32> to vector<4x256xf32>
    %755 = vector.shape_cast %752 : vector<4x256xf32> to vector<1x4x256xf32>
    tpu.vector_store %arg4[%c0_168, %c0_169, %c0_170], %755 {strides = array<i32>} : memref<1x4x256xf32, #tpu.memory_space<vmem>>, vector<1x4x256xf32>,
    return
  }
  func.func @transform_0(%arg0: i32) -> i32 {
    %c0_i32 = arith.constant 0 : i32
    %c0_i32_0 = arith.constant 0 : i32
    return %c0_i32 : i32
  }
  func.func @transform_1(%arg0: i32) -> i32 {
    %c0_i32 = arith.constant 0 : i32
    %c0_i32_0 = arith.constant 0 : i32
    return %c0_i32 : i32
  }
  func.func @transform_2(%arg0: i32) -> (i32, i32, i32) {
    %c0_i32 = arith.constant 0 : i32
    %c0_i32_0 = arith.constant 0 : i32
    %c0_i32_1 = arith.constant 0 : i32
    return %arg0, %c0_i32, %c0_i32_0 : i32, i32, i32
  }
  func.func @transform_3(%arg0: i32) -> (i32, i32, i32) {
    %c0_i32 = arith.constant 0 : i32
    %c0_i32_0 = arith.constant 0 : i32
    %c0_i32_1 = arith.constant 0 : i32
    return %arg0, %c0_i32, %c0_i32_0 : i32, i32, i32
  }
}

</mosaic_0001>

<bundles_post_ra>
// kernel: spatial_attention.1
= control target key start
LH: loop header
LB: loop body
LE: loop exit
PB: predicated region body
PF: predicated region fallthrough
CT: control target
= control target key end

     0   :  { %s4484_s0 = inlined_call_operand.vmem [shape: f32[98], index: 0, kind: input, shape index: {}]   ;;  %s4485_s1 = inlined_call_operand.<no memory space> [shape: f32[1], index: 1, kind: input, shape index: {}]   ;;  %s4486_s2 = inlined_call_operand.vmem [shape: f32[2,4,256], index: 2, kind: input, shape index: {}]   ;;  %s4487_s3 = inlined_call_operand.vmem [shape: f32[2,4,256], index: 3, kind: output, shape index: {}]  }
   0x1   :  { %8 = sst [smem:[#allocation2]] %s4485_s1 }
   0x2   :  { %9 = vsyncpa [#allocation4], 0  ;;  %s2164_s14 = smov 0  }
   0x3 LB: > { %s2170_s15 = sadd.s32 4294967295, %s2089_s14   ;;  %p1873_p0 = scmp.ge.s32.totalorder %s2089_s14, 1  ;;  %s2089_s14 = sphi %s2164_s14, %s15_s14  }
   0x4   : > { %p114_p1 = scmp.lt.s32.totalorder %s2089_s14, 3  ;;  %s127_s1 = sshll.u32 %s4484_s0, 4  ;;  %s128_s1 = int_to_ptr.vmem [resolvable:$true] %s127_s1 }
   0x5   : > { %p1994_p3 = scmp.eq.s32.totalorder %s2170_s15, 0  ;;  %s2064_s19 = scalar_lea.vmem %s128_s1, 16 }
   0x6   : > { %p2177_p2 = pnand %p1873_p0, %p114_p1  ;;  %p2065_p6 = scmp.ne.s32.totalorder %s128_s1, %s2064_s19 }
   0x7   : > { %p2072_p10 = scmp.lt.s32.totalorder %s128_s1, %s128_s1  ;;  %p2073_p11 = scmp.lt.s32.totalorder %s2064_s19, %s2064_s19 }
   0x8   : > { %p1990_p4 = pneg %p2177_p2 }
   0x9   : > { %p2074_p12 = por %p2073_p11, %p2072_p10 }
   0xa   : > { %p1991_p5 = pnand %p1994_p3, %p1990_p4 }
   0xc   : > { %p2066_p7 = pneg %p1991_p5 }
   0xe   : > { %p2067_p8 = pnand %p2066_p7, %p2065_p6 }
  0x10   : > { %p2068_p9 = pneg %p2067_p8 }
  0x12   : > { %p2075_p13 = pnand %p2074_p12, %p2068_p9 }
  0x14   : > { %2078 = shalt.err (!%p2075_p13)
}
  0x15   : > { %s2091_s20 = smov [#allocation3]   ;;  %151 = sbr.rel (%p2177_p2) target bundleno = 678 (0x2a6), region = 32 }
  0x16   : > { %1993 = dma.vmem_to_smem (!%p1991_p5), %s128_s1, 16, %s2091_s20, [#allocation4]  }
  0x1c   : > { %2084 = dma.done.wait (%p1994_p3), [#allocation4], 16  }
  0x1d   : > { %2086 = vsyncadd (%p1994_p3), [#allocation4], 4294967280 }
  0x1e   : > { %157 = sfence }
  0x1f   : > { %v4540_v0 = vmov 0.0   ;;  %s2093_s21 = smov 51   ;;  %s2094_s22 = smov 50   ;;  %vm190_vm0 = vcmask 1043456  }
  0x20   : > { %299 = vrot.lane.b32.xlu0 %v4540_v0, %s2093_s21  ;;  %316 = vrot.lane.b32.xlu1 %v4540_v0, %s2094_s22  ;;  %p176_p0 = scmp.lt.s32.totalorder %s2170_s15, 1  ;;  %s2095_s23 = smov 49  }
  0x21   : > { %s2096_s24 = smov 48   ;;  %s2097_s29 = smov 47  }
  0x22   : > { %s4986_s15 = smov (!%p176_p0, %s2170_s15), 1  ;;  %s2098_s30 = smov 46  }
  0x23   : > { %s4488_s25 = sshll.u32 %s4986_s15, 3  ;;  %s2099_s4 = smov 45  }
  0x24   : > { %333 = vrot.lane.b32.xlu0 %v4540_v0, %s2095_s23  ;;  %350 = vrot.lane.b32.xlu1 %v4540_v0, %s2096_s24  ;;  %s2210_s28 = scalar_lea.vmem %s4486_s2, %s4488_s25  ;;  %s2100_s5 = smov 35  }
  0x25   : > { %v2213_v1 = vld [vmem:[%s2210_s28] sm:$0xff]  ;;  %s2101_s6 = smov 34   ;;  %s2102_s7 = smov 33  }
  0x26   : > { %v191_v2 = vsel %vm190_vm0, %v2213_v1, 0.0  ;;  %v2221_v3 = vcombine.high %v2213_v1, %v2213_v1  ;;  %s2103_s8 = smov 32   ;;  %s2104_s9 = smov 31  }
  0x27   : > { %v192_v4 = vrot.slane %v191_v2, 4  ;;  %s2105_s10 = smov 30   ;;  %s2106_s11 = smov 29  }
  0x28   : > { %365 = vrot.lane.b32.xlu0 %v4540_v0, %s2097_s29  ;;  %v198_v5 = vsel %vm190_vm0, %v2221_v3, 0.0  ;;  %s2107_s12 = smov 19   ;;  %s2108_s13 = smov 18  }
  0x29   : > { %v193_v6 = vadd.f32 %v192_v4, %v191_v2  ;;  %v199_v7 = vrot.slane %v198_v5, 4  ;;  %s2109_s16 = smov 17   ;;  %s2110_s17 = smov 16  }
  0x2a   : > { %s4567_s1 = smov 15   ;;  %s4559_s18 = smov 14  }
  0x2b   : > { %v194_v8 = vrot.slane %v193_v6, 2  ;;  %v200_v9 = vadd.f32 %v199_v7, %v198_v5  ;;  %s4557_s19 = smov 13   ;;  %s4549_s20 = smov 3  }
  0x2c   : > { %s4489_s26 = smov 2   ;;  %s4491_s27 = smov 1  }
  0x2d   : > { %v195_v10 = vadd.f32 %v194_v8, %v193_v6  ;;  %v201_v11 = vrot.slane %v200_v9, 2  ;;  %s4493_s25 = smov 127  }
  0x2f   : > { %v196_v12 = vrot.slane %v195_v10, 1  ;;  %v202_v13 = vadd.f32 %v201_v11, %v200_v9 }
  0x31   : > { %v197_v14 = vadd.f32 %v196_v12, %v195_v10  ;;  %v203_v15 = vrot.slane %v202_v13, 1 }
  0x33   : > { %v2225_v16 = vmul.f32 0.25, %v197_v14  ;;  %v204_v17 = vadd.f32 %v203_v15, %v202_v13 }
  0x35   : > { %335 = vrot.lane.b32.xlu1 %v2225_v16, %s2095_s23  ;;  %301 = vrot.lane.b32.xlu0 %v2225_v16, %s2093_s21  ;;  %v2235_v18 = vmul.f32 0.25, %v204_v17 }
  0x39   : > { %367 = vrot.lane.b32.xlu1 %v2225_v16, %s2097_s29  ;;  %318 = vrot.lane.b32.xlu0 %v2225_v16, %s2094_s22 }
  0x3d   : > { %352 = vrot.lane.b32.xlu0 %v2225_v16, %s2096_s24  ;;  %303 = vrot.lane.b32.xlu1 %v2235_v18, %s2093_s21 }
  0x41   : > { %337 = vrot.lane.b32.xlu0 %v2235_v18, %s2095_s23  ;;  %320 = vrot.lane.b32.xlu1 %v2235_v18, %s2094_s22 }
  0x45   : > { %369 = vrot.lane.b32.xlu0 %v2235_v18, %s2097_s29  ;;  %354 = vrot.lane.b32.xlu1 %v2235_v18, %s2096_s24 }
  0x49   : > { %384 = vrot.lane.b32.xlu0 %v2225_v16, %s2098_s30  ;;  %382 = vrot.lane.b32.xlu1 %v4540_v0, %s2098_s30 }
  0x4d   : > { %399 = vrot.lane.b32.xlu0 %v4540_v0, %s2099_s4  ;;  %386 = vrot.lane.b32.xlu1 %v2235_v18, %s2098_s30 }
  0x51   : > { %403 = vrot.lane.b32.xlu0 %v2235_v18, %s2099_s4  ;;  %401 = vrot.lane.b32.xlu1 %v2225_v16, %s2099_s4 }
  0x55   : > { %418 = vrot.lane.b32.xlu0 %v2225_v16, %s2100_s5  ;;  %416 = vrot.lane.b32.xlu1 %v4540_v0, %s2100_s5 }
  0x59   : > { %433 = vrot.lane.b32.xlu0 %v4540_v0, %s2101_s6  ;;  %420 = vrot.lane.b32.xlu1 %v2235_v18, %s2100_s5 }
  0x5d   : > { %437 = vrot.lane.b32.xlu0 %v2235_v18, %s2101_s6  ;;  %435 = vrot.lane.b32.xlu1 %v2225_v16, %s2101_s6 }
  0x61   : > { %452 = vrot.lane.b32.xlu0 %v2225_v16, %s2102_s7  ;;  %450 = vrot.lane.b32.xlu1 %v4540_v0, %s2102_s7 }
  0x65   : > { %467 = vrot.lane.b32.xlu0 %v4540_v0, %s2103_s8  ;;  %454 = vrot.lane.b32.xlu1 %v2235_v18, %s2102_s7 }
  0x69   : > { %471 = vrot.lane.b32.xlu0 %v2235_v18, %s2103_s8  ;;  %469 = vrot.lane.b32.xlu1 %v2225_v16, %s2103_s8 }
  0x6d   : > { %484 = vrot.lane.b32.xlu0 %v2225_v16, %s2104_s9  ;;  %482 = vrot.lane.b32.xlu1 %v4540_v0, %s2104_s9 }
  0x71   : > { %499 = vrot.lane.b32.xlu0 %v4540_v0, %s2105_s10  ;;  %486 = vrot.lane.b32.xlu1 %v2235_v18, %s2104_s9 }
  0x75   : > { %503 = vrot.lane.b32.xlu0 %v2235_v18, %s2105_s10  ;;  %501 = vrot.lane.b32.xlu1 %v2225_v16, %s2105_s10 }
  0x79   : > { %518 = vrot.lane.b32.xlu0 %v2225_v16, %s2106_s11  ;;  %516 = vrot.lane.b32.xlu1 %v4540_v0, %s2106_s11 }
  0x7d   : > { %533 = vrot.lane.b32.xlu0 %v4540_v0, %s2107_s12  ;;  %520 = vrot.lane.b32.xlu1 %v2235_v18, %s2106_s11 }
  0x81   : > { %537 = vrot.lane.b32.xlu0 %v2235_v18, %s2107_s12  ;;  %535 = vrot.lane.b32.xlu1 %v2225_v16, %s2107_s12 }
  0x85   : > { %552 = vrot.lane.b32.xlu0 %v2225_v16, %s2108_s13  ;;  %550 = vrot.lane.b32.xlu1 %v4540_v0, %s2108_s13 }
  0x89   : > { %567 = vrot.lane.b32.xlu0 %v4540_v0, %s2109_s16  ;;  %554 = vrot.lane.b32.xlu1 %v2235_v18, %s2108_s13 }
  0x8d   : > { %571 = vrot.lane.b32.xlu0 %v2235_v18, %s2109_s16  ;;  %569 = vrot.lane.b32.xlu1 %v2225_v16, %s2109_s16 }
  0x91   : > { %586 = vrot.lane.b32.xlu0 %v2225_v16, %s2110_s17  ;;  %584 = vrot.lane.b32.xlu1 %v4540_v0, %s2110_s17 }
  0x92   : > { %v2329_v19 = vpop.permute.xlu0 %299  ;;  %v2335_v20 = vpop.permute.xlu1 %316 }
  0x93   : > { %4657 = vst [vmem:[#allocation6_spill] sm:$0xff] %v2329_v19  ;;  %4658 = vst [vmem:[#allocation7_spill] sm:$0xff] %v2335_v20 }
  0x95   : > { %599 = vrot.lane.b32.xlu0 %v4540_v0, %s4567_s1  ;;  %588 = vrot.lane.b32.xlu1 %v2235_v18, %s2110_s17 }
  0x96   : > { %v2337_v21 = vpop.permute.xlu0 %333  ;;  %v2347_v22 = vpop.permute.xlu1 %350 }
  0x97   : > { %4659 = vst [vmem:[#allocation8_spill] sm:$0xff] %v2337_v21  ;;  %4660 = vst [vmem:[#allocation9_spill] sm:$0xff] %v2347_v22 }
  0x99   : > { %603 = vrot.lane.b32.xlu0 %v2235_v18, %s4567_s1  ;;  %601 = vrot.lane.b32.xlu1 %v2225_v16, %s4567_s1  ;;  %s2715_s1 = sld [smem:[#allocation3 + $0x5]] }
  0x9a   : > { %v2349_v23 = vpop.permute.xlu0 %365 }
  0x9b   : > { %4661 = vst [vmem:[#allocation10_spill] sm:$0xff] %v2349_v23 }
  0x9d   : > { %618 = vrot.lane.b32.xlu0 %v2225_v16, %s4559_s18  ;;  %616 = vrot.lane.b32.xlu1 %v4540_v0, %s4559_s18 }
  0xa1   : > { %633 = vrot.lane.b32.xlu0 %v4540_v0, %s4557_s19  ;;  %620 = vrot.lane.b32.xlu1 %v2235_v18, %s4559_s18  ;;  %s2680_s18 = sld [smem:[#allocation3 + $0x3]] }
  0xa5   : > { %637 = vrot.lane.b32.xlu0 %v2235_v18, %s4557_s19  ;;  %635 = vrot.lane.b32.xlu1 %v2225_v16, %s4557_s19  ;;  %s2676_s19 = sld [smem:[#allocation3 + $0x4]] }
  0xa7   : > { %v2355_v24 = vpop.permute.xlu1 %335  ;;  %v2357_v25 = vpop.permute.xlu0 %301 }
  0xa9   : > { %652 = vrot.lane.b32.xlu0 %v2225_v16, %s4549_s20  ;;  %650 = vrot.lane.b32.xlu1 %v4540_v0, %s4549_s20 }
  0xab   : > { %v2363_v26 = vpop.permute.xlu1 %367  ;;  %v2365_v27 = vpop.permute.xlu0 %318 }
  0xad   : > { %667 = vrot.lane.b32.xlu0 %v4540_v0, %s4489_s26  ;;  %654 = vrot.lane.b32.xlu1 %v2235_v18, %s4549_s20  ;;  %s2657_s20 = sld [smem:[#allocation3 + $0x1]] }
  0xaf   : > { %v2371_v28 = vpop.permute.xlu0 %352  ;;  %v2373_v29 = vpop.permute.xlu1 %303 }
  0xb1   : > { %671 = vrot.lane.b32.xlu0 %v2235_v18, %s4489_s26  ;;  %669 = vrot.lane.b32.xlu1 %v2225_v16, %s4489_s26  ;;  %s4495_s26 = smov 126  }
  0xb3   : > { %v2379_v30 = vpop.permute.xlu0 %337  ;;  %v2381_v31 = vpop.permute.xlu1 %320 }
  0xb5   : > { %686 = vrot.lane.b32.xlu0 %v2225_v16, %s4491_s27  ;;  %684 = vrot.lane.b32.xlu1 %v4540_v0, %s4491_s27 }
  0xb7   : > { %v2387_v32 = vpop.permute.xlu0 %369  ;;  %v2389_v33 = vpop.permute.xlu1 %354 }
  0xb9   : > { %707 = vrot.lane.b32.xlu0 %v2225_v16, %s4493_s25  ;;  %688 = vrot.lane.b32.xlu1 %v2235_v18, %s4491_s27  ;;  %s4497_s27 = smov 125  }
  0xbb   : > { %v2395_v34 = vpop.permute.xlu0 %384  ;;  %v2397_v35 = vpop.permute.xlu1 %382 }
  0xbc   : > { %4662 = vst [vmem:[#allocation11_spill] sm:$0xff] %v2397_v35 }
  0xbd   : > { %711 = vrot.lane.b32.xlu0 %v4540_v0, %s4493_s25  ;;  %709 = vrot.lane.b32.xlu1 %v2235_v18, %s4493_s25  ;;  %s4499_s25 = smov 115  }
  0xbf   : > { %v2403_v36 = vpop.permute.xlu0 %399  ;;  %v2405_v37 = vpop.permute.xlu1 %386 }
  0xc0   : > { %4663 = vst [vmem:[#allocation12_spill] sm:$0xff] %v2403_v36 }
  0xc1   : > { %726 = vrot.lane.b32.xlu0 %v2235_v18, %s4495_s26  ;;  %724 = vrot.lane.b32.xlu1 %v2225_v16, %s4495_s26 }
  0xc3   : > { %v2411_v38 = vpop.permute.xlu0 %403  ;;  %v2413_v39 = vpop.permute.xlu1 %401 }
  0xc5   : > { %741 = vrot.lane.b32.xlu0 %v2225_v16, %s4497_s27  ;;  %728 = vrot.lane.b32.xlu1 %v4540_v0, %s4495_s26  ;;  %s4501_s26 = smov 114  }
  0xc7   : > { %v2419_v40 = vpop.permute.xlu0 %418  ;;  %v2421_v41 = vpop.permute.xlu1 %416 }
  0xc8   : > { %4664 = vst [vmem:[#allocation13_spill] sm:$0xff] %v2421_v41 }
  0xc9   : > { %745 = vrot.lane.b32.xlu0 %v4540_v0, %s4497_s27  ;;  %743 = vrot.lane.b32.xlu1 %v2235_v18, %s4497_s27  ;;  %s4503_s27 = smov 113  }
  0xcb   : > { %v2427_v42 = vpop.permute.xlu0 %433  ;;  %v2429_v43 = vpop.permute.xlu1 %420 }
  0xcc   : > { %4665 = vst [vmem:[#allocation14_spill] sm:$0xff] %v2427_v42 }
  0xcd   : > { %760 = vrot.lane.b32.xlu0 %v2235_v18, %s4499_s25  ;;  %758 = vrot.lane.b32.xlu1 %v2225_v16, %s4499_s25 }
  0xcf   : > { %v2435_v44 = vpop.permute.xlu0 %437  ;;  %v2437_v45 = vpop.permute.xlu1 %435 }
  0xd1   : > { %775 = vrot.lane.b32.xlu0 %v2225_v16, %s4501_s26  ;;  %762 = vrot.lane.b32.xlu1 %v4540_v0, %s4499_s25  ;;  %s4505_s25 = smov 112  }
  0xd3   : > { %v2443_v46 = vpop.permute.xlu0 %452  ;;  %v2445_v47 = vpop.permute.xlu1 %450 }
  0xd4   : > { %4666 = vst [vmem:[#allocation15_spill] sm:$0xff] %v2445_v47 }
  0xd5   : > { %779 = vrot.lane.b32.xlu0 %v4540_v0, %s4501_s26  ;;  %777 = vrot.lane.b32.xlu1 %v2235_v18, %s4501_s26  ;;  %s4507_s26 = smov 111  }
  0xd7   : > { %v2451_v48 = vpop.permute.xlu0 %467  ;;  %v2453_v49 = vpop.permute.xlu1 %454 }
  0xd8   : > { %4667 = vst [vmem:[#allocation16_spill] sm:$0xff] %v2451_v48 }
  0xd9   : > { %794 = vrot.lane.b32.xlu0 %v2235_v18, %s4503_s27  ;;  %792 = vrot.lane.b32.xlu1 %v2225_v16, %s4503_s27 }
  0xdb   : > { %v2459_v50 = vpop.permute.xlu0 %471  ;;  %v2461_v51 = vpop.permute.xlu1 %469 }
  0xdd   : > { %809 = vrot.lane.b32.xlu0 %v2225_v16, %s4505_s25  ;;  %796 = vrot.lane.b32.xlu1 %v4540_v0, %s4503_s27  ;;  %s4509_s27 = smov 110  }
  0xdf   : > { %v2467_v52 = vpop.permute.xlu0 %484  ;;  %v2469_v53 = vpop.permute.xlu1 %482 }
  0xe0   : > { %4668 = vst [vmem:[#allocation17_spill] sm:$0xff] %v2469_v53 }
  0xe1   : > { %813 = vrot.lane.b32.xlu0 %v4540_v0, %s4505_s25  ;;  %811 = vrot.lane.b32.xlu1 %v2235_v18, %s4505_s25  ;;  %s4511_s25 = smov 109  }
  0xe3   : > { %v2475_v54 = vpop.permute.xlu0 %499  ;;  %v2477_v55 = vpop.permute.xlu1 %486 }
  0xe4   : > { %4669 = vst [vmem:[#allocation18_spill] sm:$0xff] %v2475_v54 }
  0xe5   : > { %826 = vrot.lane.b32.xlu0 %v2235_v18, %s4507_s26  ;;  %824 = vrot.lane.b32.xlu1 %v2225_v16, %s4507_s26 }
  0xe7   : > { %v2483_v56 = vpop.permute.xlu0 %503  ;;  %v2485_v57 = vpop.permute.xlu1 %501 }
  0xe8   : > { %4670 = vst [vmem:[#allocation19_spill] sm:$0xff] %v2483_v56  ;;  %4671 = vst [vmem:[#allocation20_spill] sm:$0xff] %v2485_v57  ;;  %v360_v56 = vstv %s2680_s18  ;;  %s2785_s18 = sld [smem:[#allocation3 + $0x6]] }
  0xe9   : > { %841 = vrot.lane.b32.xlu0 %v2225_v16, %s4509_s27  ;;  %828 = vrot.lane.b32.xlu1 %v4540_v0, %s4507_s26  ;;  %s4513_s26 = smov 99  }
  0xeb   : > { %v2491_v58 = vpop.permute.xlu0 %518  ;;  %v2493_v59 = vpop.permute.xlu1 %516 }
  0xec   : > { %4672 = vst [vmem:[#allocation21_spill] sm:$0xff] %v2491_v58  ;;  %4673 = vst [vmem:[#allocation22_spill] sm:$0xff] %v2493_v59 }
  0xed   : > { %845 = vrot.lane.b32.xlu0 %v4540_v0, %s4509_s27  ;;  %843 = vrot.lane.b32.xlu1 %v2235_v18, %s4509_s27  ;;  %s4515_s27 = smov 98  }
  0xef   : > { %v2499_v60 = vpop.permute.xlu0 %533  ;;  %v2501_v61 = vpop.permute.xlu1 %520 }
  0xf0   : > { %4674 = vst [vmem:[#allocation23_spill] sm:$0xff] %v2499_v60  ;;  %4675 = vst [vmem:[#allocation24_spill] sm:$0xff] %v2501_v61  ;;  %v328_v60 = vstv %s2657_s20  ;;  %s4586_s20 = smov 78  }
  0xf1   : > { %860 = vrot.lane.b32.xlu0 %v2235_v18, %s4511_s25  ;;  %858 = vrot.lane.b32.xlu1 %v2225_v16, %s4511_s25 }
  0xf3   : > { %v2507_v62 = vpop.permute.xlu0 %537  ;;  %v2509_v63 = vpop.permute.xlu1 %535 }
  0xf4   : > { %4676 = vst [vmem:[#allocation25_spill] sm:$0xff] %v2507_v62  ;;  %4677 = vst [vmem:[#allocation26_spill] sm:$0xff] %v2509_v63 }
  0xf5   : > { %875 = vrot.lane.b32.xlu0 %v2225_v16, %s4513_s26  ;;  %862 = vrot.lane.b32.xlu1 %v4540_v0, %s4511_s25  ;;  %s4519_s25 = smov 97  }
  0xf7   : > { %v2515_v2 = vpop.permute.xlu0 %552  ;;  %v2517_v4 = vpop.permute.xlu1 %550 }
  0xf8   : > { %4678 = vst [vmem:[#allocation27_spill] sm:$0xff] %v2515_v2  ;;  %4679 = vst [vmem:[#allocation28_spill] sm:$0xff] %v2517_v4 }
  0xf9   : > { %879 = vrot.lane.b32.xlu0 %v4540_v0, %s4513_s26  ;;  %877 = vrot.lane.b32.xlu1 %v2235_v18, %s4513_s26  ;;  %s4523_s26 = smov 96  }
  0xfb   : > { %v2523_v5 = vpop.permute.xlu0 %567  ;;  %v2525_v6 = vpop.permute.xlu1 %554 }
  0xfc   : > { %4680 = vst [vmem:[#allocation29_spill] sm:$0xff] %v2523_v5  ;;  %4681 = vst [vmem:[#allocation30_spill] sm:$0xff] %v2525_v6 }
  0xfd   : > { %894 = vrot.lane.b32.xlu0 %v2235_v18, %s4515_s27  ;;  %892 = vrot.lane.b32.xlu1 %v2225_v16, %s4515_s27 }
  0xff   : > { %v2531_v7 = vpop.permute.xlu0 %571  ;;  %v2533_v8 = vpop.permute.xlu1 %569 }
 0x100   : > { %4682 = vst [vmem:[#allocation31_spill] sm:$0xff] %v2531_v7  ;;  %4683 = vst [vmem:[#allocation32_spill] sm:$0xff] %v2533_v8 }
 0x101   : > { %909 = vrot.lane.b32.xlu0 %v2225_v16, %s4519_s25  ;;  %896 = vrot.lane.b32.xlu1 %v4540_v0, %s4515_s27  ;;  %s4527_s27 = smov 95  }
 0x103   : > { %v2539_v9 = vpop.permute.xlu0 %586  ;;  %v2541_v10 = vpop.permute.xlu1 %584 }
 0x104   : > { %4684 = vst [vmem:[#allocation33_spill] sm:$0xff] %v2539_v9  ;;  %4685 = vst [vmem:[#allocation34_spill] sm:$0xff] %v2541_v10 }
 0x105   : > { %913 = vrot.lane.b32.xlu0 %v4540_v0, %s4519_s25  ;;  %911 = vrot.lane.b32.xlu1 %v2235_v18, %s4519_s25  ;;  %s4532_s25 = smov 94  }
 0x107   : > { %v2547_v11 = vpop.permute.xlu0 %599  ;;  %v2549_v12 = vpop.permute.xlu1 %588 }
 0x108   : > { %4686 = vst [vmem:[#allocation35_spill] sm:$0xff] %v2547_v11  ;;  %4687 = vst [vmem:[#allocation36_spill] sm:$0xff] %v2549_v12 }
 0x109   : > { %928 = vrot.lane.b32.xlu0 %v2235_v18, %s4523_s26  ;;  %926 = vrot.lane.b32.xlu1 %v2225_v16, %s4523_s26 }
 0x10b   : > { %v2555_v13 = vpop.permute.xlu0 %603  ;;  %v2557_v14 = vpop.permute.xlu1 %601 }
 0x10c   : > { %4688 = vst [vmem:[#allocation37_spill] sm:$0xff] %v2555_v13  ;;  %4689 = vst [vmem:[#allocation38_spill] sm:$0xff] %v2557_v14 }
 0x10d   : > { %941 = vrot.lane.b32.xlu0 %v2225_v16, %s4527_s27  ;;  %930 = vrot.lane.b32.xlu1 %v4540_v0, %s4523_s26  ;;  %s4547_s26 = smov 93  }
 0x10f   : > { %v2563_v15 = vpop.permute.xlu0 %618  ;;  %v2565_v17 = vpop.permute.xlu1 %616 }
 0x110   : > { %4690 = vst [vmem:[#allocation39_spill] sm:$0xff] %v2563_v15  ;;  %4691 = vst [vmem:[#allocation40_spill] sm:$0xff] %v2565_v17 }
 0x111   : > { %945 = vrot.lane.b32.xlu0 %v4540_v0, %s4527_s27  ;;  %943 = vrot.lane.b32.xlu1 %v2235_v18, %s4527_s27  ;;  %s4537_s27 = smov 83  }
 0x113   : > { %v2571_v10 = vpop.permute.xlu0 %633  ;;  %v2573_v11 = vpop.permute.xlu1 %620 }
 0x114   : > { %4692 = vst [vmem:[#allocation41_spill] sm:$0xff] %v2571_v10  ;;  %4693 = vst [vmem:[#allocation42_spill] sm:$0xff] %v2573_v11 }
 0x115   : > { %960 = vrot.lane.b32.xlu0 %v2235_v18, %s4532_s25  ;;  %958 = vrot.lane.b32.xlu1 %v2225_v16, %s4532_s25 }
 0x117   : > { %v2579_v15 = vpop.permute.xlu0 %637  ;;  %v2581_v17 = vpop.permute.xlu1 %635 }
 0x118   : > { %4694 = vst [vmem:[#allocation43_spill] sm:$0xff] %v2579_v15  ;;  %4695 = vst [vmem:[#allocation44_spill] sm:$0xff] %v2581_v17 }
 0x119   : > { %975 = vrot.lane.b32.xlu0 %v2225_v16, %s4547_s26  ;;  %962 = vrot.lane.b32.xlu1 %v4540_v0, %s4532_s25  ;;  %s4544_s25 = smov 82  }
 0x11b   : > { %v2587_v10 = vpop.permute.xlu0 %652  ;;  %v2589_v11 = vpop.permute.xlu1 %650 }
 0x11c   : > { %4696 = vst [vmem:[#allocation45_spill] sm:$0xff] %v2587_v10  ;;  %4697 = vst [vmem:[#allocation46_spill] sm:$0xff] %v2589_v11  ;;  %v4539_v10 = vlaneseq }
 0x11d   : > { %979 = vrot.lane.b32.xlu0 %v4540_v0, %s4547_s26  ;;  %977 = vrot.lane.b32.xlu1 %v2235_v18, %s4547_s26  ;;  %s2654_s26 = sld [smem:[#allocation3]] }
 0x11f   : > { %v2595_v15 = vpop.permute.xlu0 %667  ;;  %v2597_v17 = vpop.permute.xlu1 %654 }
 0x120   : > { %4698 = vst [vmem:[#allocation47_spill] sm:$0xff] %v2595_v15  ;;  %4699 = vst [vmem:[#allocation48_spill] sm:$0xff] %v2597_v17  ;;  %v2612_v15 = vand.u32 127, %v4539_v10 }
 0x121   : > { %994 = vrot.lane.b32.xlu0 %v2235_v18, %s4537_s27  ;;  %992 = vrot.lane.b32.xlu1 %v2225_v16, %s4537_s27 }
 0x122   : > { %v225_v9 = vadd.s32 256, %v2612_v15  ;;  %v2632_v10 = vand.u32 15, %v2612_v15  ;;  %vm4579_vm1 = vcmp.lt.s32.totalorder %v2612_v15, 50  ;;  %vm4581_vm2 = vcmp.lt.s32.totalorder %v2612_v15, 49 }
 0x123   : > { %v2603_v14 = vpop.permute.xlu0 %671  ;;  %v2605_v11 = vpop.permute.xlu1 %669  ;;  %vm4583_vm3 = vcmp.lt.s32.totalorder %v2612_v15, 51  ;;  %vm4588_vm11 = vcmp.lt.s32.totalorder %v2612_v15, 47  ;;  %vm4582_vm12 = vcmp.lt.s32.totalorder %v2612_v15, 48 }
 0x124   : > { %4700 = vst [vmem:[#allocation49_spill] sm:$0xff] %v2603_v14  ;;  %4701 = vst [vmem:[#allocation50_spill] sm:$0xff] %v2605_v11  ;;  %v1882_v12 = vadd.s32 4294967168, %v225_v9  ;;  %v4708_v9 = vmov 0.0   ;;  %v2647_v7 = vadd.s32 4294967295, %v2632_v10  ;;  %v2664_v8 = vadd.s32 4294967294, %v2632_v10 }
 0x125   : > { %1009 = vrot.lane.b32.xlu0 %v2225_v16, %s4544_s25  ;;  %996 = vrot.lane.b32.xlu1 %v4540_v0, %s4537_s27  ;;  %s4554_s27 = smov 81  }
 0x126   : > { %vm4584_vm4 = vcmp.ge.s32.totalorder %v2647_v7, 0  ;;  %vm4585_vm8 = vcmp.ge.s32.totalorder %v2664_v8, 0 }
 0x127   : > { %v2614_v17 = vpop.permute.xlu0 %686  ;;  %v2616_v13 = vpop.permute.xlu1 %684 }
 0x128   : > { %4702 = vst [vmem:[#allocation51_spill] sm:$0xff] %v2614_v17  ;;  %4703 = vst [vmem:[#allocation52_spill] sm:$0xff] %v2616_v13 }
 0x129   : > { %1013 = vrot.lane.b32.xlu0 %v4540_v0, %s4544_s25  ;;  %1011 = vrot.lane.b32.xlu1 %v2235_v18, %s4544_s25  ;;  %v208_v0 = vsel %vm190_vm0, %v2213_v1, -inf  ;;  %s4563_s25 = smov 80   ;;  %v215_v1 = vsel %vm190_vm0, %v2221_v3, -inf }
 0x12a   : > { %v216_v4 = vrot.slane %v215_v1, 4 }
 0x12b   : > { %v2623_v11 = vpop.permute.xlu0 %707  ;;  %v2625_v14 = vpop.permute.xlu1 %688 }
 0x12c   : > { %4704 = vst [vmem:[#allocation53_spill] sm:$0xff] %v2623_v11  ;;  %4705 = vst [vmem:[#allocation54_spill] sm:$0xff] %v2625_v14  ;;  %v2640_v11 = vand.u32 15, %v1882_v12  ;;  %v209_v14 = vrot.slane %v208_v0, 4 }
 0x12d   : > { %1028 = vrot.lane.b32.xlu0 %v2235_v18, %s4554_s27  ;;  %1026 = vrot.lane.b32.xlu1 %v2225_v16, %s4554_s27 }
 0x12e   : > { %v260_v12 = vadd.s32 4294967294, %v2640_v11  ;;  %v252_v3 = vadd.s32 4294967293, %v2640_v11  ;;  %v210_v6 = vmax.f32 %v208_v0, %v209_v14  ;;  %v2687_v0 = vadd.s32 1, %v2632_v10 }
 0x12f   : > { %v2636_v13 = vpop.permute.xlu0 %711  ;;  %v2638_v17 = vpop.permute.xlu1 %709  ;;  %v324_v14 = vsel %vm4579_vm1, %v2335_v20, %v2365_v27  ;;  %v268_v2 = vadd.s32 4294967295, %v2640_v11  ;;  %v307_v20 = vsel %vm4583_vm3, %v2329_v19, %v2357_v25  ;;  %v311_v19 = vstv %s2654_s26  ;;  %s2809_s26 = sld [smem:[#allocation3 + $0x7]] }
 0x130   : > { %4706 = vst [vmem:[#allocation55_spill] sm:$0xff] %v2636_v13  ;;  %4707 = vst [vmem:[#allocation56_spill] sm:$0xff] %v2638_v17  ;;  %v2652_v13 = vadd.s32 4294967293, %v2632_v10  ;;  %vm262_vm6 = vcmp.ge.s32.totalorder %v260_v12, 0  ;;  %vm264_vm7 = vcmp.lt.s32.totalorder %v260_v12, 16  ;;  %vm254_vm9 = vcmp.ge.s32.totalorder %v252_v3, 0 }
 0x131   : > { %1043 = vrot.lane.b32.xlu0 %v2225_v16, %s4563_s25  ;;  %1030 = vrot.lane.b32.xlu1 %v4708_v9, %s4554_s27  ;;  %s2666_s27 = sld [smem:[#allocation3 + $0x2]]  ;;  %vm256_vm10 = vcmp.lt.s32.totalorder %v252_v3, 16  ;;  %vm2707_vm13 = vmand %vm262_vm6, %vm264_vm7  ;;  %v2722_v63 = vadd.s32 1, %v2640_v11  ;;  %vm279_vm14 = vcmp.lt.s32.totalorder %v2687_v0, 16  ;;  %vm270_vm0 = vcmp.ge.s32.totalorder %v268_v2, 0 }
 0x132   : > { %vm253_vm5 = vcmp.ge.s32.totalorder %v2652_v13, 0  ;;  %vm2731_vm15 = vmand %vm254_vm9, %vm256_vm10  ;;  %vm272_vm6 = vcmp.lt.s32.totalorder %v268_v2, 16  ;;  %v284_v54 = vadd.s32 2, %v2640_v11 }
 0x133   : > { %v2659_v17 = vpop.permute.xlu0 %726  ;;  %v2661_v5 = vpop.permute.xlu1 %724  ;;  %vm278_vm7 = vcmp.ge.s32.totalorder %v2722_v63, 0  ;;  %vm2767_vm9 = vmand %vm270_vm0, %vm272_vm6  ;;  %vm280_vm10 = vcmp.lt.s32.totalorder %v2722_v63, 16  ;;  %v372_v63 = vsel %vm4588_vm11, %v2363_v26, %v2387_v32 }
 0x134   : > { %4709 = vst [vmem:[#allocation57_spill] sm:$0xff] %v2659_v17  ;;  %4710 = vst [vmem:[#allocation58_spill] sm:$0xff] %v2661_v5  ;;  %vm286_vm6 = vcmp.ge.s32.totalorder %v284_v54, 0 }
 0x135   : > { %1047 = vrot.lane.b32.xlu0 %v4708_v9, %s4563_s25  ;;  %1045 = vrot.lane.b32.xlu1 %v2235_v18, %s4563_s25  ;;  %s2138_s25 = smov 79  }
 0x137   : > { %v2682_v5 = vpop.permute.xlu0 %741  ;;  %v2684_v17 = vpop.permute.xlu1 %728 }
 0x138   : > { %4711 = vst [vmem:[#allocation59_spill] sm:$0xff] %v2682_v5  ;;  %4712 = vst [vmem:[#allocation60_spill] sm:$0xff] %v2684_v17  ;;  %v211_v5 = vrot.slane %v210_v6, 2  ;;  %v217_v17 = vmax.f32 %v215_v1, %v216_v4  ;;  %v323_v4 = vsel %vm4579_vm1, %v2365_v27, %v2381_v31  ;;  %v325_v1 = vsel %vm4585_vm8, %v324_v14, 0.0 }
 0x139   : > { %1060 = vrot.lane.b32.xlu0 %v2235_v18, %s2138_s25  ;;  %1058 = vrot.lane.b32.xlu1 %v2225_v16, %s2138_s25  ;;  %v306_v31 = vsel %vm4583_vm3, %v2357_v25, %v2373_v29  ;;  %v345_v14 = vstv %s2666_s27  ;;  %v341_v25 = vsel %vm4581_vm2, %v2337_v21, %v2355_v24  ;;  %v329_v29 = vmul.f32 %v328_v60, %v325_v1  ;;  %s4589_s27 = smov 77   ;;  %vm2824_vm3 = vmand %vm278_vm7, %vm280_vm10 }
 0x13a   : > { %v212_v3 = vmax.f32 %v210_v6, %v211_v5  ;;  %v218_v59 = vrot.slane %v217_v17, 2  ;;  %v342_v21 = vsel %vm4584_vm4, %v341_v25, 0.0  ;;  %vm388_vm1 = vcmp.lt.s32.totalorder %v2612_v15, 46 }
 0x13b   : > { %v2724_v12 = vpop.permute.xlu0 %745  ;;  %v2726_v61 = vpop.permute.xlu1 %743 }
 0x13c   : > { %4715 = vst [vmem:[#allocation61_spill] sm:$0xff] %v2724_v12  ;;  %4716 = vst [vmem:[#allocation62_spill] sm:$0xff] %v2726_v61  ;;  %v308_v12 = vsel %vm253_vm5, %v307_v20, 0.0  ;;  %v326_v61 = vsel %vm2707_vm13, %v323_v4, 0.0  ;;  %v2754_v20 = vadd.s32 2, %v2632_v10  ;;  %v309_v4 = vsel %vm2731_vm15, %v306_v31, 0.0 }
 0x13d   : > { %1075 = vrot.lane.b32.xlu0 %v2225_v16, %s4586_s20  ;;  %1062 = vrot.lane.b32.xlu1 %v4708_v9, %s2138_s25  ;;  %v312_v57 = vmul.f32 %v311_v19, %v308_v12  ;;  %v340_v31 = vsel %vm4581_vm2, %v2355_v24, %v2379_v30  ;;  %v330_v58 = vmul.f32 %v328_v60, %v326_v61  ;;  %v213_v2 = vrot.slane %v212_v3, 1 }
 0x13e   : > { %v219_v12 = vmax.f32 %v217_v17, %v218_v59  ;;  %vm287_vm0 = vcmp.lt.s32.totalorder %v2754_v20, 16  ;;  %v394_v24 = vstv %s2715_s1  ;;  %v358_v30 = vsel %vm4582_vm12, %v2347_v22, %v2371_v28  ;;  %s2951_s1 = sld [smem:[#allocation3 + $0xc]] }
 0x13f   : > { %v2761_v5 = vpop.permute.xlu0 %760  ;;  %v2763_v6 = vpop.permute.xlu1 %758  ;;  %v343_v60 = vsel %vm2767_vm9, %v340_v31, 0.0  ;;  %v292_v61 = vadd.s32 3, %v2640_v11  ;;  %v346_v59 = vmul.f32 %v345_v14, %v342_v21  ;;  %vm288_vm2 = vcmp.lt.s32.totalorder %v284_v54, 16 }
 0x140   : > { %4719 = vst [vmem:[#allocation63_spill] sm:$0xff] %v2761_v5  ;;  %4720 = vst [vmem:[#allocation64_spill] sm:$0xff] %v2763_v6  ;;  %v313_v6 = vmul.f32 %v311_v19, %v309_v4  ;;  %v331_v5 = vadd.f32 %v329_v29, %v312_v57  ;;  %v373_v57 = vsel %vm4588_vm11, %v2349_v23, %v2363_v26  ;;  %v2807_v4 = vadd.s32 3, %v2632_v10 }
 0x141   : > { %1079 = vrot.lane.b32.xlu0 %v4708_v9, %s4586_s20  ;;  %1077 = vrot.lane.b32.xlu1 %v2235_v18, %s4586_s20  ;;  %v357_v29 = vsel %vm4582_vm12, %v2371_v28, %v2389_v33  ;;  %v2815_v21 = vmax.f32 %v212_v3, %v213_v2  ;;  %v347_v11 = vmul.f32 %v345_v14, %v343_v60  ;;  %vm4609_vm12 = vcmp.lt.s32.totalorder %v2612_v15, 45  ;;  %vm2842_vm7 = vmand %vm286_vm6, %vm288_vm2  ;;  %s2850_s20 = sld [smem:[#allocation3 + $0x8]] }
 0x142   : > { %v332_v17 = vadd.f32 %v330_v58, %v313_v6  ;;  %v220_v58 = vrot.slane %v219_v12, 1  ;;  %v348_v6 = vadd.f32 %v346_v59, %v331_v5  ;;  %v361_v31 = vmul.f32 %v360_v56, %v358_v30 }
 0x143   : > { %v2794_v25 = vpop.permute.xlu0 %775  ;;  %v2796_v19 = vpop.permute.xlu1 %762  ;;  %v374_v28 = vsel %vm279_vm14, %v373_v57, 0.0  ;;  %v390_v10 = vsel %vm388_vm1, %v2397_v35, %v2395_v34  ;;  %vm294_vm4 = vcmp.ge.s32.totalorder %v292_v61, 0  ;;  %vm296_vm8 = vcmp.lt.s32.totalorder %v292_v61, 16  ;;  %v4759_v35 = vld [vmem:[#allocation39_spill] sm:$0xff] }
 0x144   : > { %4723 = vst [vmem:[#allocation65_spill] sm:$0xff] %v2796_v19  ;;  %v349_v5 = vadd.f32 %v347_v11, %v332_v17  ;;  %v362_v2 = vmul.f32 %v360_v56, %v357_v29  ;;  %v389_v60 = vsel %vm388_vm1, %v2395_v34, %v2405_v37  ;;  %vm295_vm10 = vcmp.lt.s32.totalorder %v2807_v4, 16  ;;  %vm2868_vm2 = vmand %vm294_vm4, %vm296_vm8 }
 0x145   : > { %1094 = vrot.lane.b32.xlu0 %v2235_v18, %s4589_s27  ;;  %1092 = vrot.lane.b32.xlu1 %v2225_v16, %s4589_s27  ;;  %v407_v26 = vsel %vm4609_vm12, %v2403_v36, %v2413_v39  ;;  %vm4593_vm11 = vcmp.lt.s32.totalorder %v2612_v15, 35  ;;  %v2862_v32 = vmax.f32 %v219_v12, %v220_v58  ;;  %v363_v34 = vadd.f32 %v361_v31, %v348_v6 }
 0x146   : > { %v391_v37 = vsel %vm287_vm0, %v390_v10, 0.0  ;;  %v411_v56 = vstv %s2785_s18  ;;  %v4730_v12 = vstv %s2676_s19  ;;  %v375_v59 = vsel %vm2824_vm3, %v372_v63, 0.0  ;;  %s2918_s18 = sld [smem:[#allocation3 + $0xa]]  ;;  %s2966_s19 = sld [smem:[#allocation3 + $0xe]] }
 0x147   : > { %v2832_v14 = vpop.permute.xlu0 %779  ;;  %v2834_v3 = vpop.permute.xlu1 %777  ;;  %v378_v57 = vmul.f32 %v4730_v12, %v374_v28  ;;  %v392_v61 = vsel %vm2842_vm7, %v389_v60, 0.0  ;;  %vm4592_vm4 = vcmp.lt.s32.totalorder %v2612_v15, 34  ;;  %v364_v58 = vadd.f32 %v362_v2, %v349_v5 }
 0x148   : > { %v423_v11 = vsel %vm4593_vm11, %v2419_v40, %v2429_v43  ;;  %v395_v6 = vmul.f32 %v394_v24, %v391_v37  ;;  %v428_v28 = vstv %s2809_s26  ;;  %vm4591_vm8 = vcmp.lt.s32.totalorder %v2612_v15, 33  ;;  %s3061_s26 = sld [smem:[#allocation3 + $0x13]] }
 0x149   : > { %1109 = vrot.lane.b32.xlu0 %v2815_v21, %s2093_s21  ;;  %1096 = vrot.lane.b32.xlu1 %v4708_v9, %s4589_s27  ;;  %v406_v9 = vsel %vm4609_vm12, %v2413_v39, %v2411_v38  ;;  %s2884_s27 = sld [smem:[#allocation3 + $0x9]]  ;;  %v408_v38 = vsel %vm295_vm10, %v407_v26, 0.0  ;;  %v424_v39 = vsel %vm4593_vm11, %v2421_v41, %v2419_v40  ;;  %v4731_v10 = vmov %v4730_v12  ;;  %v4755_v41 = vld [vmem:[#allocation38_spill] sm:$0xff] }
 0x14a   : > { %v409_v31 = vsel %vm2868_vm2, %v406_v9, 0.0  ;;  %v379_v63 = vmul.f32 %v4731_v10, %v375_v59  ;;  %v380_v5 = vadd.f32 %v378_v57, %v363_v34  ;;  %v396_v40 = vmul.f32 %v394_v24, %v392_v61 }
 0x14b   : > { %v2886_v17 = vpop.permute.xlu0 %794  ;;  %v2888_v29 = vpop.permute.xlu1 %792  ;;  %v441_v43 = vsel %vm4592_vm4, %v2427_v42, %v2437_v45  ;;  %v412_v2 = vmul.f32 %v411_v56, %v408_v38  ;;  %v425_v60 = vsel %vm253_vm5, %v424_v39, 0.0  ;;  %v426_v26 = vsel %vm2731_vm15, %v423_v11, 0.0 }
 0x14c   : > { %v440_v34 = vsel %vm4592_vm4, %v2437_v45, %v2435_v44  ;;  %v381_v9 = vadd.f32 %v379_v63, %v364_v58  ;;  %v413_v12 = vmul.f32 %v411_v56, %v409_v31  ;;  %v445_v57 = vstv %s2850_s20  ;;  %s3009_s20 = sld [smem:[#allocation3 + $0x10]] }
 0x14d   : > { %1123 = vrot.lane.b32.xlu0 %v2815_v21, %s2094_s22  ;;  %1111 = vrot.lane.b32.xlu1 %v2862_v32, %s2093_s21  ;;  %v397_v59 = vadd.f32 %v395_v6, %v380_v5  ;;  %vm4732_vm6 = vcmp.ge.s32.totalorder %v2664_v8, 0  ;;  %v458_v38 = vsel %vm4591_vm8, %v2445_v47, %v2443_v46  ;;  %v457_v44 = vsel %vm4591_vm8, %v2443_v46, %v2453_v49  ;;  %s2949_s21 = sld [smem:[#allocation3 + $0xb]]  ;;  %v4747_v47 = vld [vmem:[#allocation29_spill] sm:$0xff] }
 0x14e   : > { %v442_v61 = vsel %vm4732_vm6, %v441_v43, 0.0  ;;  %v398_v45 = vadd.f32 %v396_v40, %v381_v9  ;;  %v429_v56 = vmul.f32 %v428_v28, %v425_v60  ;;  %v430_v58 = vmul.f32 %v428_v28, %v426_v26 }
 0x14f   : > { %v2928_v24 = vpop.permute.xlu0 %809  ;;  %v2930_v37 = vpop.permute.xlu1 %796  ;;  %v443_v39 = vsel %vm2707_vm13, %v440_v34, 0.0  ;;  %v414_v11 = vadd.f32 %v412_v2, %v397_v59  ;;  %v462_v6 = vstv %s2884_s27  ;;  %vm4603_vm6 = vcmp.lt.s32.totalorder %v2612_v15, 32  ;;  %s3080_s27 = sld [smem:[#allocation3 + $0x14]] }
 0x150   : > { %vm4594_vm8 = vcmp.lt.s32.totalorder %v2612_v15, 31  ;;  %v415_v31 = vadd.f32 %v413_v12, %v398_v45  ;;  %v446_v28 = vmul.f32 %v445_v57, %v442_v61  ;;  %vm4733_vm4 = vcmp.ge.s32.totalorder %v2647_v7, 0  ;;  %v4734_v45 = vld [vmem:[#allocation20_spill] sm:$0xff] }
 0x151   : > { %1137 = vrot.lane.b32.xlu0 %v2815_v21, %s2095_s23  ;;  %1125 = vrot.lane.b32.xlu1 %v2862_v32, %s2094_s22  ;;  %v459_v10 = vsel %vm4733_vm4, %v458_v38, 0.0  ;;  %v460_v63 = vsel %vm2767_vm9, %v457_v44, 0.0  ;;  %v447_v5 = vmul.f32 %v445_v57, %v443_v39  ;;  %s2964_s22 = sld [smem:[#allocation3 + $0xd]]  ;;  %v431_v40 = vadd.f32 %v429_v56, %v414_v11  ;;  %v4735_v56 = vld [vmem:[#allocation18_spill] sm:$0xff] }
 0x152   : > { %v432_v43 = vadd.f32 %v430_v58, %v415_v31  ;;  %v477_v2 = vstv %s2918_s18  ;;  %vm4595_vm11 = vcmp.lt.s32.totalorder %v2612_v15, 30  ;;  %v463_v60 = vmul.f32 %v462_v6, %v459_v10  ;;  %s3257_s18 = sld [smem:[#allocation3 + $0x1b]] }
 0x153   : > { %v2956_v46 = vpop.permute.xlu0 %813  ;;  %v2958_v49 = vpop.permute.xlu1 %811  ;;  %v464_v26 = vmul.f32 %v462_v6, %v460_v63  ;;  %v475_v34 = vsel %vm4603_vm6, %v2451_v48, %v2461_v51  ;;  %v490_v9 = vsel %vm4594_vm8, %v2469_v53, %v2467_v52  ;;  %v448_v59 = vadd.f32 %v446_v28, %v431_v40  ;;  %v4736_v63 = vld [vmem:[#allocation19_spill] sm:$0xff]  ;;  %v4744_v53 = vld [vmem:[#allocation28_spill] sm:$0xff] }
 0x154   : > { %v474_v61 = vsel %vm4603_vm6, %v2461_v51, %v2459_v50  ;;  %v449_v38 = vadd.f32 %v447_v5, %v432_v43  ;;  %v489_v44 = vsel %vm4594_vm8, %v2467_v52, %v2477_v55  ;;  %v507_v58 = vsel %vm4595_vm11, %v4735_v56, %v4734_v45  ;;  %v4737_v43 = vld [vmem:[#allocation21_spill] sm:$0xff]  ;;  %v4746_v48 = vld [vmem:[#allocation32_spill] sm:$0xff] }
 0x155   : > { %1151 = vrot.lane.b32.xlu0 %v2815_v21, %s2096_s24  ;;  %1139 = vrot.lane.b32.xlu1 %v2862_v32, %s2095_s23  ;;  %s2990_s23 = sld [smem:[#allocation3 + $0xf]]  ;;  %vm4596_vm4 = vcmp.lt.s32.totalorder %v2612_v15, 29  ;;  %v478_v50 = vmul.f32 %v477_v2, %v475_v34  ;;  %v491_v51 = vsel %vm279_vm14, %v490_v9, 0.0  ;;  %v494_v52 = vstv %s2949_s21  ;;  %v4742_v56 = vld [vmem:[#allocation25_spill] sm:$0xff]  ;;  %s3275_s21 = sld [smem:[#allocation3 + $0x1d]] }
 0x156   : > { %v511_v55 = vstv %s2951_s1  ;;  %v465_v39 = vadd.f32 %v463_v60, %v448_v59  ;;  %v466_v11 = vadd.f32 %v464_v26, %v449_v38  ;;  %v479_v6 = vmul.f32 %v477_v2, %v474_v61  ;;  %v4738_v60 = vld [vmem:[#allocation22_spill] sm:$0xff]  ;;  %v4739_v61 = vld [vmem:[#allocation24_spill] sm:$0xff]  ;;  %s3348_s1 = sld [smem:[#allocation3 + $0x20]] }
 0x157   : > { %v2982_v12 = vpop.permute.xlu0 %826  ;;  %v2984_v57 = vpop.permute.xlu1 %824  ;;  %vm4602_vm8 = vcmp.lt.s32.totalorder %v2612_v15, 19  ;;  %v492_v10 = vsel %vm2824_vm3, %v489_v44, 0.0  ;;  %v506_v5 = vsel %vm4595_vm11, %v4734_v45, %v4736_v63  ;;  %v508_v40 = vsel %vm287_vm0, %v507_v58, 0.0  ;;  %v4740_v44 = vld [vmem:[#allocation26_spill] sm:$0xff]  ;;  %v4741_v45 = vld [vmem:[#allocation23_spill] sm:$0xff] }
 0x158   : > { %v524_v2 = vsel %vm4596_vm4, %v4738_v60, %v4737_v43  ;;  %v495_v26 = vmul.f32 %v494_v52, %v491_v51  ;;  %v528_v34 = vstv %s2964_s22  ;;  %v545_v9 = vstv %s2966_s19  ;;  %s3391_s22 = sld [smem:[#allocation3 + $0x22]]  ;;  %s4797_s19 = smov 15  }
 0x159   : > { %1163 = vrot.lane.b32.xlu0 %v2815_v21, %s2097_s29  ;;  %1153 = vrot.lane.b32.xlu1 %v2862_v32, %s2096_s24  ;;  %s3030_s24 = sld [smem:[#allocation3 + $0x11]]  ;;  %v480_v59 = vadd.f32 %v478_v50, %v465_v39  ;;  %v523_v38 = vsel %vm4596_vm4, %v4737_v43, %v4739_v61  ;;  %v541_v58 = vsel %vm4602_vm8, %v4741_v45, %v4740_v44  ;;  %vm4601_vm11 = vcmp.lt.s32.totalorder %v2612_v15, 18  ;;  %v4743_v45 = vld [vmem:[#allocation27_spill] sm:$0xff] }
 0x15a   : > { %v496_v51 = vmul.f32 %v494_v52, %v492_v10  ;;  %v509_v63 = vsel %vm2842_vm7, %v506_v5, 0.0  ;;  %v512_v60 = vmul.f32 %v511_v55, %v508_v40  ;;  %v525_v50 = vsel %vm295_vm10, %v524_v2, 0.0 }
 0x15b   : > { %v3012_v31 = vpop.permute.xlu0 %841  ;;  %v3014_v28 = vpop.permute.xlu1 %828  ;;  %v481_v61 = vadd.f32 %v479_v6, %v466_v11  ;;  %v540_v52 = vsel %vm4602_vm8, %v4740_v44, %v4742_v56  ;;  %v562_v10 = vstv %s2990_s23  ;;  %vm4604_vm4 = vcmp.lt.s32.totalorder %v2612_v15, 17  ;;  %s3453_s23 = sld [smem:[#allocation3 + $0x25]] }
 0x15c   : > { %v497_v5 = vadd.f32 %v495_v26, %v480_v59  ;;  %v526_v40 = vsel %vm2868_vm2, %v523_v38, 0.0  ;;  %v542_v2 = vsel %vm253_vm5, %v541_v58, 0.0  ;;  %v558_v11 = vsel %vm4601_vm11, %v4744_v53, %v4743_v45  ;;  %v4745_v26 = vld [vmem:[#allocation30_spill] sm:$0xff] }
 0x15d   : > { %1177 = vrot.lane.b32.xlu0 %v2815_v21, %s2098_s30  ;;  %1165 = vrot.lane.b32.xlu1 %v2862_v32, %s2097_s29  ;;  %s3049_s29 = sld [smem:[#allocation3 + $0x12]]  ;;  %v513_v56 = vmul.f32 %v511_v55, %v509_v63  ;;  %v529_v6 = vmul.f32 %v528_v34, %v525_v50  ;;  %v557_v59 = vsel %vm4601_vm11, %v4743_v45, %v4745_v26  ;;  %v579_v38 = vstv %s3009_s20  ;;  %s3489_s20 = sld [smem:[#allocation3 + $0x26]] }
 0x15e   : > { %v498_v44 = vadd.f32 %v496_v51, %v481_v61  ;;  %v514_v58 = vadd.f32 %v512_v60, %v497_v5  ;;  %v543_v53 = vsel %vm2731_vm15, %v540_v52, 0.0  ;;  %v575_v55 = vsel %vm4604_vm4, %v4747_v47, %v4746_v48  ;;  %v4749_v51 = vld [vmem:[#allocation31_spill] sm:$0xff] }
 0x15f   : > { %v3051_v39 = vpop.permute.xlu0 %845  ;;  %v3053_v43 = vpop.permute.xlu1 %843  ;;  %v530_v42 = vmul.f32 %v528_v34, %v526_v40  ;;  %v546_v45 = vmul.f32 %v545_v9, %v542_v2  ;;  %vm4748_vm11 = vcmp.ge.s32.totalorder %v2664_v8, 0  ;;  %v574_v60 = vsel %vm4604_vm4, %v4746_v48, %v4749_v51 }
 0x160   : > { %v559_v26 = vsel %vm4748_vm11, %v558_v11, 0.0  ;;  %v560_v61 = vsel %vm2707_vm13, %v557_v59, 0.0  ;;  %vm4611_vm8 = vcmp.lt.s32.totalorder %v2612_v15, 16  ;;  %v594_v52 = vstv %s3030_s24  ;;  %s4804_s24 = smov 13  }
 0x161   : > { %1191 = vrot.lane.b32.xlu0 %v2815_v21, %s2099_s4  ;;  %1179 = vrot.lane.b32.xlu1 %v2862_v32, %s2098_s30  ;;  %vm605_vm6 = vcmp.lt.s32.totalorder %v2612_v15, 15  ;;  %v515_v34 = vadd.f32 %v513_v56, %v498_v44  ;;  %v531_v5 = vadd.f32 %v529_v6, %v514_v58  ;;  %v547_v40 = vmul.f32 %v545_v9, %v543_v53  ;;  %s3113_s30 = sld [smem:[#allocation3 + $0x15]]  ;;  %v4752_v58 = vld [vmem:[#allocation36_spill] sm:$0xff] }
 0x162   : > { %vm4750_vm11 = vcmp.ge.s32.totalorder %v2647_v7, 0  ;;  %v563_v2 = vmul.f32 %v562_v10, %v559_v26  ;;  %v577_v11 = vsel %vm2767_vm9, %v574_v60, 0.0  ;;  %vm4626_vm4 = vcmp.lt.s32.totalorder %v2612_v15, 14  ;;  %v4754_v60 = vld [vmem:[#allocation37_spill] sm:$0xff] }
 0x163   : > { %v3088_v63 = vpop.permute.xlu0 %860  ;;  %v3090_v50 = vpop.permute.xlu1 %858  ;;  %v576_v48 = vsel %vm4750_vm11, %v575_v55, 0.0  ;;  %v611_v59 = vstv %s3049_s29  ;;  %v532_v56 = vadd.f32 %v530_v42, %v515_v34  ;;  %v548_v6 = vadd.f32 %v546_v45, %v531_v5  ;;  %v4753_v55 = vld [vmem:[#allocation33_spill] sm:$0xff]  ;;  %v4756_v45 = vld [vmem:[#allocation35_spill] sm:$0xff]  ;;  %s3512_s29 = sld [smem:[#allocation3 + $0x27]] }
 0x164   : > { %v564_v53 = vmul.f32 %v562_v10, %v560_v61  ;;  %v628_v9 = vstv %s3061_s26  ;;  %v580_v44 = vmul.f32 %v579_v38, %v576_v48  ;;  %v591_v26 = vsel %vm4611_vm8, %v4753_v55, %v4752_v58  ;;  %v4757_v48 = vld [vmem:[#allocation34_spill] sm:$0xff]  ;;  %s3528_s26 = sld [smem:[#allocation3 + $0x28]] }
 0x165   : > { %1205 = vrot.lane.b32.xlu0 %v2815_v21, %s2100_s5  ;;  %1193 = vrot.lane.b32.xlu1 %v2862_v32, %s2099_s4  ;;  %s3120_s4 = sld [smem:[#allocation3 + $0x16]]  ;;  %v606_v36 = vsel %vm605_vm6, %v4755_v41, %v4754_v60  ;;  %vm4614_vm11 = vcmp.lt.s32.totalorder %v2612_v15, 13  ;;  %v549_v42 = vadd.f32 %v547_v40, %v532_v56  ;;  %v581_v10 = vmul.f32 %v579_v38, %v577_v11  ;;  %v4758_v60 = vld [vmem:[#allocation42_spill] sm:$0xff]  ;;  %v4761_v56 = vld [vmem:[#allocation40_spill] sm:$0xff] }
 0x166   : > { %v607_v61 = vsel %vm605_vm6, %v4756_v45, %v4755_v41  ;;  %v645_v34 = vstv %s3080_s27  ;;  %v565_v5 = vadd.f32 %v563_v2, %v548_v6  ;;  %v592_v58 = vsel %vm4611_vm8, %v4757_v48, %v4753_v55  ;;  %v4762_v48 = vld [vmem:[#allocation43_spill] sm:$0xff]  ;;  %v4763_v45 = vld [vmem:[#allocation44_spill] sm:$0xff]  ;;  %s3530_s27 = sld [smem:[#allocation3 + $0x29]] }
 0x167   : > { %v3115_v51 = vpop.permute.xlu0 %875  ;;  %v3117_v47 = vpop.permute.xlu1 %862  ;;  %v623_v23 = vsel %vm4626_vm4, %v4759_v35, %v4758_v60  ;;  %vm4617_vm12 = vcmp.lt.s32.totalorder %v2612_v15, 3  ;;  %v566_v11 = vadd.f32 %v564_v53, %v549_v42  ;;  %v596_v41 = vmul.f32 %v594_v52, %v591_v26 }
 0x168   : > { %4751 = vst [vmem:[#allocation20_spill] sm:$0xff] %v3115_v51  ;;  %v609_v2 = vsel %vm2824_vm3, %v606_v36, 0.0  ;;  %v624_v6 = vsel %vm4626_vm4, %v4761_v56, %v4759_v35  ;;  %v582_v55 = vadd.f32 %v580_v44, %v565_v5  ;;  %v608_v60 = vsel %vm279_vm14, %v607_v61, 0.0  ;;  %v4764_v44 = vld [vmem:[#allocation41_spill] sm:$0xff]  ;;  %v4770_v51 = vld [vmem:[#allocation50_spill] sm:$0xff] }
 0x169   : > { %1219 = vrot.lane.b32.xlu0 %v2815_v21, %s2101_s6  ;;  %1207 = vrot.lane.b32.xlu1 %v2862_v32, %s2100_s5  ;;  %v640_v22 = vsel %vm4614_vm11, %v4763_v45, %v4762_v48  ;;  %vm4615_vm8 = vcmp.lt.s32.totalorder %v2612_v15, 2  ;;  %v583_v36 = vadd.f32 %v581_v10, %v566_v11  ;;  %v595_v35 = vmul.f32 %v594_v52, %v592_v58  ;;  %v4765_v48 = vld [vmem:[#allocation48_spill] sm:$0xff]  ;;  %v4766_v56 = vld [vmem:[#allocation45_spill] sm:$0xff]  ;;  %s3190_s5 = sld [smem:[#allocation3 + $0x17]] }
 0x16a   : > { %v626_v53 = vsel %vm2842_vm7, %v623_v23, 0.0  ;;  %v641_v26 = vsel %vm4614_vm11, %v4764_v44, %v4763_v45  ;;  %v613_v42 = vmul.f32 %v611_v59, %v609_v2  ;;  %v625_v61 = vsel %vm287_vm0, %v624_v6, 0.0  ;;  %v4768_v44 = vld [vmem:[#allocation46_spill] sm:$0xff] }
 0x16b   : > { %v3149_v38 = vpop.permute.xlu0 %879  ;;  %v3151_v40 = vpop.permute.xlu1 %877  ;;  %v662_v5 = vstv %s3113_s30  ;;  %v598_v23 = vadd.f32 %v596_v41, %v583_v36  ;;  %v612_v58 = vmul.f32 %v611_v59, %v608_v60  ;;  %v643_v11 = vsel %vm2868_vm2, %v640_v22, 0.0  ;;  %s4807_s30 = smov 3  }
 0x16c   : > { %4760 = vst [vmem:[#allocation19_spill] sm:$0xff] %v3149_v38  ;;  %v657_v38 = vsel %vm4617_vm12, %v4766_v56, %v4765_v48  ;;  %v679_v45 = vstv %s3120_s4  ;;  %v630_v2 = vmul.f32 %v628_v9, %v626_v53  ;;  %v642_v6 = vsel %vm295_vm10, %v641_v26, 0.0  ;;  %v4771_v53 = vld [vmem:[#allocation47_spill] sm:$0xff]  ;;  %s4810_s4 = smov 2  }
 0x16d   : > { %1233 = vrot.lane.b32.xlu0 %v2815_v21, %s2102_s7  ;;  %1221 = vrot.lane.b32.xlu1 %v2862_v32, %s2101_s6  ;;  %v658_v48 = vsel %vm4617_vm12, %v4768_v44, %v4766_v56  ;;  %v597_v22 = vadd.f32 %v595_v35, %v582_v55  ;;  %v629_v41 = vmul.f32 %v628_v9, %v625_v61  ;;  %v660_v60 = vsel %vm2731_vm15, %v657_v38, 0.0  ;;  %s3209_s6 = sld [smem:[#allocation3 + $0x18]]  ;;  %v4773_v44 = vld [vmem:[#allocation51_spill] sm:$0xff] }
 0x16e   : > { %vm4616_vm11 = vcmp.lt.s32.totalorder %v2612_v15, 1  ;;  %v615_v56 = vadd.f32 %v613_v42, %v598_v23  ;;  %v647_v36 = vmul.f32 %v645_v34, %v643_v11  ;;  %v675_v26 = vsel %vm4615_vm8, %v4771_v53, %v4770_v51  ;;  %v4774_v53 = vld [vmem:[#allocation52_spill] sm:$0xff] }
 0x16f   : > { %v3183_v10 = vpop.permute.xlu0 %894  ;;  %v3185_v52 = vpop.permute.xlu1 %892  ;;  %v614_v38 = vadd.f32 %v612_v58, %v597_v22  ;;  %v646_v61 = vmul.f32 %v645_v34, %v642_v6  ;;  %v659_v42 = vsel %vm253_vm5, %v658_v48, 0.0  ;;  %vm4620_vm12 = vcmp.lt.s32.totalorder %v2612_v15, 125 }
 0x170   : > { %4767 = vst [vmem:[#allocation21_spill] sm:$0xff] %v3183_v10  ;;  %v4769_v10 = vld [vmem:[#allocation49_spill] sm:$0xff]  ;;  %v632_v11 = vadd.f32 %v630_v2, %v615_v56  ;;  %v663_v48 = vmul.f32 %v662_v5, %v659_v42  ;;  %v696_v56 = vstv %s3190_s5  ;;  %vm4628_vm4 = vcmp.lt.s32.totalorder %v2612_v15, 110  ;;  %s3568_s5 = sld [smem:[#allocation3 + $0x2a]] }
 0x171   : > { %v674_v59 = vsel %vm4615_vm8, %v4770_v51, %v4769_v10  ;;  %1247 = vrot.lane.b32.xlu0 %v2815_v21, %s2103_s8  ;;  %1235 = vrot.lane.b32.xlu1 %v2862_v32, %s2102_s7  ;;  %v4772_v10 = vld [vmem:[#allocation54_spill] sm:$0xff]  ;;  %v664_v51 = vmul.f32 %v662_v5, %v660_v60  ;;  %v631_v34 = vadd.f32 %v629_v41, %v614_v38  ;;  %vm4775_vm8 = vcmp.ge.s32.totalorder %v2664_v8, 0  ;;  %s3239_s7 = sld [smem:[#allocation3 + $0x19]] }
 0x172   : > { %v691_v55 = vsel %vm4616_vm11, %v4773_v44, %v4772_v10  ;;  %v677_v23 = vsel %vm2707_vm13, %v674_v59, 0.0  ;;  %v692_v10 = vsel %vm4616_vm11, %v4774_v53, %v4773_v44  ;;  %v676_v58 = vsel %vm4775_vm8, %v675_v26, 0.0 }
 0x173   : > { %v3219_v9 = vpop.permute.xlu0 %909  ;;  %v3221_v35 = vpop.permute.xlu1 %896  ;;  %v694_v2 = vsel %vm2767_vm9, %v691_v55, 0.0  ;;  %v649_v6 = vadd.f32 %v647_v36, %v632_v11  ;;  %v681_v59 = vmul.f32 %v679_v45, %v677_v23  ;;  %v648_v60 = vadd.f32 %v646_v61, %v631_v34  ;;  %v4778_v11 = vld [vmem:[#allocation55_spill] sm:$0xff]  ;;  %v4780_v34 = vld [vmem:[#allocation53_spill] sm:$0xff] }
 0x174   : > { %vm4777_vm11 = vcmp.ge.s32.totalorder %v2647_v7, 0  ;;  %v680_v38 = vmul.f32 %v679_v45, %v676_v58  ;;  %v698_v55 = vmul.f32 %v696_v56, %v694_v2  ;;  %vm4618_vm8 = vcmp.lt.s32.totalorder %v2612_v15, 127 }
 0x175   : > { %1259 = vrot.lane.b32.xlu0 %v2815_v21, %s2104_s9  ;;  %1249 = vrot.lane.b32.xlu1 %v2862_v32, %s2103_s8  ;;  %v693_v41 = vsel %vm4777_vm11, %v692_v10, 0.0  ;;  %s3248_s8 = sld [smem:[#allocation3 + $0x1a]]  ;;  %v666_v26 = vadd.f32 %v664_v51, %v649_v6  ;;  %v702_v5 = vstv %s3209_s6  ;;  %v665_v36 = vadd.f32 %v663_v48, %v648_v60  ;;  %v4779_v51 = vld [vmem:[#allocation56_spill] sm:$0xff]  ;;  %s3570_s6 = sld [smem:[#allocation3 + $0x2b]] }
 0x176   : > { %v697_v42 = vmul.f32 %v696_v56, %v693_v41  ;;  %vm4619_vm11 = vcmp.lt.s32.totalorder %v2612_v15, 126  ;;  %v714_v10 = vsel %vm4618_vm8, %v4779_v51, %v4778_v11  ;;  %v715_v58 = vsel %vm4618_vm8, %v4780_v34, %v4779_v51  ;;  %v4781_v41 = vld [vmem:[#allocation57_spill] sm:$0xff]  ;;  %v4782_v56 = vld [vmem:[#allocation58_spill] sm:$0xff] }
 0x177   : > { %v3241_v44 = vpop.permute.xlu0 %913  ;;  %v3243_v22 = vpop.permute.xlu1 %911  ;;  %v683_v61 = vadd.f32 %v681_v59, %v666_v26  ;;  %v682_v2 = vadd.f32 %v680_v38, %v665_v36  ;;  %v704_v48 = vmul.f32 %v702_v5, %v2235_v18  ;;  %v703_v59 = vmul.f32 %v702_v5, %v2225_v16  ;;  %v4783_v36 = vld [vmem:[#allocation60_spill] sm:$0xff]  ;;  %v4786_v34 = vld [vmem:[#allocation62_spill] sm:$0xff] }
 0x178   : > { %4776 = vst [vmem:[#allocation24_spill] sm:$0xff] %v3241_v44  ;;  %v719_v60 = vstv %s3239_s7  ;;  %v732_v18 = vsel %vm4619_vm11, %v4782_v56, %v4781_v41  ;;  %vm4622_vm8 = vcmp.lt.s32.totalorder %v2612_v15, 115  ;;  %v716_v38 = vsel %vm279_vm14, %v715_v58, 0.0  ;;  %v4787_v56 = vld [vmem:[#allocation59_spill] sm:$0xff]  ;;  %s4812_s7 = smov 1  }
 0x179   : > { %1273 = vrot.lane.b32.xlu0 %v2815_v21, %s2105_s10  ;;  %1261 = vrot.lane.b32.xlu1 %v2862_v32, %s2104_s9  ;;  %v700_v6 = vadd.f32 %v698_v55, %v683_v61  ;;  %s3273_s9 = sld [smem:[#allocation3 + $0x1c]]  ;;  %v699_v26 = vadd.f32 %v697_v42, %v682_v2  ;;  %v717_v55 = vsel %vm2824_vm3, %v714_v10, 0.0  ;;  %v731_v16 = vsel %vm4619_vm11, %v4781_v41, %v4783_v36  ;;  %v4788_v2 = vld [vmem:[#allocation61_spill] sm:$0xff] }
 0x17a   : > { %v749_v42 = vsel %vm4620_vm12, %v4787_v56, %v4786_v34  ;;  %v733_v10 = vsel %vm287_vm0, %v732_v18, 0.0  ;;  %v748_v41 = vsel %vm4620_vm12, %v4786_v34, %v4788_v2  ;;  %vm4624_vm11 = vcmp.lt.s32.totalorder %v2612_v15, 114  ;;  %v4790_v18 = vld [vmem:[#allocation64_spill] sm:$0xff] }
 0x17b   : > { %v3259_v23 = vpop.permute.xlu0 %928  ;;  %v3261_v45 = vpop.permute.xlu1 %926  ;;  %v736_v51 = vstv %s3248_s8  ;;  %v706_v58 = vadd.f32 %v704_v48, %v700_v6  ;;  %v720_v56 = vmul.f32 %v719_v60, %v716_v38  ;;  %v721_v36 = vmul.f32 %v719_v60, %v717_v55  ;;  %v4789_v48 = vld [vmem:[#allocation63_spill] sm:$0xff]  ;;  %s3605_s8 = sld [smem:[#allocation3 + $0x2c]] }
 0x17c   : > { %v734_v6 = vsel %vm2842_vm7, %v731_v16, 0.0  ;;  %v766_v34 = vsel %vm4622_vm8, %v4790_v18, %v4789_v48  ;;  %v705_v2 = vadd.f32 %v703_v59, %v699_v26  ;;  %v753_v11 = vstv %s3257_s18  ;;  %s3620_s18 = sld [smem:[#allocation3 + $0x2d]] }
 0x17d   : > { %1287 = vrot.lane.b32.xlu0 %v2815_v21, %s2106_s11  ;;  %1275 = vrot.lane.b32.xlu1 %v2862_v32, %s2105_s10  ;;  %s3305_s10 = sld [smem:[#allocation3 + $0x1e]]  ;;  %v750_v53 = vsel %vm295_vm10, %v749_v42, 0.0  ;;  %vm4625_vm12 = vcmp.lt.s32.totalorder %v2612_v15, 113  ;;  %v737_v55 = vmul.f32 %v736_v51, %v733_v10  ;;  %v751_v16 = vsel %vm2868_vm2, %v748_v41, 0.0 }
 0x17e   : > { %v765_v59 = vsel %vm4622_vm8, %v4789_v48, %v2796_v19  ;;  %v783_v26 = vsel %vm4624_vm11, %v2794_v25, %v2834_v3  ;;  %v738_v42 = vmul.f32 %v736_v51, %v734_v6  ;;  %v722_v10 = vadd.f32 %v720_v56, %v705_v2 }
 0x17f   : > { %v3296_v5 = vpop.permute.xlu0 %941  ;;  %v3298_v61 = vpop.permute.xlu1 %930  ;;  %v770_v18 = vstv %s3273_s9  ;;  %v723_v41 = vadd.f32 %v721_v36, %v706_v58  ;;  %v754_v48 = vmul.f32 %v753_v11, %v750_v53  ;;  %v782_v25 = vsel %vm4624_vm11, %v2834_v3, %v2832_v14  ;;  %s4814_s9 = smov 127  }
 0x180   : > { %4784 = vst [vmem:[#allocation26_spill] sm:$0xff] %v3296_v5  ;;  %4785 = vst [vmem:[#allocation25_spill] sm:$0xff] %v3298_v61  ;;  %v767_v5 = vsel %vm253_vm5, %v766_v34, 0.0  ;;  %v755_v51 = vmul.f32 %v753_v11, %v751_v16  ;;  %v768_v6 = vsel %vm2731_vm15, %v765_v59, 0.0  ;;  %vm4793_vm8 = vcmp.ge.s32.totalorder %v2664_v8, 0 }
 0x181   : > { %1301 = vrot.lane.b32.xlu0 %v2815_v21, %s2107_s12  ;;  %1289 = vrot.lane.b32.xlu1 %v2862_v32, %s2106_s11  ;;  %s3328_s11 = sld [smem:[#allocation3 + $0x1f]]  ;;  %v784_v34 = vsel %vm4793_vm8, %v783_v26, 0.0  ;;  %v800_v19 = vsel %vm4625_vm12, %v2888_v29, %v2886_v17  ;;  %v739_v36 = vadd.f32 %v737_v55, %v722_v10  ;;  %v771_v58 = vmul.f32 %v770_v18, %v767_v5 }
 0x182   : > { %v799_v11 = vsel %vm4625_vm12, %v2886_v17, %v2930_v37  ;;  %v740_v56 = vadd.f32 %v738_v42, %v723_v41  ;;  %v785_v16 = vsel %vm2707_vm13, %v782_v25, 0.0  ;;  %vm4627_vm8 = vcmp.lt.s32.totalorder %v2612_v15, 112 }
 0x183   : > { %v3330_v38 = vpop.permute.xlu0 %945  ;;  %v3332_v60 = vpop.permute.xlu1 %943  ;;  %v804_v3 = vstv %s3305_s10  ;;  %vm4632_vm11 = vcmp.lt.s32.totalorder %v2612_v15, 111  ;;  %v756_v29 = vadd.f32 %v754_v48, %v739_v36  ;;  %v772_v5 = vmul.f32 %v770_v18, %v768_v6  ;;  %s4816_s10 = smov 126  }
 0x184   : > { %4791 = vst [vmem:[#allocation27_spill] sm:$0xff] %v3330_v38  ;;  %4792 = vst [vmem:[#allocation30_spill] sm:$0xff] %v3332_v60  ;;  %v787_v60 = vstv %s3275_s21  ;;  %vm4794_vm12 = vcmp.ge.s32.totalorder %v2647_v7, 0  ;;  %v757_v59 = vadd.f32 %v755_v51, %v740_v56  ;;  %v802_v26 = vsel %vm2767_vm9, %v799_v11, 0.0  ;;  %s3640_s21 = sld [smem:[#allocation3 + $0x2e]] }
 0x185   : > { %1315 = vrot.lane.b32.xlu0 %v2815_v21, %s2108_s13  ;;  %1303 = vrot.lane.b32.xlu1 %v2862_v32, %s2107_s12  ;;  %s3375_s12 = sld [smem:[#allocation3 + $0x21]]  ;;  %v788_v17 = vmul.f32 %v787_v60, %v784_v34  ;;  %v801_v55 = vsel %vm4794_vm12, %v800_v19, 0.0  ;;  %v773_v48 = vadd.f32 %v771_v58, %v756_v29  ;;  %v789_v25 = vmul.f32 %v787_v60, %v785_v16 }
 0x186   : > { %v817_v19 = vsel %vm4627_vm8, %v2928_v24, %v2958_v49  ;;  %v832_v18 = vsel %vm4632_vm11, %v2984_v57, %v2982_v12  ;;  %v805_v51 = vmul.f32 %v804_v3, %v801_v55  ;;  %v836_v6 = vstv %s3348_s1  ;;  %s3673_s1 = sld [smem:[#allocation3 + $0x30]] }
 0x187   : > { %v3366_v2 = vpop.permute.xlu0 %960  ;;  %v3368_v53 = vpop.permute.xlu1 %958  ;;  %v819_v42 = vstv %s3328_s11  ;;  %v831_v34 = vsel %vm4632_vm11, %v2982_v12, %v3014_v28  ;;  %v774_v24 = vadd.f32 %v772_v5, %v757_v59  ;;  %v790_v60 = vadd.f32 %v788_v17, %v773_v48  ;;  %s3663_s11 = sld [smem:[#allocation3 + $0x2f]] }
 0x188   : > { %v806_v36 = vmul.f32 %v804_v3, %v802_v26  ;;  %vm4629_vm12 = vcmp.lt.s32.totalorder %v2612_v15, 109  ;;  %v816_v57 = vsel %vm4627_vm8, %v2958_v49, %v2956_v46  ;;  %v820_v12 = vmul.f32 %v819_v42, %v817_v19 }
 0x189   : > { %1329 = vrot.lane.b32.xlu0 %v2815_v21, %s2109_s16  ;;  %1317 = vrot.lane.b32.xlu1 %v2862_v32, %s2108_s13  ;;  %s3410_s13 = sld [smem:[#allocation3 + $0x23]]  ;;  %v833_v58 = vsel %vm279_vm14, %v832_v18, 0.0  ;;  %v849_v11 = vsel %vm4628_vm4, %v3012_v31, %v3053_v43  ;;  %v791_v3 = vadd.f32 %v789_v25, %v774_v24  ;;  %v834_v29 = vsel %vm2824_vm3, %v831_v34, 0.0  ;;  %v4798_v34 = vld [vmem:[#allocation20_spill] sm:$0xff] }
 0x18a   : > { %v807_v49 = vadd.f32 %v805_v51, %v790_v60  ;;  %v848_v17 = vsel %vm4628_vm4, %v3053_v43, %v3051_v39  ;;  %v866_v31 = vsel %vm4629_vm12, %v3090_v50, %v3088_v63  ;;  %vm4630_vm8 = vcmp.lt.s32.totalorder %v2612_v15, 99 }
 0x18b   : > { %v3393_v10 = vpop.permute.xlu0 %975  ;;  %v3395_v41 = vpop.permute.xlu1 %962  ;;  %v853_v5 = vstv %s3375_s12  ;;  %v808_v55 = vadd.f32 %v806_v36, %v791_v3  ;;  %v821_v59 = vmul.f32 %v819_v42, %v816_v57  ;;  %v837_v26 = vmul.f32 %v836_v6, %v833_v58  ;;  %v4799_v57 = vld [vmem:[#allocation19_spill] sm:$0xff]  ;;  %s4819_s12 = smov 125  }
 0x18c   : > { %4795 = vst [vmem:[#allocation32_spill] sm:$0xff] %v3395_v41  ;;  %v850_v43 = vsel %vm287_vm0, %v849_v11, 0.0  ;;  %v822_v48 = vadd.f32 %v820_v12, %v807_v49  ;;  %v838_v25 = vmul.f32 %v836_v6, %v834_v29  ;;  %v870_v19 = vstv %s3391_s22  ;;  %v4801_v11 = vld [vmem:[#allocation21_spill] sm:$0xff]  ;;  %s3694_s22 = sld [smem:[#allocation3 + $0x31]] }
 0x18d   : > { %1343 = vrot.lane.b32.xlu0 %v2815_v21, %s2110_s17  ;;  %1331 = vrot.lane.b32.xlu1 %v2862_v32, %s2109_s16  ;;  %s3434_s16 = sld [smem:[#allocation3 + $0x24]]  ;;  %vm4631_vm4 = vcmp.lt.s32.totalorder %v2612_v15, 98  ;;  %v851_v51 = vsel %vm2842_vm7, %v848_v17, 0.0  ;;  %v867_v42 = vsel %vm295_vm10, %v866_v31, 0.0  ;;  %v865_v6 = vsel %vm4629_vm12, %v3088_v63, %v3117_v47 }
 0x18e   : > { %v883_v24 = vsel %vm4630_vm8, %v4798_v34, %v3151_v40  ;;  %v854_v60 = vmul.f32 %v853_v5, %v850_v43  ;;  %v882_v12 = vsel %vm4630_vm8, %v3151_v40, %v4799_v57  ;;  %v823_v63 = vadd.f32 %v821_v59, %v808_v55 }
 0x18f   : > { %v3427_v56 = vpop.permute.xlu0 %979  ;;  %v3429_v16 = vpop.permute.xlu1 %977  ;;  %v887_v36 = vstv %s3410_s13  ;;  %v839_v58 = vadd.f32 %v837_v26, %v822_v48  ;;  %v900_v3 = vsel %vm4631_vm4, %v3185_v52, %v4801_v11  ;;  %vm4634_vm12 = vcmp.lt.s32.totalorder %v2612_v15, 97  ;;  %s4821_s13 = smov 115  }
 0x190   : > { %4796 = vst [vmem:[#allocation31_spill] sm:$0xff] %v3427_v56  ;;  %v855_v29 = vmul.f32 %v853_v5, %v851_v51  ;;  %v871_v49 = vmul.f32 %v870_v19, %v867_v42  ;;  %v868_v40 = vsel %vm2868_vm2, %v865_v6, 0.0  ;;  %v884_v17 = vsel %vm253_vm5, %v883_v24, 0.0 }
 0x191   : > { %1355 = vrot.lane.b32.xlu0 %v2815_v21, %s4797_s19  ;;  %1345 = vrot.lane.b32.xlu1 %v2862_v32, %s2110_s17  ;;  %s4800_s17 = smov 14   ;;  %v840_v59 = vadd.f32 %v838_v25, %v823_v63  ;;  %v885_v52 = vsel %vm2731_vm15, %v882_v12, 0.0  ;;  %v856_v5 = vadd.f32 %v854_v60, %v839_v58  ;;  %vm4803_vm8 = vcmp.ge.s32.totalorder %v2664_v8, 0 }
 0x192   : > { %v901_v43 = vsel %vm4803_vm8, %v900_v3, 0.0  ;;  %v899_v48 = vsel %vm4631_vm4, %v4801_v11, %v3221_v35  ;;  %v917_v51 = vsel %vm4634_vm12, %v3219_v9, %v3243_v22  ;;  %v872_v25 = vmul.f32 %v870_v19, %v868_v40 }
 0x193   : > { %v3455_v50 = vpop.permute.xlu0 %994  ;;  %v3457_v18 = vpop.permute.xlu1 %992  ;;  %v904_v26 = vstv %s3434_s16  ;;  %v888_v42 = vmul.f32 %v887_v36, %v884_v17  ;;  %v857_v6 = vadd.f32 %v855_v29, %v840_v59  ;;  %v873_v34 = vadd.f32 %v871_v49, %v856_v5  ;;  %s3719_s16 = sld [smem:[#allocation3 + $0x32]] }
 0x194   : > { %v889_v24 = vmul.f32 %v887_v36, %v885_v52  ;;  %v921_v60 = vstv %s3453_s23  ;;  %v905_v9 = vmul.f32 %v904_v26, %v901_v43  ;;  %v902_v58 = vsel %vm2707_vm13, %v899_v48, 0.0  ;;  %v4808_v48 = vld [vmem:[#allocation30_spill] sm:$0xff]  ;;  %s3734_s23 = sld [smem:[#allocation3 + $0x33]] }
 0x195   : > { %1369 = vrot.lane.b32.xlu0 %v2815_v21, %s4800_s17  ;;  %1357 = vrot.lane.b32.xlu1 %v2862_v32, %s4797_s19  ;;  %v916_v19 = vsel %vm4634_vm12, %v3243_v22, %v3241_v44  ;;  %vm4806_vm8 = vcmp.ge.s32.totalorder %v2647_v7, 0  ;;  %vm4633_vm4 = vcmp.lt.s32.totalorder %v2612_v15, 96  ;;  %v874_v36 = vadd.f32 %v872_v25, %v857_v6  ;;  %v4809_v25 = vld [vmem:[#allocation26_spill] sm:$0xff]  ;;  %s4822_s19 = smov 114  }
 0x196   : > { %v918_v11 = vsel %vm4806_vm8, %v917_v51, 0.0  ;;  %v890_v3 = vadd.f32 %v888_v42, %v873_v34  ;;  %vm4640_vm11 = vcmp.lt.s32.totalorder %v2612_v15, 95  ;;  %v906_v22 = vmul.f32 %v904_v26, %v902_v58 }
 0x197   : > { %v3491_v31 = vpop.permute.xlu0 %1009  ;;  %v3493_v55 = vpop.permute.xlu1 %996  ;;  %v919_v29 = vsel %vm2767_vm9, %v916_v19, 0.0  ;;  %v922_v49 = vmul.f32 %v921_v60, %v918_v11  ;;  %v936_v40 = vstv %s3489_s20  ;;  %v891_v52 = vadd.f32 %v889_v24, %v874_v36  ;;  %s3750_s20 = sld [smem:[#allocation3 + $0x34]] }
 0x198   : > { %4802 = vst [vmem:[#allocation36_spill] sm:$0xff] %v3493_v55  ;;  %v907_v5 = vadd.f32 %v905_v9, %v890_v3  ;;  %v934_v43 = vsel %vm4633_vm4, %v3261_v45, %v3259_v23  ;;  %vm4635_vm8 = vcmp.lt.s32.totalorder %v2612_v15, 94  ;;  %v933_v26 = vsel %vm4633_vm4, %v3259_v23, %v3298_v61 }
 0x199   : > { %1383 = vrot.lane.b32.xlu0 %v2815_v21, %s4804_s24  ;;  %1371 = vrot.lane.b32.xlu1 %v2862_v32, %s4800_s17  ;;  %v948_v51 = vsel %vm4640_vm11, %v4808_v48, %v3330_v38  ;;  %v949_v42 = vsel %vm4640_vm11, %v4809_v25, %v4808_v48  ;;  %v923_v45 = vmul.f32 %v921_v60, %v919_v29  ;;  %v953_v6 = vstv %s3512_s29  ;;  %s4826_s17 = smov 113   ;;  %s3767_s29 = sld [smem:[#allocation3 + $0x35]]  ;;  %v4896_v38 = vld [vmem:[#allocation35_spill] sm:$0xff] }
 0x19a   : > { %vm4636_vm4 = vcmp.lt.s32.totalorder %v2612_v15, 93  ;;  %vm4637_vm12 = vcmp.lt.s32.totalorder %v2612_v15, 83  ;;  %v908_v23 = vadd.f32 %v906_v22, %v891_v52  ;;  %v924_v34 = vadd.f32 %v922_v49, %v907_v5 }
 0x19b   : > { %v3515_v12 = vpop.permute.xlu0 %1013  ;;  %v3517_v63 = vpop.permute.xlu1 %1011  ;;  %v937_v24 = vmul.f32 %v936_v40, %v934_v43  ;;  %v966_v9 = vsel %vm4635_vm8, %v3368_v53, %v3366_v2  ;;  %v938_v19 = vmul.f32 %v936_v40, %v933_v26  ;;  %v950_v11 = vsel %vm279_vm14, %v949_v42, 0.0 }
 0x19c   : > { %4805 = vst [vmem:[#allocation33_spill] sm:$0xff] %v3515_v12  ;;  %v951_v36 = vsel %vm2824_vm3, %v948_v51, 0.0  ;;  %v965_v3 = vsel %vm4635_vm8, %v3366_v2, %v3395_v41  ;;  %v970_v22 = vstv %s3528_s26  ;;  %v987_v29 = vstv %s3530_s27  ;;  %s4836_s26 = smov 111   ;;  %s3783_s27 = sld [smem:[#allocation3 + $0x36]] }
 0x19d   : > { %1397 = vrot.lane.b32.xlu0 %v2815_v21, %s4807_s30  ;;  %1385 = vrot.lane.b32.xlu1 %v2862_v32, %s4804_s24  ;;  %v983_v53 = vsel %vm4636_vm4, %v3393_v10, %v3429_v16  ;;  %v925_v49 = vadd.f32 %v923_v45, %v908_v23  ;;  %v967_v40 = vsel %vm287_vm0, %v966_v9, 0.0  ;;  %v982_v2 = vsel %vm4636_vm4, %v3429_v16, %v3427_v56  ;;  %s4831_s24 = smov 112  }
 0x19e   : > { %vm4638_vm8 = vcmp.lt.s32.totalorder %v2612_v15, 82  ;;  %v954_v10 = vmul.f32 %v953_v6, %v950_v11  ;;  %v955_v52 = vmul.f32 %v953_v6, %v951_v36  ;;  %v968_v5 = vsel %vm2842_vm7, %v965_v3, 0.0 }
 0x19f   : > { %v3540_v17 = vpop.permute.xlu0 %1028  ;;  %v3542_v59 = vpop.permute.xlu1 %1026  ;;  %v1000_v43 = vsel %vm4637_vm12, %v3457_v18, %v3455_v50  ;;  %v939_v16 = vadd.f32 %v937_v24, %v924_v34  ;;  %v940_v51 = vadd.f32 %v938_v19, %v925_v49  ;;  %v984_v25 = vsel %vm295_vm10, %v983_v53, 0.0 }
 0x1a0   : > { %vm4639_vm4 = vcmp.lt.s32.totalorder %v2612_v15, 81  ;;  %v971_v42 = vmul.f32 %v970_v22, %v967_v40  ;;  %v985_v45 = vsel %vm2868_vm2, %v982_v2, 0.0  ;;  %v999_v18 = vsel %vm4637_vm12, %v3455_v50, %v3493_v55 }
 0x1a1   : > { %1411 = vrot.lane.b32.xlu0 %v2815_v21, %s4810_s4  ;;  %1399 = vrot.lane.b32.xlu1 %v2862_v32, %s4807_s30  ;;  %v1017_v6 = vsel %vm4638_vm8, %v3491_v31, %v3517_v63  ;;  %v972_v23 = vmul.f32 %v970_v22, %v968_v5  ;;  %v1004_v34 = vstv %s3568_s5  ;;  %v1001_v24 = vsel %vm253_vm5, %v1000_v43, 0.0  ;;  %s4840_s30 = smov 110   ;;  %s4843_s5 = smov 109  }
 0x1a2   : > { %v1021_v9 = vstv %s3570_s6  ;;  %v956_v50 = vadd.f32 %v954_v10, %v939_v16  ;;  %v957_v19 = vadd.f32 %v955_v52, %v940_v51  ;;  %v988_v11 = vmul.f32 %v987_v29, %v984_v25  ;;  %s3811_s6 = sld [smem:[#allocation3 + $0x38]] }
 0x1a3   : > { %v3576_v60 = vpop.permute.xlu0 %1043  ;;  %v3578_v58 = vpop.permute.xlu1 %1030  ;;  %v1016_v31 = vsel %vm4638_vm8, %v3517_v63, %v3515_v12  ;;  %v989_v53 = vmul.f32 %v987_v29, %v985_v45  ;;  %v1002_v22 = vsel %vm2731_vm15, %v999_v18, 0.0  ;;  %vm4815_vm12 = vcmp.ge.s32.totalorder %v2664_v8, 0 }
 0x1a4   : > { %4811 = vst [vmem:[#allocation37_spill] sm:$0xff] %v3578_v58  ;;  %v1018_v49 = vsel %vm4815_vm12, %v1017_v6, 0.0  ;;  %v1034_v40 = vsel %vm4639_vm4, %v3542_v59, %v3540_v17  ;;  %v973_v2 = vadd.f32 %v971_v42, %v956_v50  ;;  %v1005_v10 = vmul.f32 %v1004_v34, %v1001_v24 }
 0x1a5   : > { %1425 = vrot.lane.b32.xlu0 %v2815_v21, %s4812_s7  ;;  %1413 = vrot.lane.b32.xlu1 %v2862_v32, %s4810_s4  ;;  %v1033_v63 = vsel %vm4639_vm4, %v3540_v17, %v3578_v58  ;;  %vm4643_vm8 = vcmp.lt.s32.totalorder %v2612_v15, 79  ;;  %v974_v29 = vadd.f32 %v972_v23, %v957_v19  ;;  %v1019_v59 = vsel %vm2707_vm13, %v1016_v31, 0.0  ;;  %s3797_s4 = sld [smem:[#allocation3 + $0x37]] }
 0x1a6   : > { %v1038_v52 = vstv %s3605_s8  ;;  %vm1049_vm12 = vcmp.lt.s32.totalorder %v2612_v15, 80  ;;  %v990_v5 = vadd.f32 %v988_v11, %v973_v2  ;;  %v1006_v17 = vmul.f32 %v1004_v34, %v1002_v22  ;;  %s3827_s8 = sld [smem:[#allocation3 + $0x39]] }
 0x1a7   : > { %v3613_v26 = vpop.permute.xlu0 %1047  ;;  %v3615_v48 = vpop.permute.xlu1 %1045  ;;  %v1022_v43 = vmul.f32 %v1021_v9, %v1018_v49  ;;  %vm4817_vm4 = vcmp.ge.s32.totalorder %v2647_v7, 0  ;;  %v991_v42 = vadd.f32 %v989_v53, %v974_v29  ;;  %v1036_v45 = vsel %vm2767_vm9, %v1033_v63, 0.0 }
 0x1a8   : > { %4813 = vst [vmem:[#allocation38_spill] sm:$0xff] %v3613_v26  ;;  %v1035_v16 = vsel %vm4817_vm4, %v1034_v40, 0.0  ;;  %v1053_v18 = vstv %s3620_s18  ;;  %v1007_v23 = vadd.f32 %v1005_v10, %v990_v5  ;;  %v1023_v34 = vmul.f32 %v1021_v9, %v1019_v59  ;;  %s4849_s18 = smov 98  }
 0x1a9   : > { %1427 = vrot.lane.b32.xlu1 %v2862_v32, %s4812_s7  ;;  %1445 = vrot.lane.b32.xlu0 %v2815_v21, %s4814_s9  ;;  %v1051_v24 = vsel %vm1049_vm12, %v3576_v60, %v3615_v48  ;;  %vm4641_vm4 = vcmp.lt.s32.totalorder %v2612_v15, 78  ;;  %v1039_v50 = vmul.f32 %v1038_v52, %v1035_v16  ;;  %v1070_v19 = vstv %s3640_s21  ;;  %s4846_s7 = smov 99   ;;  %s4853_s21 = smov 97  }
 0x1aa   : > { %v1008_v11 = vadd.f32 %v1006_v17, %v991_v42  ;;  %v1024_v31 = vadd.f32 %v1022_v43, %v1007_v23  ;;  %v1050_v22 = vsel %vm1049_vm12, %v3615_v48, %v3613_v26  ;;  %v1054_v49 = vmul.f32 %v1053_v18, %v1051_v24 }
 0x1ab   : > { %v1061_v36 = vpop.permute.xlu0 %1060  ;;  %v1059_v3 = vpop.permute.xlu1 %1058  ;;  %v1087_v63 = vstv %s3663_s11  ;;  %vm4642_vm11 = vcmp.lt.s32.totalorder %v2612_v15, 77  ;;  %v1055_v5 = vmul.f32 %v1053_v18, %v1050_v22  ;;  %v1104_v16 = vstv %s3673_s1  ;;  %s4858_s11 = smov 96   ;;  %s3875_s1 = sld [smem:[#allocation3 + $0x3c]] }
 0x1ac   : > { %v1066_v6 = vsel %vm4643_vm8, %v1059_v3, %v1061_v36  ;;  %v1040_v3 = vmul.f32 %v1038_v52, %v1036_v45  ;;  %v1025_v10 = vadd.f32 %v1023_v34, %v1008_v11  ;;  %v1041_v48 = vadd.f32 %v1039_v50, %v1024_v31 }
 0x1ad   : > { %1447 = vrot.lane.b32.xlu1 %v2862_v32, %s4814_s9  ;;  %1459 = vrot.lane.b32.xlu0 %v2815_v21, %s4816_s10  ;;  %v1067_v9 = vsel %vm279_vm14, %v1066_v6, 0.0  ;;  %v1118_v31 = vstv %s3694_s22  ;;  %s3843_s9 = sld [smem:[#allocation3 + $0x3a]]  ;;  %s3891_s22 = sld [smem:[#allocation3 + $0x3d]] }
 0x1ae   : > { %v1071_v59 = vmul.f32 %v1070_v19, %v1067_v9  ;;  %v1042_v52 = vadd.f32 %v1040_v3, %v1025_v10  ;;  %v1056_v42 = vadd.f32 %v1054_v49, %v1041_v48  ;;  %v4824_v49 = vld [vmem:[#allocation6_spill] sm:$0xff] }
 0x1af   : > { %v1076_v51 = vpop.permute.xlu0 %1075  ;;  %v3671_v25 = vpop.permute.xlu1 %1062 }
 0x1b0   : > { %4818 = vst [vmem:[#allocation42_spill] sm:$0xff] %v3671_v25  ;;  %v1065_v40 = vsel %vm4643_vm8, %v1061_v36, %v3671_v25  ;;  %v1073_v34 = vadd.f32 %v1071_v59, %v1056_v42  ;;  %v1057_v11 = vadd.f32 %v1055_v5, %v1042_v52  ;;  %vm4830_vm8 = vcmp.ge.s32.totalorder %v2664_v8, 0 }
 0x1b1   : > { %1461 = vrot.lane.b32.xlu1 %v2862_v32, %s4816_s10  ;;  %1473 = vrot.lane.b32.xlu0 %v2815_v21, %s4819_s12  ;;  %v1068_v17 = vsel %vm2824_vm3, %v1065_v40, 0.0  ;;  %s3858_s10 = sld [smem:[#allocation3 + $0x3b]] }
 0x1b2   : > { %v1072_v24 = vmul.f32 %v1070_v19, %v1068_v17 }
 0x1b3   : > { %v3692_v53 = vpop.permute.xlu0 %1079  ;;  %v1078_v60 = vpop.permute.xlu1 %1077 }
 0x1b4   : > { %4820 = vst [vmem:[#allocation39_spill] sm:$0xff] %v3692_v53  ;;  %v1083_v2 = vsel %vm4641_vm4, %v1076_v51, %v1078_v60  ;;  %v1082_v36 = vsel %vm4641_vm4, %v1078_v60, %v3692_v53  ;;  %vm4825_vm4 = vcmp.lt.s32.totalorder %v2612_v15, 51 }
 0x1b5   : > { %v1084_v29 = vsel %vm287_vm0, %v1083_v2, 0.0  ;;  %1475 = vrot.lane.b32.xlu1 %v2862_v32, %s4819_s12  ;;  %1487 = vrot.lane.b32.xlu0 %v2815_v21, %s4821_s13  ;;  %v1085_v23 = vsel %vm2842_vm7, %v1082_v36, 0.0  ;;  %v1132_v36 = vstv %s3719_s16  ;;  %s4862_s12 = smov 95   ;;  %s3905_s16 = sld [smem:[#allocation3 + $0x3e]] }
 0x1b6   : > { %v1088_v45 = vmul.f32 %v1087_v63, %v1084_v29  ;;  %v1089_v60 = vmul.f32 %v1087_v63, %v1085_v23  ;;  %v1074_v63 = vadd.f32 %v1072_v24, %v1057_v11  ;;  %v1146_v24 = vstv %s3734_s23  ;;  %s3919_s23 = sld [smem:[#allocation3 + $0x3f]] }
 0x1b7   : > { %v1095_v43 = vpop.permute.xlu0 %1094  ;;  %v1093_v51 = vpop.permute.xlu1 %1092 }
 0x1b8   : > { %v1100_v6 = vsel %vm4642_vm11, %v1093_v51, %v1095_v43  ;;  %v1090_v22 = vadd.f32 %v1088_v45, %v1073_v34  ;;  %v1091_v17 = vadd.f32 %v1089_v60, %v1074_v63  ;;  %v4827_v51 = vld [vmem:[#allocation7_spill] sm:$0xff]  ;;  %v1158_v63 = vstv %s3750_s20  ;;  %s4877_s20 = smov 82  }
 0x1b9   : > { %v1101_v18 = vsel %vm295_vm10, %v1100_v6, 0.0  ;;  %1489 = vrot.lane.b32.xlu1 %v2862_v32, %s4821_s13  ;;  %1501 = vrot.lane.b32.xlu0 %v2815_v21, %s4822_s19  ;;  %s4865_s13 = smov 94  }
 0x1ba   : > { %v1105_v50 = vmul.f32 %v1104_v16, %v1101_v18 }
 0x1bb   : > { %v1110_v3 = vpop.permute.xlu0 %1109  ;;  %v3732_v9 = vpop.permute.xlu1 %1096 }
 0x1bc   : > { %4823 = vst [vmem:[#allocation43_spill] sm:$0xff] %v3732_v9  ;;  %v1114_v40 = vsel %vm4825_vm4, %v4824_v49, %v1110_v3  ;;  %v1099_v2 = vsel %vm4642_vm11, %v1095_v43, %v3732_v9  ;;  %v1107_v29 = vadd.f32 %v1105_v50, %v1090_v22  ;;  %vm4828_vm4 = vcmp.lt.s32.totalorder %v2612_v15, 50  ;;  %v4832_v22 = vld [vmem:[#allocation8_spill] sm:$0xff] }
 0x1bd   : > { %v1115_v19 = vsel %vm253_vm5, %v1114_v40, 0.0  ;;  %v1102_v10 = vsel %vm2868_vm2, %v1099_v2, 0.0  ;;  %1503 = vrot.lane.b32.xlu1 %v2862_v32, %s4822_s19  ;;  %1515 = vrot.lane.b32.xlu0 %v2815_v21, %s4826_s17  ;;  %vm4829_vm11 = vcmp.lt.s32.totalorder %v2612_v15, 51  ;;  %s4869_s19 = smov 93  }
 0x1be   : > { %v1119_v48 = vmul.f32 %v1118_v31, %v1115_v19  ;;  %v1106_v59 = vmul.f32 %v1104_v16, %v1102_v10 }
 0x1bf   : > { %v1124_v52 = vpop.permute.xlu0 %1123  ;;  %v1112_v5 = vpop.permute.xlu1 %1111 }
 0x1c0   : > { %v1121_v43 = vadd.f32 %v1119_v48, %v1107_v29  ;;  %v1128_v42 = vsel %vm4828_vm4, %v4827_v51, %v1124_v52  ;;  %v1113_v45 = vsel %vm4829_vm11, %v1110_v3, %v1112_v5  ;;  %v1108_v23 = vadd.f32 %v1106_v59, %v1091_v17  ;;  %v4837_v5 = vld [vmem:[#allocation9_spill] sm:$0xff] }
 0x1c1   : > { %v1129_v6 = vsel %vm4830_vm8, %v1128_v42, 0.0  ;;  %v1116_v16 = vsel %vm2731_vm15, %v1113_v45, 0.0  ;;  %1517 = vrot.lane.b32.xlu1 %v2862_v32, %s4826_s17  ;;  %1529 = vrot.lane.b32.xlu0 %v2815_v21, %s4831_s24  ;;  %vm4833_vm11 = vcmp.lt.s32.totalorder %v2612_v15, 49  ;;  %vm4834_vm8 = vmmov %vm4828_vm4  ;;  %vm4835_vm4 = vcmp.ge.s32.totalorder %v2647_v7, 0  ;;  %s4873_s17 = smov 83  }
 0x1c2   : > { %v1133_v18 = vmul.f32 %v1132_v36, %v1129_v6  ;;  %v1120_v34 = vmul.f32 %v1118_v31, %v1116_v16  ;;  %v1172_v6 = vstv %s3767_s29  ;;  %s4883_s29 = smov 80  }
 0x1c3   : > { %v1138_v50 = vpop.permute.xlu0 %1137  ;;  %v1126_v11 = vpop.permute.xlu1 %1125 }
 0x1c4   : > { %v1135_v3 = vadd.f32 %v1133_v18, %v1121_v43  ;;  %v1122_v60 = vadd.f32 %v1120_v34, %v1108_v23  ;;  %v1142_v49 = vsel %vm4833_vm11, %v4832_v22, %v1138_v50  ;;  %v1127_v40 = vsel %vm4834_vm8, %v1124_v52, %v1126_v11  ;;  %v4841_v34 = vld [vmem:[#allocation10_spill] sm:$0xff] }
 0x1c5   : > { %v1143_v2 = vsel %vm4835_vm4, %v1142_v49, 0.0  ;;  %v1130_v31 = vsel %vm2707_vm13, %v1127_v40, 0.0  ;;  %1531 = vrot.lane.b32.xlu1 %v2862_v32, %s4831_s24  ;;  %1541 = vrot.lane.b32.xlu0 %v2815_v21, %s4836_s26  ;;  %vm4838_vm11 = vcmp.lt.s32.totalorder %v2612_v15, 48  ;;  %vm4839_vm8 = vcmp.lt.s32.totalorder %v2612_v15, 49  ;;  %s4881_s24 = smov 81  }
 0x1c6   : > { %v1147_v19 = vmul.f32 %v1146_v24, %v1143_v2  ;;  %v1134_v10 = vmul.f32 %v1132_v36, %v1130_v31  ;;  %vm4842_vm4 = vcmp.lt.s32.totalorder %v2612_v15, 47  ;;  %v1186_v49 = vstv %s3783_s27  ;;  %s4885_s27 = smov 77  }
 0x1c7   : > { %v1152_v29 = vpop.permute.xlu0 %1151  ;;  %v1140_v48 = vpop.permute.xlu1 %1139 }
 0x1c8   : > { %v1149_v59 = vadd.f32 %v1147_v19, %v1135_v3  ;;  %v1136_v52 = vadd.f32 %v1134_v10, %v1122_v60  ;;  %v1156_v17 = vsel %vm4838_vm11, %v4837_v5, %v1152_v29  ;;  %v1141_v43 = vsel %vm4839_vm8, %v1138_v50, %v1140_v48  ;;  %v4844_v19 = vld [vmem:[#allocation11_spill] sm:$0xff]  ;;  %vm4845_vm8 = vmmov %vm4842_vm4 }
 0x1c9   : > { %v1159_v51 = vmul.f32 %v1158_v63, %v1156_v17  ;;  %v1144_v42 = vsel %vm2767_vm9, %v1141_v43, 0.0  ;;  %1543 = vrot.lane.b32.xlu1 %v2862_v32, %s4836_s26  ;;  %1555 = vrot.lane.b32.xlu0 %v2815_v21, %s4840_s30  ;;  %v1200_v5 = vstv %s3797_s4  ;;  %s4884_s26 = smov 78   ;;  %s4010_s4 = sld [smem:[#allocation3 + $0x42]] }
 0x1ca   : > { %v1148_v36 = vmul.f32 %v1146_v24, %v1144_v42 }
 0x1cb   : > { %v1161_v45 = vadd.f32 %v1159_v51, %v1149_v59  ;;  %v1164_v16 = vpop.permute.xlu0 %1163  ;;  %v1154_v23 = vpop.permute.xlu1 %1153 }
 0x1cc   : > { %v1150_v18 = vadd.f32 %v1148_v36, %v1136_v52  ;;  %v1168_v50 = vsel %vm4842_vm4, %v4841_v34, %v1164_v16  ;;  %v1155_v11 = vsel %vm4838_vm11, %v1152_v29, %v1154_v23  ;;  %v4847_v36 = vld [vmem:[#allocation12_spill] sm:$0xff]  ;;  %vm4848_vm4 = vcmp.lt.s32.totalorder %v2612_v15, 45 }
 0x1cd   : > { %v1169_v3 = vsel %vm279_vm14, %v1168_v50, 0.0  ;;  %v1160_v60 = vmul.f32 %v1158_v63, %v1155_v11  ;;  %1557 = vrot.lane.b32.xlu1 %v2862_v32, %s4840_s30  ;;  %1569 = vrot.lane.b32.xlu0 %v2815_v21, %s4843_s5  ;;  %v1214_v50 = vstv %s3811_s6  ;;  %vm4852_vm11 = vmmov %vm4848_vm4  ;;  %s1947_s30 = sld [smem:[#allocation3 + $0x41]]  ;;  %s4026_s6 = sld [smem:[#allocation3 + $0x44]] }
 0x1ce   : > { %v1173_v24 = vmul.f32 %v1172_v6, %v1169_v3 }
 0x1cf   : > { %v1162_v22 = vadd.f32 %v1160_v60, %v1150_v18  ;;  %v1178_v40 = vpop.permute.xlu0 %1177  ;;  %v1166_v2 = vpop.permute.xlu1 %1165  ;;  %v1350_v41 = vstv %s4010_s4  ;;  %s4357_s4 = sld [smem:[#allocation3 + $0x5b]] }
 0x1d0   : > { %v1175_v31 = vadd.f32 %v1173_v24, %v1161_v45  ;;  %v1182_v10 = vsel %vm388_vm1, %v4844_v19, %v1178_v40  ;;  %v1167_v63 = vsel %vm4845_vm8, %v1164_v16, %v1166_v2  ;;  %vm4855_vm8 = vcmp.lt.s32.totalorder %v2612_v15, 34 }
 0x1d1   : > { %v1183_v29 = vsel %vm287_vm0, %v1182_v10, 0.0  ;;  %v1170_v48 = vsel %vm2824_vm3, %v1167_v63, 0.0  ;;  %1571 = vrot.lane.b32.xlu1 %v2862_v32, %s4843_s5  ;;  %1583 = vrot.lane.b32.xlu0 %v2815_v21, %s4846_s7  ;;  %v1228_v63 = vstv %s3827_s8  ;;  %s4019_s5 = sld [smem:[#allocation3 + $0x43]]  ;;  %s4042_s8 = sld [smem:[#allocation3 + $0x46]] }
 0x1d2   : > { %v1187_v59 = vmul.f32 %v1186_v49, %v1183_v29  ;;  %v1174_v52 = vmul.f32 %v1172_v6, %v1170_v48 }
 0x1d3   : > { %v1192_v17 = vpop.permute.xlu0 %1191  ;;  %v1180_v43 = vpop.permute.xlu1 %1179 }
 0x1d4   : > { %v1189_v51 = vadd.f32 %v1187_v59, %v1175_v31  ;;  %v1176_v42 = vadd.f32 %v1174_v52, %v1162_v22  ;;  %v1196_v45 = vsel %vm4848_vm4, %v4847_v36, %v1192_v17  ;;  %v1181_v16 = vsel %vm388_vm1, %v1178_v40, %v1180_v43  ;;  %v4850_v22 = vld [vmem:[#allocation13_spill] sm:$0xff] }
 0x1d5   : > { %v1197_v23 = vsel %vm295_vm10, %v1196_v45, 0.0  ;;  %v1184_v6 = vsel %vm2842_vm7, %v1181_v16, 0.0  ;;  %1585 = vrot.lane.b32.xlu1 %v2862_v32, %s4846_s7  ;;  %1597 = vrot.lane.b32.xlu0 %v2815_v21, %s4849_s18  ;;  %vm4851_vm1 = vcmp.lt.s32.totalorder %v2612_v15, 35  ;;  %v1242_v16 = vstv %s3843_s9  ;;  %s4034_s7 = sld [smem:[#allocation3 + $0x45]]  ;;  %s4088_s9 = sld [smem:[#allocation3 + $0x48]] }
 0x1d6   : > { %v1201_v18 = vmul.f32 %v1200_v5, %v1197_v23  ;;  %v1188_v34 = vmul.f32 %v1186_v49, %v1184_v6  ;;  %vm4856_vm4 = vmmov %vm4851_vm1 }
 0x1d7   : > { %v1206_v11 = vpop.permute.xlu0 %1205  ;;  %v1194_v3 = vpop.permute.xlu1 %1193  ;;  %v1364_v61 = vstv %s4019_s5  ;;  %s4381_s5 = sld [smem:[#allocation3 + $0x5c]] }
 0x1d8   : > { %v1203_v60 = vadd.f32 %v1201_v18, %v1189_v51  ;;  %v1190_v24 = vadd.f32 %v1188_v34, %v1176_v42  ;;  %v1210_v40 = vsel %vm4851_vm1, %v4850_v22, %v1206_v11  ;;  %v1195_v2 = vsel %vm4852_vm11, %v1192_v17, %v1194_v3  ;;  %v4854_v17 = vld [vmem:[#allocation14_spill] sm:$0xff] }
 0x1d9   : > { %v1211_v31 = vsel %vm253_vm5, %v1210_v40, 0.0  ;;  %v1198_v49 = vsel %vm2868_vm2, %v1195_v2, 0.0  ;;  %1599 = vrot.lane.b32.xlu1 %v2862_v32, %s4849_s18  ;;  %1611 = vrot.lane.b32.xlu0 %v2815_v21, %s4853_s21  ;;  %vm4857_vm1 = vcmp.ge.s32.totalorder %v2664_v8, 0  ;;  %vm4860_vm11 = vcmp.lt.s32.totalorder %v2612_v15, 33  ;;  %s4063_s18 = sld [smem:[#allocation3 + $0x47]] }
 0x1da   : > { %v1215_v19 = vmul.f32 %v1214_v50, %v1211_v31  ;;  %v1202_v10 = vmul.f32 %v1200_v5, %v1198_v49  ;;  %v1254_v2 = vstv %s3858_s10  ;;  %s4130_s10 = sld [smem:[#allocation3 + $0x4a]] }
 0x1db   : > { %v1220_v29 = vpop.permute.xlu0 %1219  ;;  %v1208_v48 = vpop.permute.xlu1 %1207 }
 0x1dc   : > { %v1217_v59 = vadd.f32 %v1215_v19, %v1203_v60  ;;  %v1204_v52 = vadd.f32 %v1202_v10, %v1190_v24  ;;  %v1224_v43 = vsel %vm4855_vm8, %v4854_v17, %v1220_v29  ;;  %v1209_v51 = vsel %vm4856_vm4, %v1206_v11, %v1208_v48  ;;  %v4859_v11 = vld [vmem:[#allocation15_spill] sm:$0xff] }
 0x1dd   : > { %v1225_v42 = vsel %vm4857_vm1, %v1224_v43, 0.0  ;;  %v1212_v5 = vsel %vm2731_vm15, %v1209_v51, 0.0  ;;  %1613 = vrot.lane.b32.xlu1 %v2862_v32, %s4853_s21  ;;  %1625 = vrot.lane.b32.xlu0 %v2815_v21, %s4858_s11  ;;  %vm4861_vm4 = vcmp.ge.s32.totalorder %v2647_v7, 0  ;;  %vm4864_vm1 = vcmp.lt.s32.totalorder %v2612_v15, 32  ;;  %s4113_s21 = sld [smem:[#allocation3 + $0x49]] }
 0x1de   : > { %v1229_v36 = vmul.f32 %v1228_v63, %v1225_v42  ;;  %v1216_v45 = vmul.f32 %v1214_v50, %v1212_v5  ;;  %v1268_v51 = vstv %s3875_s1  ;;  %s4148_s1 = sld [smem:[#allocation3 + $0x4c]] }
 0x1df   : > { %v1234_v23 = vpop.permute.xlu0 %1233  ;;  %v1222_v6 = vpop.permute.xlu1 %1221 }
 0x1e0   : > { %v1231_v18 = vadd.f32 %v1229_v36, %v1217_v59  ;;  %v1218_v34 = vadd.f32 %v1216_v45, %v1204_v52  ;;  %v1238_v3 = vsel %vm4860_vm11, %v4859_v11, %v1234_v23  ;;  %v1223_v60 = vsel %vm4855_vm8, %v1220_v29, %v1222_v6  ;;  %v4863_v29 = vld [vmem:[#allocation16_spill] sm:$0xff]  ;;  %v4866_v45 = vld [vmem:[#allocation17_spill] sm:$0xff] }
 0x1e1   : > { %v1239_v24 = vsel %vm4861_vm4, %v1238_v3, 0.0  ;;  %v1226_v50 = vsel %vm2707_vm13, %v1223_v60, 0.0  ;;  %1627 = vrot.lane.b32.xlu1 %v2862_v32, %s4858_s11  ;;  %1637 = vrot.lane.b32.xlu0 %v2815_v21, %s4862_s12  ;;  %vm4867_vm8 = vcmp.lt.s32.totalorder %v2612_v15, 31  ;;  %vm4868_vm4 = vmmov %vm4864_vm1  ;;  %v1282_v3 = vstv %s3891_s22  ;;  %s4141_s11 = sld [smem:[#allocation3 + $0x4b]]  ;;  %s4179_s22 = sld [smem:[#allocation3 + $0x4e]] }
 0x1e2   : > { %v1243_v22 = vmul.f32 %v1242_v16, %v1239_v24  ;;  %v1230_v40 = vmul.f32 %v1228_v63, %v1226_v50 }
 0x1e3   : > { %v1248_v31 = vpop.permute.xlu0 %1247  ;;  %v1236_v49 = vpop.permute.xlu1 %1235 }
 0x1e4   : > { %v1245_v19 = vadd.f32 %v1243_v22, %v1231_v18  ;;  %v1232_v10 = vadd.f32 %v1230_v40, %v1218_v34  ;;  %v1252_v48 = vsel %vm4864_vm1, %v4863_v29, %v1248_v31  ;;  %v1237_v59 = vsel %vm4860_vm11, %v1234_v23, %v1236_v49  ;;  %v4870_v22 = vld [vmem:[#allocation18_spill] sm:$0xff]  ;;  %vm4872_vm11 = vmmov %vm4867_vm8 }
 0x1e5   : > { %v1255_v52 = vmul.f32 %v1254_v2, %v1252_v48  ;;  %v1240_v17 = vsel %vm2767_vm9, %v1237_v59, 0.0  ;;  %1639 = vrot.lane.b32.xlu1 %v2862_v32, %s4862_s12  ;;  %1651 = vrot.lane.b32.xlu0 %v2815_v21, %s4865_s13  ;;  %vm4871_vm1 = vcmp.lt.s32.totalorder %v2612_v15, 30  ;;  %v1296_v29 = vstv %s3905_s16  ;;  %s4158_s12 = sld [smem:[#allocation3 + $0x4d]]  ;;  %s4226_s16 = sld [smem:[#allocation3 + $0x50]] }
 0x1e6   : > { %v1244_v63 = vmul.f32 %v1242_v16, %v1240_v17 }
 0x1e7   : > { %v1257_v43 = vadd.f32 %v1255_v52, %v1245_v19  ;;  %v1260_v42 = vpop.permute.xlu0 %1259  ;;  %v1250_v5 = vpop.permute.xlu1 %1249 }
 0x1e8   : > { %v1246_v36 = vadd.f32 %v1244_v63, %v1232_v10  ;;  %v1264_v23 = vsel %vm4867_vm8, %v4866_v45, %v1260_v42  ;;  %v1251_v6 = vsel %vm4868_vm4, %v1248_v31, %v1250_v5  ;;  %v4874_v63 = vld [vmem:[#allocation22_spill] sm:$0xff]  ;;  %vm4875_vm8 = vcmp.lt.s32.totalorder %v2612_v15, 29  ;;  %vm4876_vm4 = vmmov %vm4871_vm1 }
 0x1e9   : > { %v1265_v18 = vsel %vm279_vm14, %v1264_v23, 0.0  ;;  %v1256_v34 = vmul.f32 %v1254_v2, %v1251_v6  ;;  %1653 = vrot.lane.b32.xlu1 %v2862_v32, %s4865_s13  ;;  %1665 = vrot.lane.b32.xlu0 %v2815_v21, %s4869_s19  ;;  %v1310_v23 = vstv %s3919_s23  ;;  %s4194_s13 = sld [smem:[#allocation3 + $0x4f]]  ;;  %s4252_s23 = sld [smem:[#allocation3 + $0x52]] }
 0x1ea   : > { %v1269_v16 = vmul.f32 %v1268_v51, %v1265_v18 }
 0x1eb   : > { %v1258_v11 = vadd.f32 %v1256_v34, %v1246_v36  ;;  %v1274_v60 = vpop.permute.xlu0 %1273  ;;  %v1262_v24 = vpop.permute.xlu1 %1261 }
 0x1ec   : > { %v1271_v50 = vadd.f32 %v1269_v16, %v1257_v43  ;;  %v1278_v40 = vsel %vm4871_vm1, %v4870_v22, %v1274_v60  ;;  %v1263_v2 = vsel %vm4872_vm11, %v1260_v42, %v1262_v24  ;;  %vm4879_vm1 = vcmp.lt.s32.totalorder %v2612_v15, 19  ;;  %vm4880_vm11 = vmmov %vm4875_vm8 }
 0x1ed   : > { %v1279_v31 = vsel %vm287_vm0, %v1278_v40, 0.0  ;;  %v1266_v49 = vsel %vm2824_vm3, %v1263_v2, 0.0  ;;  %1667 = vrot.lane.b32.xlu1 %v2862_v32, %s4869_s19  ;;  %1679 = vrot.lane.b32.xlu0 %v2815_v21, %s4873_s17  ;;  %s4228_s19 = sld [smem:[#allocation3 + $0x51]] }
 0x1ee   : > { %v1283_v19 = vmul.f32 %v1282_v3, %v1279_v31  ;;  %v1270_v10 = vmul.f32 %v1268_v51, %v1266_v49 }
 0x1ef   : > { %v1288_v48 = vpop.permute.xlu0 %1287  ;;  %v1276_v59 = vpop.permute.xlu1 %1275 }
 0x1f0   : > { %v1285_v52 = vadd.f32 %v1283_v19, %v1271_v50  ;;  %v1272_v17 = vadd.f32 %v1270_v10, %v1258_v11  ;;  %v1292_v43 = vsel %vm4875_vm8, %v4874_v63, %v1288_v48  ;;  %v1277_v42 = vsel %vm4876_vm4, %v1274_v60, %v1276_v59  ;;  %v4878_v11 = vld [vmem:[#allocation23_spill] sm:$0xff]  ;;  %vm4882_vm8 = vmmov %vm4879_vm1 }
 0x1f1   : > { %v1293_v5 = vsel %vm295_vm10, %v1292_v43, 0.0  ;;  %v1280_v36 = vsel %vm2842_vm7, %v1277_v42, 0.0  ;;  %1681 = vrot.lane.b32.xlu1 %v2862_v32, %s4873_s17  ;;  %1693 = vrot.lane.b32.xlu0 %v2815_v21, %s4877_s20  ;;  %vm4886_vm4 = vcmp.lt.s32.totalorder %v2612_v15, 18  ;;  %s4264_s17 = sld [smem:[#allocation3 + $0x53]] }
 0x1f2   : > { %v1297_v51 = vmul.f32 %v1296_v29, %v1293_v5  ;;  %v1284_v45 = vmul.f32 %v1282_v3, %v1280_v36 }
 0x1f3   : > { %v1302_v6 = vpop.permute.xlu0 %1301  ;;  %v1290_v18 = vpop.permute.xlu1 %1289 }
 0x1f4   : > { %v1299_v34 = vadd.f32 %v1297_v51, %v1285_v52  ;;  %v1286_v16 = vadd.f32 %v1284_v45, %v1272_v17  ;;  %v1306_v60 = vsel %vm4879_vm1, %v4878_v11, %v1302_v6  ;;  %v1291_v24 = vsel %vm4880_vm11, %v1288_v48, %v1290_v18  ;;  %vm4889_vm11 = vmmov %vm4886_vm4 }
 0x1f5   : > { %v1307_v50 = vsel %vm253_vm5, %v1306_v60, 0.0  ;;  %v1294_v22 = vsel %vm2868_vm2, %v1291_v24, 0.0  ;;  %1695 = vrot.lane.b32.xlu1 %v2862_v32, %s4877_s20  ;;  %1707 = vrot.lane.b32.xlu0 %v2815_v21, %s4881_s24  ;;  %vm4887_vm1 = vcmp.lt.s32.totalorder %v2612_v15, 17  ;;  %s4282_s20 = sld [smem:[#allocation3 + $0x54]] }
 0x1f6   : > { %v1311_v3 = vmul.f32 %v1310_v23, %v1307_v50  ;;  %v1298_v40 = vmul.f32 %v1296_v29, %v1294_v22 }
 0x1f7   : > { %v1316_v2 = vpop.permute.xlu0 %1315  ;;  %v1304_v31 = vpop.permute.xlu1 %1303 }
 0x1f8   : > { %v3962_v49 = vadd.f32 %v1311_v3, %v1299_v34  ;;  %v1300_v19 = vadd.f32 %v1298_v40, %v1286_v16  ;;  %v1305_v10 = vsel %vm4882_vm8, %v1302_v6, %v1304_v31  ;;  %vm4891_vm8 = vmmov %vm4887_vm1 }
 0x1f9   : > { %v1308_v48 = vsel %vm2731_vm15, %v1305_v10, 0.0  ;;  %1709 = vrot.lane.b32.xlu1 %v2862_v32, %s4881_s24  ;;  %1721 = vrot.lane.b32.xlu0 %v2815_v21, %s4883_s29  ;;  %s4292_s24 = sld [smem:[#allocation3 + $0x55]] }
 0x1fa   : > { %v1312_v59 = vmul.f32 %v1310_v23, %v1308_v48  ;;  %v4888_v48 = vld [vmem:[#allocation28_spill] sm:$0xff] }
 0x1fb   : > { %v1330_v52 = vpop.permute.xlu0 %1329  ;;  %v1318_v29 = vpop.permute.xlu1 %1317 }
 0x1fc   : > { %v1314_v17 = vadd.f32 %v1312_v59, %v1300_v19  ;;  %v1319_v40 = vsel %vm4886_vm4, %v1316_v2, %v1318_v29  ;;  %v1320_v59 = vsel %vm4889_vm11, %v4888_v48, %v1316_v2  ;;  %v4890_v29 = vld [vmem:[#allocation29_spill] sm:$0xff]  ;;  %vm4892_vm4 = vcmp.ge.s32.totalorder %v2664_v8, 0 }
 0x1fd   : > { %1723 = vrot.lane.b32.xlu1 %v2862_v32, %s4883_s29  ;;  %1733 = vrot.lane.b32.xlu0 %v2815_v21, %s2138_s25  ;;  %v1322_v9 = vsel %vm2707_vm13, %v1319_v40, 0.0  ;;  %v1334_v25 = vsel %vm4891_vm8, %v4890_v29, %v1330_v52  ;;  %v1321_v2 = vsel %vm4892_vm4, %v1320_v59, 0.0  ;;  %v1338_v48 = vstv %s1947_s30  ;;  %s4308_s29 = sld [smem:[#allocation3 + $0x56]]  ;;  %s4355_s30 = sld [smem:[#allocation3 + $0x5a]] }
 0x1fe   : > { %vm4894_vm11 = vcmp.lt.s32.totalorder %v2612_v15, 16  ;;  %vm4895_vm8 = vcmp.lt.s32.totalorder %v2612_v15, 14 }
 0x1ff   : > { %v1344_v63 = vpop.permute.xlu0 %1343  ;;  %v1332_v43 = vpop.permute.xlu1 %1331  ;;  %vm4898_vm4 = vmmov %vm4894_vm11 }
 0x200   : > { %v1333_v10 = vsel %vm4887_vm1, %v1330_v52, %v1332_v43  ;;  %vm4893_vm1 = vcmp.ge.s32.totalorder %v2647_v7, 0 }
 0x201   : > { %1735 = vrot.lane.b32.xlu1 %v2862_v32, %s2138_s25  ;;  %1747 = vrot.lane.b32.xlu0 %v2815_v21, %s4884_s26  ;;  %s1946_s25 = sld [smem:[#allocation3 + $0x40]]  ;;  %v1336_v26 = vsel %vm2767_vm9, %v1333_v10, 0.0  ;;  %v1335_v52 = vsel %vm4893_vm1, %v1334_v25, 0.0  ;;  %vm4899_vm1 = vcmp.lt.s32.totalorder %v2612_v15, 13 }
 0x202   : > { %v1340_v29 = vmul.f32 %v1338_v48, %v1336_v26  ;;  %v1339_v26 = vmul.f32 %v1338_v48, %v1335_v52  ;;  %v1378_v48 = vstv %s4026_s6  ;;  %v4900_v52 = vld [vmem:[#allocation40_spill] sm:$0xff]  ;;  %s4393_s6 = sld [smem:[#allocation3 + $0x5d]] }
 0x203   : > { %v1356_v42 = vpop.permute.xlu0 %1355  ;;  %v1346_v5 = vpop.permute.xlu1 %1345 }
 0x204   : > { %v1347_v55 = vsel %vm4894_vm11, %v1344_v63, %v1346_v5  ;;  %vm4902_vm11 = vcmp.lt.s32.totalorder %v2612_v15, 3 }
 0x205   : > { %1749 = vrot.lane.b32.xlu1 %v2862_v32, %s4884_s26  ;;  %1761 = vrot.lane.b32.xlu0 %v2815_v21, %s4885_s27  ;;  %s4334_s26 = sld [smem:[#allocation3 + $0x57]] }
 0x207   : > { %v1370_v36 = vpop.permute.xlu0 %1369  ;;  %v1358_v51 = vpop.permute.xlu1 %1357  ;;  %v1324_v53 = vstv %s1946_s25  ;;  %s4353_s25 = sld [smem:[#allocation3 + $0x59]] }
 0x208   : > { %v1326_v40 = vmul.f32 %v1324_v53, %v1322_v9  ;;  %v1359_v10 = vsel %vm605_vm6, %v1356_v42, %v1358_v51  ;;  %v1325_v12 = vmul.f32 %v1324_v53, %v1321_v2  ;;  %v1360_v53 = vsel %vm605_vm6, %v4896_v38, %v1356_v42  ;;  %v4897_v51 = vld [vmem:[#allocation34_spill] sm:$0xff]  ;;  %vm4901_vm6 = vmmov %vm4895_vm8 }
 0x209   : > { %1763 = vrot.lane.b32.xlu1 %v2862_v32, %s4885_s27  ;;  %v1362_v5 = vsel %vm2824_vm3, %v1359_v10, 0.0  ;;  %v1348_v2 = vsel %vm4898_vm4, %v4897_v51, %v1344_v63  ;;  %v1374_v38 = vsel %vm4901_vm6, %v4900_v52, %v1370_v36  ;;  %vm4905_vm4 = vcmp.lt.s32.totalorder %v2612_v15, 2  ;;  %s4342_s27 = sld [smem:[#allocation3 + $0x58]] }
 0x20a   : > { %v1328_v56 = vadd.f32 %v1326_v40, %v1314_v17  ;;  %v1352_v17 = vmul.f32 %v1350_v41, %v1347_v55  ;;  %v1327_v40 = vadd.f32 %v1325_v12, %v3962_v49  ;;  %v1361_v55 = vsel %vm279_vm14, %v1360_v53, 0.0 }
 0x20b   : > { %v3986_v45 = vpop.permute.xlu0 %1383  ;;  %v1372_v23 = vpop.permute.xlu1 %1371  ;;  %v1366_v63 = vmul.f32 %v1364_v61, %v1362_v5  ;;  %v1375_v53 = vsel %vm287_vm0, %v1374_v38, 0.0  ;;  %vm4908_vm6 = vcmp.lt.s32.totalorder %v2612_v15, 1 }
 0x20c   : > { %v1373_v25 = vsel %vm4895_vm8, %v1370_v36, %v1372_v23  ;;  %v1342_v44 = vadd.f32 %v1340_v29, %v1328_v56  ;;  %v1341_v49 = vadd.f32 %v1339_v26, %v1327_v40  ;;  %v1351_v29 = vmul.f32 %v1350_v41, %v1348_v2  ;;  %v4903_v36 = vld [vmem:[#allocation41_spill] sm:$0xff]  ;;  %vm4904_vm8 = vmmov %vm4899_vm1  ;;  %v4906_v2 = vld [vmem:[#allocation46_spill] sm:$0xff] }
 0x20d   : > { %v1376_v42 = vsel %vm2842_vm7, %v1373_v25, 0.0  ;;  %v1388_v25 = vsel %vm4904_vm8, %v4903_v36, %v3986_v45  ;;  %v1406_v26 = vstv %s4042_s8  ;;  %vm4912_vm8 = vmmov %vm4908_vm6  ;;  %s4427_s8 = sld [smem:[#allocation3 + $0x5f]] }
 0x20e   : > { %v1354_v52 = vadd.f32 %v1352_v17, %v1342_v44  ;;  %v1380_v5 = vmul.f32 %v1378_v48, %v1376_v42  ;;  %v1389_v38 = vsel %vm295_vm10, %v1388_v25, 0.0  ;;  %v1379_v42 = vmul.f32 %v1378_v48, %v1375_v53 }
 0x20f   : > { %v3988_v6 = vpop.permute.xlu0 %1397  ;;  %v1386_v18 = vpop.permute.xlu1 %1385 }
 0x210   : > { %v1387_v23 = vsel %vm4899_vm1, %v3986_v45, %v1386_v18  ;;  %v1392_v18 = vstv %s4034_s7  ;;  %vm4907_vm1 = vmmov %vm4902_vm11  ;;  %v1368_v40 = vadd.f32 %v1366_v63, %v1354_v52  ;;  %s4415_s7 = sld [smem:[#allocation3 + $0x5e]] }
 0x211   : > { %v1390_v51 = vsel %vm2868_vm2, %v1387_v23, 0.0  ;;  %v1402_v45 = vsel %vm4907_vm1, %v4906_v2, %v3988_v6  ;;  %v1393_v2 = vmul.f32 %v1392_v18, %v1389_v38  ;;  %vm4914_vm1 = vcmp.ge.s32.totalorder %v2647_v7, 0 }
 0x212   : > { %v1382_v36 = vadd.f32 %v1380_v5, %v1368_v40  ;;  %v1403_v25 = vsel %vm253_vm5, %v1402_v45, 0.0 }
 0x213   : > { %v3990_v34 = vpop.permute.xlu0 %1411  ;;  %v1400_v16 = vpop.permute.xlu1 %1399  ;;  %v1407_v45 = vmul.f32 %v1406_v26, %v1403_v25 }
 0x214   : > { %v1401_v12 = vsel %vm4902_vm11, %v3988_v6, %v1400_v16  ;;  %v1365_v16 = vmul.f32 %v1364_v61, %v1361_v55  ;;  %v1353_v6 = vadd.f32 %v1351_v29, %v1341_v49  ;;  %v4909_v55 = vld [vmem:[#allocation47_spill] sm:$0xff]  ;;  %vm4910_vm11 = vmmov %vm4905_vm4  ;;  %v4911_v49 = vld [vmem:[#allocation52_spill] sm:$0xff] }
 0x215   : > { %v1404_v44 = vsel %vm2731_vm15, %v1401_v12, 0.0  ;;  %v1416_v12 = vsel %vm4910_vm11, %v4909_v55, %v3990_v34 }
 0x216   : > { %v1408_v52 = vmul.f32 %v1406_v26, %v1404_v44  ;;  %v1434_v44 = vstv %s4088_s9  ;;  %s4442_s9 = sld [smem:[#allocation3 + $0x61]] }
 0x217   : > { %v3992_v11 = vpop.permute.xlu0 %1425  ;;  %v3994_v60 = vpop.permute.xlu1 %1413 }
 0x218   : > { %v1415_v41 = vsel %vm4905_vm4, %v3990_v34, %v3994_v60  ;;  %v1394_v60 = vmul.f32 %v1392_v18, %v1390_v51  ;;  %v1420_v51 = vstv %s4063_s18  ;;  %v1430_v48 = vsel %vm4912_vm8, %v4911_v49, %v3992_v11  ;;  %s4434_s18 = sld [smem:[#allocation3 + $0x60]] }
 0x219   : > { %v1418_v63 = vsel %vm2707_vm13, %v1415_v41, 0.0  ;;  %vm4913_vm4 = vcmp.ge.s32.totalorder %v2664_v8, 0  ;;  %v1454_v49 = vstv %s4130_s10  ;;  %vm4919_vm8 = vcmp.lt.s32.totalorder %v2612_v15, 126  ;;  %s4984_s10 = sshll.u32 %s4986_s15, 3 }
 0x21a   : > { %v1396_v5 = vadd.f32 %v1394_v60, %v1382_v36  ;;  %v1417_v41 = vsel %vm4913_vm4, %v1416_v12, 0.0  ;;  %v1422_v18 = vmul.f32 %v1420_v51, %v1418_v63  ;;  %v1440_v12 = vstv %s4113_s21  ;;  %v4915_v63 = vld [vmem:[#allocation55_spill] sm:$0xff]  ;;  %vm4920_vm4 = vmmov %vm4919_vm8  ;;  %s222_s21 = sld [smem:[#allocation2]] }
 0x21b   : > { %v3996_v24 = vpop.permute.xlu1 %1427  ;;  %v3998_v50 = vpop.permute.xlu0 %1445 }
 0x21c   : > { %v1429_v61 = vsel %vm4908_vm6, %v3992_v11, %v3996_v24  ;;  %v1367_v24 = vadd.f32 %v1365_v16, %v1353_v6  ;;  %v1410_v40 = vadd.f32 %v1408_v52, %v1396_v5  ;;  %v1431_v11 = vsel %vm4914_vm1, %v1430_v48, 0.0 }
 0x21d   : > { %v1432_v34 = vsel %vm2767_vm9, %v1429_v61, 0.0  ;;  %v1421_v6 = vmul.f32 %v1420_v51, %v1417_v41  ;;  %vm4916_vm6 = vcmp.lt.s32.totalorder %v2612_v15, 127  ;;  %vm4922_vm1 = vcmp.lt.s32.totalorder %v2612_v15, 125 }
 0x21e   : > { %v1381_v16 = vadd.f32 %v1379_v42, %v1367_v24  ;;  %v1436_v38 = vmul.f32 %v1434_v44, %v1432_v34  ;;  %v1424_v36 = vadd.f32 %v1422_v18, %v1410_v40  ;;  %v1435_v42 = vmul.f32 %v1434_v44, %v1431_v11  ;;  %vm4917_vm11 = vmmov %vm4916_vm6  ;;  %v4918_v18 = vld [vmem:[#allocation60_spill] sm:$0xff]  ;;  %v4921_v40 = vld [vmem:[#allocation61_spill] sm:$0xff] }
 0x21f   : > { %v4000_v22 = vpop.permute.xlu1 %1447  ;;  %v4002_v3 = vpop.permute.xlu0 %1459  ;;  %v1442_v24 = vmul.f32 %v1440_v12, %v2862_v32  ;;  %v1468_v44 = vstv %s4141_s11 }
 0x220   : > { %v1395_v61 = vadd.f32 %v1393_v2, %v1381_v16  ;;  %v1449_v25 = vsel %vm4916_vm6, %v4000_v22, %v4915_v63  ;;  %v1450_v51 = vsel %vm4917_vm11, %v3998_v50, %v4000_v22  ;;  %v1438_v52 = vadd.f32 %v1436_v38, %v1424_v36  ;;  %vm4923_vm6 = vmmov %vm4922_vm1 }
 0x221   : > { %v1451_v5 = vsel %vm279_vm14, %v1450_v51, 0.0  ;;  %v1452_v41 = vsel %vm2824_vm3, %v1449_v25, 0.0  ;;  %v1441_v16 = vmul.f32 %v1440_v12, %v2815_v21  ;;  %v1482_v12 = vstv %s4148_s1 }
 0x222   : > { %v1409_v26 = vadd.f32 %v1407_v45, %v1395_v61  ;;  %v1444_v45 = vadd.f32 %v1442_v24, %v1438_v52  ;;  %v1455_v61 = vmul.f32 %v1454_v49, %v1451_v5  ;;  %vm4925_vm11 = vcmp.lt.s32.totalorder %v2612_v15, 115 }
 0x223   : > { %v4006_v31 = vpop.permute.xlu1 %1461  ;;  %v4008_v19 = vpop.permute.xlu0 %1473  ;;  %v1496_v51 = vstv %s4158_s12  ;;  %s185_s12 = scalar_lea.vmem %s4487_s3, %s4984_s10 }
 0x224   : > { %v1423_v2 = vadd.f32 %v1421_v6, %v1409_v26  ;;  %v1463_v50 = vsel %vm4919_vm8, %v4006_v31, %v4918_v18  ;;  %v1464_v32 = vsel %vm4920_vm4, %v4002_v3, %v4006_v31  ;;  %v1456_v3 = vmul.f32 %v1454_v49, %v1452_v41  ;;  %v4924_v26 = vld [vmem:[#allocation65_spill] sm:$0xff]  ;;  %vm4926_vm8 = vmmov %vm4925_vm11 }
 0x225   : > { %v1465_v21 = vsel %vm287_vm0, %v1464_v32, 0.0  ;;  %v1466_v31 = vsel %vm2842_vm7, %v1463_v50, 0.0  ;;  %vm4927_vm4 = vcmp.lt.s32.totalorder %v2612_v15, 114 }
 0x226   : > { %v1437_v22 = vadd.f32 %v1435_v42, %v1423_v2  ;;  %v1469_v52 = vmul.f32 %v1468_v44, %v1465_v21  ;;  %v1470_v24 = vmul.f32 %v1468_v44, %v1466_v31  ;;  %v1458_v49 = vadd.f32 %v1456_v3, %v1444_v45 }
 0x227   : > { %v4028_v43 = vpop.permute.xlu1 %1475  ;;  %v4030_v58 = vpop.permute.xlu0 %1487 }
 0x228   : > { %v1477_v11 = vsel %vm4922_vm1, %v4028_v43, %v4921_v40  ;;  %v1478_v38 = vsel %vm4923_vm6, %v4008_v19, %v4028_v43  ;;  %v1443_v42 = vadd.f32 %v1441_v16, %v1437_v22  ;;  %vm4928_vm1 = vmmov %vm4927_vm4  ;;  %vm4929_vm6 = vcmp.lt.s32.totalorder %v2612_v15, 113 }
 0x229   : > { %v1479_v63 = vsel %vm295_vm10, %v1478_v38, 0.0  ;;  %v1480_v25 = vsel %vm2868_vm2, %v1477_v11, 0.0  ;;  %v1510_v22 = vstv %s4179_s22  ;;  %v1472_v40 = vadd.f32 %v1470_v24, %v1458_v49 }
 0x22a   : > { %v1483_v50 = vmul.f32 %v1482_v12, %v1479_v63  ;;  %v1484_v32 = vmul.f32 %v1482_v12, %v1480_v25 }
 0x22b   : > { %v4044_v59 = vpop.permute.xlu1 %1489  ;;  %v4046_v9 = vpop.permute.xlu0 %1501 }
 0x22c   : > { %v1491_v19 = vsel %vm4925_vm11, %v4044_v59, %v4924_v26  ;;  %v1492_v43 = vsel %vm4926_vm8, %v4030_v58, %v4044_v59  ;;  %v1457_v59 = vadd.f32 %v1455_v61, %v1443_v42  ;;  %vm4930_vm11 = vmmov %vm4929_vm6  ;;  %vm4931_vm8 = vcmp.ge.s32.totalorder %v2664_v8, 0 }
 0x22d   : > { %v1493_v5 = vsel %vm253_vm5, %v1492_v43, 0.0  ;;  %v1494_v41 = vsel %vm2731_vm15, %v1491_v19, 0.0  ;;  %v1524_v61 = vstv %s4194_s13  ;;  %v1486_v31 = vadd.f32 %v1484_v32, %v1472_v40 }
 0x22e   : > { %v1471_v44 = vadd.f32 %v1469_v52, %v1457_v59  ;;  %v1497_v11 = vmul.f32 %v1496_v51, %v1493_v5  ;;  %v1498_v38 = vmul.f32 %v1496_v51, %v1494_v41  ;;  %v1536_v52 = vstv %s4226_s16 }
 0x22f   : > { %v4072_v10 = vpop.permute.xlu1 %1503  ;;  %v4074_v56 = vpop.permute.xlu0 %1515  ;;  %v1578_v40 = vstv %s4264_s17 }
 0x230   : > { %v1505_v2 = vsel %vm4927_vm4, %v4072_v10, %v2832_v14  ;;  %v1506_v58 = vsel %vm4928_vm1, %v4046_v9, %v4072_v10  ;;  %vm4932_vm4 = vcmp.ge.s32.totalorder %v2647_v7, 0  ;;  %v1485_v21 = vadd.f32 %v1483_v50, %v1471_v44 }
 0x231   : > { %v1507_v16 = vsel %vm4931_vm8, %v1506_v58, 0.0  ;;  %v1508_v45 = vsel %vm2707_vm13, %v1505_v2, 0.0  ;;  %vm4933_vm1 = vcmp.lt.s32.totalorder %v2612_v15, 111  ;;  %v1500_v63 = vadd.f32 %v1498_v38, %v1486_v31 }
 0x232   : > { %v1511_v12 = vmul.f32 %v1510_v22, %v1507_v16  ;;  %v1512_v26 = vmul.f32 %v1510_v22, %v1508_v45  ;;  %v1499_v42 = vadd.f32 %v1497_v11, %v1485_v21  ;;  %v1550_v2 = vstv %s4228_s19 }
 0x233   : > { %v4103_v17 = vpop.permute.xlu1 %1517  ;;  %v4105_v23 = vpop.permute.xlu0 %1529  ;;  %v1564_v22 = vstv %s4252_s23 }
 0x234   : > { %v1519_v9 = vsel %vm4929_vm6, %v4103_v17, %v2930_v37  ;;  %v1520_v10 = vsel %vm4930_vm11, %v4074_v56, %v4103_v17  ;;  %vm4934_vm6 = vmmov %vm4933_vm1  ;;  %vm4935_vm11 = vcmp.lt.s32.totalorder %v2612_v15, 112  ;;  %v1514_v59 = vadd.f32 %v1512_v26, %v1500_v63 }
 0x235   : > { %v1521_v37 = vsel %vm4932_vm4, %v1520_v10, 0.0  ;;  %v1522_v3 = vsel %vm2767_vm9, %v1519_v9, 0.0  ;;  %vm4936_vm8 = vmmov %vm4935_vm11  ;;  %vm4937_vm4 = vcmp.lt.s32.totalorder %v2612_v15, 110 }
 0x236   : > { %v1525_v25 = vmul.f32 %v1524_v61, %v1521_v37  ;;  %v1526_v51 = vmul.f32 %v1524_v61, %v1522_v3 }
 0x237   : > { %v4132_v29 = vpop.permute.xlu1 %1531  ;;  %v4134_v53 = vpop.permute.xlu0 %1541 }
 0x238   : > { %v1533_v24 = vsel %vm4935_vm11, %v4132_v29, %v2956_v46  ;;  %v1528_v41 = vadd.f32 %v1526_v51, %v1514_v59 }
 0x239   : > { %v1538_v32 = vmul.f32 %v1536_v52, %v1533_v24  ;;  %v4945_v24 = vld [vmem:[#allocation24_spill] sm:$0xff] }
 0x23b   : > { %v4143_v55 = vpop.permute.xlu1 %1543  ;;  %v4145_v60 = vpop.permute.xlu0 %1555  ;;  %v1540_v38 = vadd.f32 %v1538_v32, %v1528_v41 }
 0x23c   : > { %v1545_v19 = vsel %vm4933_vm1, %v4143_v55, %v3014_v28  ;;  %v1546_v43 = vsel %vm4934_vm6, %v4134_v53, %v4143_v55  ;;  %v1534_v28 = vsel %vm4936_vm8, %v4105_v23, %v4132_v29  ;;  %v1513_v55 = vadd.f32 %v1511_v12, %v1499_v42  ;;  %vm4938_vm1 = vmmov %vm4937_vm4 }
 0x23d   : > { %v1547_v49 = vsel %vm279_vm14, %v1546_v43, 0.0  ;;  %v1548_v5 = vsel %vm2824_vm3, %v1545_v19, 0.0  ;;  %v1537_v50 = vmul.f32 %v1536_v52, %v1534_v28  ;;  %vm4939_vm6 = vcmp.lt.s32.totalorder %v2612_v15, 109 }
 0x23e   : > { %v1527_v29 = vadd.f32 %v1525_v25, %v1513_v55  ;;  %v1551_v9 = vmul.f32 %v1550_v2, %v1547_v49  ;;  %v1552_v10 = vmul.f32 %v1550_v2, %v1548_v5  ;;  %vm4940_vm11 = vmmov %vm4939_vm6  ;;  %vm4941_vm8 = vcmp.lt.s32.totalorder %v2612_v15, 99 }
 0x23f   : > { %v4162_v48 = vpop.permute.xlu1 %1557  ;;  %v4164_v34 = vpop.permute.xlu0 %1569  ;;  %v1592_v19 = vstv %s4282_s20  ;;  %v1606_v25 = vstv %s4292_s24  ;;  %v1620_v5 = vstv %s4308_s29 }
 0x240   : > { %v1559_v46 = vsel %vm4937_vm4, %v4162_v48, %v3051_v39  ;;  %v1560_v23 = vsel %vm4938_vm1, %v4145_v60, %v4162_v48  ;;  %v1539_v11 = vadd.f32 %v1537_v50, %v1527_v29  ;;  %vm4942_vm4 = vmmov %vm4941_vm8  ;;  %v1554_v26 = vadd.f32 %v1552_v10, %v1540_v38 }
 0x241   : > { %v1561_v39 = vsel %vm287_vm0, %v1560_v23, 0.0  ;;  %v1562_v44 = vsel %vm2842_vm7, %v1559_v46, 0.0  ;;  %vm4943_vm1 = vcmp.lt.s32.totalorder %v2612_v15, 98 }
 0x242   : > { %v1565_v37 = vmul.f32 %v1564_v22, %v1561_v39  ;;  %v1566_v3 = vmul.f32 %v1564_v22, %v1562_v44  ;;  %v1553_v12 = vadd.f32 %v1551_v9, %v1539_v11  ;;  %v4950_v44 = vld [vmem:[#allocation27_spill] sm:$0xff]  ;;  %v4953_v11 = vld [vmem:[#allocation25_spill] sm:$0xff] }
 0x243   : > { %v4196_v6 = vpop.permute.xlu1 %1571  ;;  %v4198_v36 = vpop.permute.xlu0 %1583 }
 0x244   : > { %v1573_v60 = vsel %vm4939_vm6, %v4196_v6, %v3117_v47  ;;  %v1574_v48 = vsel %vm4940_vm11, %v4164_v34, %v4196_v6  ;;  %vm4944_vm6 = vmmov %vm4943_vm1  ;;  %v1567_v51 = vadd.f32 %v1565_v37, %v1553_v12  ;;  %v1568_v52 = vadd.f32 %v1566_v3, %v1554_v26 }
 0x245   : > { %v1575_v34 = vsel %vm295_vm10, %v1574_v48, 0.0  ;;  %v1576_v6 = vsel %vm2868_vm2, %v1573_v60, 0.0  ;;  %vm4946_vm11 = vcmp.lt.s32.totalorder %v2612_v15, 97  ;;  %v1646_v3 = vstv %s4342_s27 }
 0x246   : > { %v1579_v42 = vmul.f32 %v1578_v40, %v1575_v34  ;;  %v1580_v63 = vmul.f32 %v1578_v40, %v1576_v6  ;;  %v1632_v40 = vstv %s4334_s26 }
 0x247   : > { %v4230_v18 = vpop.permute.xlu1 %1585  ;;  %v4232_v14 = vpop.permute.xlu0 %1597 }
 0x248   : > { %v1587_v61 = vsel %vm4941_vm8, %v4230_v18, %v4799_v57  ;;  %v1588_v47 = vsel %vm4942_vm4, %v4198_v36, %v4230_v18  ;;  %vm4947_vm8 = vmmov %vm4946_vm11  ;;  %vm4948_vm4 = vcmp.ge.s32.totalorder %v2664_v8, 0  ;;  %v1581_v46 = vadd.f32 %v1579_v42, %v1567_v51 }
 0x249   : > { %v1589_v57 = vsel %vm253_vm5, %v1588_v47, 0.0  ;;  %v1590_v36 = vsel %vm2731_vm15, %v1587_v61, 0.0  ;;  %v1582_v23 = vadd.f32 %v1580_v63, %v1568_v52 }
 0x24a   : > { %v1594_v55 = vmul.f32 %v1592_v19, %v1590_v36 }
 0x24b   : > { %v1600_v56 = vpop.permute.xlu1 %1599  ;;  %v4254_v17 = vpop.permute.xlu0 %1611 }
 0x24c   : > { %v1601_v18 = vsel %vm4943_vm1, %v1600_v56, %v3221_v35  ;;  %v1602_v43 = vsel %vm4944_vm6, %v4232_v14, %v1600_v56  ;;  %v1593_v56 = vmul.f32 %v1592_v19, %v1589_v57  ;;  %vm4949_vm1 = vcmp.ge.s32.totalorder %v2647_v7, 0 }
 0x24d   : > { %v1603_v59 = vsel %vm4948_vm4, %v1602_v43, 0.0  ;;  %v1604_v49 = vsel %vm2707_vm13, %v1601_v18, 0.0  ;;  %v1596_v10 = vadd.f32 %v1594_v55, %v1582_v23  ;;  %vm4951_vm6 = vcmp.lt.s32.totalorder %v2612_v15, 95  ;;  %v4959_v43 = vld [vmem:[#allocation31_spill] sm:$0xff] }
 0x24e   : > { %v1608_v41 = vmul.f32 %v1606_v25, %v1604_v49  ;;  %v1595_v9 = vadd.f32 %v1593_v56, %v1581_v46  ;;  %v1660_v18 = vstv %s4353_s25  ;;  %v4962_v56 = vld [vmem:[#allocation36_spill] sm:$0xff] }
 0x24f   : > { %v1614_v58 = vpop.permute.xlu1 %1613  ;;  %v4276_v53 = vpop.permute.xlu0 %1625 }
 0x250   : > { %v1615_v28 = vsel %vm4946_vm11, %v1614_v58, %v4945_v24  ;;  %v1616_v35 = vsel %vm4947_vm8, %v4254_v17, %v1614_v58  ;;  %v1607_v58 = vmul.f32 %v1606_v25, %v1603_v59  ;;  %vm4952_vm11 = vmmov %vm4951_vm6  ;;  %vm4954_vm8 = vcmp.lt.s32.totalorder %v2612_v15, 96 }
 0x251   : > { %v1617_v29 = vsel %vm4949_vm1, %v1616_v35, 0.0  ;;  %v1618_v17 = vsel %vm2767_vm9, %v1615_v28, 0.0  ;;  %vm4955_vm4 = vmmov %vm4954_vm8  ;;  %v1610_v37 = vadd.f32 %v1608_v41, %v1596_v10  ;;  %vm4957_vm1 = vcmp.lt.s32.totalorder %v2612_v15, 94 }
 0x252   : > { %v1621_v22 = vmul.f32 %v1620_v5, %v1617_v29  ;;  %v1622_v39 = vmul.f32 %v1620_v5, %v1618_v17  ;;  %v1609_v47 = vadd.f32 %v1607_v58, %v1595_v9  ;;  %v1674_v35 = vstv %s4355_s30  ;;  %v4965_v17 = vld [vmem:[#allocation33_spill] sm:$0xff] }
 0x253   : > { %v1628_v16 = vpop.permute.xlu1 %1627  ;;  %v1638_v45 = vpop.permute.xlu0 %1637 }
 0x254   : > { %v1629_v38 = vsel %vm4954_vm8, %v1628_v16, %v4953_v11  ;;  %v1630_v61 = vsel %vm4955_vm4, %v4276_v53, %v1628_v16  ;;  %v1623_v53 = vadd.f32 %v1621_v22, %v1609_v47  ;;  %v1624_v16 = vadd.f32 %v1622_v39, %v1610_v37 }
 0x255   : > { %v1633_v57 = vmul.f32 %v1632_v40, %v1630_v61  ;;  %v1634_v36 = vmul.f32 %v1632_v40, %v1629_v38  ;;  %vm4963_vm4 = vcmp.lt.s32.totalorder %v2612_v15, 83  ;;  %v1702_v38 = vstv %s4381_s5 }
 0x257   : > { %v1640_v21 = vpop.permute.xlu1 %1639  ;;  %v1652_v31 = vpop.permute.xlu0 %1651  ;;  %v1635_v59 = vadd.f32 %v1633_v57, %v1623_v53  ;;  %v1636_v49 = vadd.f32 %v1634_v36, %v1624_v16 }
 0x258   : > { %v1641_v60 = vsel %vm4951_vm6, %v1640_v21, %v4950_v44  ;;  %v1642_v48 = vsel %vm4952_vm11, %v1638_v45, %v1640_v21  ;;  %v4956_v21 = vld [vmem:[#allocation32_spill] sm:$0xff]  ;;  %vm4958_vm6 = vmmov %vm4957_vm1  ;;  %vm4960_vm11 = vcmp.lt.s32.totalorder %v2612_v15, 93 }
 0x259   : > { %v1643_v12 = vsel %vm279_vm14, %v1642_v48, 0.0  ;;  %v1644_v45 = vsel %vm2824_vm3, %v1641_v60, 0.0  ;;  %vm4961_vm8 = vmmov %vm4960_vm11  ;;  %v4968_v48 = vld [vmem:[#allocation37_spill] sm:$0xff] }
 0x25a   : > { %v1647_v25 = vmul.f32 %v1646_v3, %v1643_v12  ;;  %v1648_v51 = vmul.f32 %v1646_v3, %v1644_v45 }
 0x25b   : > { %v1654_v2 = vpop.permute.xlu1 %1653  ;;  %v1666_v14 = vpop.permute.xlu0 %1665 }
 0x25c   : > { %v1655_v26 = vsel %vm4957_vm1, %v1654_v2, %v4956_v21  ;;  %v1656_v19 = vsel %vm4958_vm6, %v1652_v31, %v1654_v2  ;;  %v1688_v2 = vstv %s4357_s4  ;;  %vm4964_vm1 = vmmov %vm4963_vm4  ;;  %vm4966_vm6 = vcmp.lt.s32.totalorder %v2612_v15, 82 }
 0x25d   : > { %v1657_v31 = vsel %vm287_vm0, %v1656_v19, 0.0  ;;  %v1658_v52 = vsel %vm2842_vm7, %v1655_v26, 0.0 }
 0x25e   : > { %v1661_v23 = vmul.f32 %v1660_v18, %v1657_v31  ;;  %v1662_v29 = vmul.f32 %v1660_v18, %v1658_v52  ;;  %v1728_v18 = vstv %s4415_s7  ;;  %v4974_v31 = vld [vmem:[#allocation42_spill] sm:$0xff] }
 0x25f   : > { %v1668_v50 = vpop.permute.xlu1 %1667  ;;  %v1680_v32 = vpop.permute.xlu0 %1679 }
 0x260   : > { %v1669_v42 = vsel %vm4960_vm11, %v1668_v50, %v4959_v43  ;;  %v1670_v63 = vsel %vm4961_vm8, %v1666_v14, %v1668_v50  ;;  %vm4967_vm11 = vmmov %vm4966_vm6  ;;  %v1649_v50 = vadd.f32 %v1647_v25, %v1635_v59  ;;  %vm4969_vm8 = vcmp.lt.s32.totalorder %v2612_v15, 81  ;;  %v4973_v43 = vld [vmem:[#allocation38_spill] sm:$0xff] }
 0x261   : > { %v1671_v5 = vsel %vm295_vm10, %v1670_v63, 0.0  ;;  %v1672_v46 = vsel %vm2868_vm2, %v1669_v42, 0.0 }
 0x262   : > { %v1675_v44 = vmul.f32 %v1674_v35, %v1671_v5  ;;  %v1676_v60 = vmul.f32 %v1674_v35, %v1672_v46  ;;  %v1663_v61 = vadd.f32 %v1661_v23, %v1649_v50 }
 0x263   : > { %v1682_v34 = vpop.permute.xlu1 %1681  ;;  %v1694_v6 = vpop.permute.xlu0 %1693 }
 0x264   : > { %v1683_v55 = vsel %vm4963_vm4, %v1682_v34, %v4962_v56  ;;  %v1684_v14 = vsel %vm4964_vm1, %v1680_v32, %v1682_v34  ;;  %v1650_v32 = vadd.f32 %v1648_v51, %v1636_v49  ;;  %vm4970_vm4 = vmmov %vm4969_vm8  ;;  %v1716_v34 = vstv %s4393_s6 }
 0x265   : > { %v1685_v9 = vsel %vm253_vm5, %v1684_v14, 0.0  ;;  %v1686_v10 = vsel %vm2731_vm15, %v1683_v55, 0.0  ;;  %vm4971_vm5 = vcmp.ge.s32.totalorder %v2664_v8, 0  ;;  %vm4972_vm15 = vcmp.ge.s32.totalorder %v2647_v7, 0 }
 0x266   : > { %v1664_v47 = vadd.f32 %v1662_v29, %v1650_v32  ;;  %v1689_v37 = vmul.f32 %v1688_v2, %v1685_v9  ;;  %v1690_v3 = vmul.f32 %v1688_v2, %v1686_v10  ;;  %v1677_v62 = vadd.f32 %v1675_v44, %v1663_v61  ;;  %v4977_v29 = vld [vmem:[#allocation39_spill] sm:$0xff] }
 0x267   : > { %v1696_v24 = vpop.permute.xlu1 %1695  ;;  %v1708_v28 = vpop.permute.xlu0 %1707  ;;  %v1756_v49 = vstv %s4434_s18 }
 0x268   : > { %v1697_v58 = vsel %vm4966_vm6, %v1696_v24, %v4965_v17  ;;  %v1698_v41 = vsel %vm4967_vm11, %v1694_v6, %v1696_v24  ;;  %v1678_v21 = vadd.f32 %v1676_v60, %v1664_v47  ;;  %v1691_v53 = vadd.f32 %v1689_v37, %v1677_v62 }
 0x269   : > { %v1699_v13 = vsel %vm4971_vm5, %v1698_v41, 0.0  ;;  %v1700_v27 = vsel %vm2707_vm13, %v1697_v58, 0.0  ;;  %vm4975_vm13 = vcmp.lt.s32.totalorder %v2612_v15, 79  ;;  %v1775_v47 = vstv %s222_s21 }
 0x26a   : > { %v1703_v26 = vmul.f32 %v1702_v38, %v1699_v13  ;;  %v1704_v19 = vmul.f32 %v1702_v38, %v1700_v27  ;;  %v1692_v16 = vadd.f32 %v1690_v3, %v1678_v21  ;;  %v4983_v62 = vlaneseq }
 0x26b   : > { %v1710_v22 = vpop.permute.xlu1 %1709  ;;  %v1722_v39 = vpop.permute.xlu0 %1721 }
 0x26c   : > { %v1711_v40 = vsel %vm4969_vm8, %v1710_v22, %v4968_v48  ;;  %v1712_v11 = vsel %vm4970_vm4, %v1708_v28, %v1710_v22  ;;  %v1705_v25 = vadd.f32 %v1703_v26, %v1691_v53  ;;  %v1706_v51 = vadd.f32 %v1704_v19, %v1692_v16  ;;  %v4980_v48 = vld [vmem:[#allocation43_spill] sm:$0xff] }
 0x26d   : > { %v1713_v6 = vsel %vm4972_vm15, %v1712_v11, 0.0  ;;  %v1714_v12 = vsel %vm2767_vm9, %v1711_v40, 0.0  ;;  %vm4976_vm9 = vmmov %vm4975_vm13  ;;  %v1742_v28 = vstv %s4427_s8  ;;  %v1770_v22 = vstv %s4442_s9 }
 0x26e   : > { %v1717_v57 = vmul.f32 %v1716_v34, %v1713_v6  ;;  %v1718_v36 = vmul.f32 %v1716_v34, %v1714_v12  ;;  %v1791_v21 = vshrl.u32 %v4983_v62, 7 }
 0x26f   : > { %v1724_v45 = vpop.permute.xlu1 %1723  ;;  %v1734_v8 = vpop.permute.xlu0 %1733 }
 0x270   : > { %v1725_v7 = vsel %vm1049_vm12, %v1724_v45, %v4973_v43  ;;  %v1726_v1 = vsel %vm1049_vm12, %v1722_v39, %v1724_v45  ;;  %v1719_v56 = vadd.f32 %v1717_v57, %v1705_v25  ;;  %v1720_v55 = vadd.f32 %v1718_v36, %v1706_v51 }
 0x271   : > { %v1729_v14 = vmul.f32 %v1728_v18, %v1726_v1  ;;  %v1730_v59 = vmul.f32 %v1728_v18, %v1725_v7  ;;  %vm4978_vm12 = vcmp.lt.s32.totalorder %v2612_v15, 78  ;;  %v1792_v26 = vsub.s32 0, %v1791_v21  ;;  %v2063_v18 = vld [vmem:[%s2210_s28] sm:$0xff] }
 0x272   : > { %vm4979_vm1 = vmmov %vm4978_vm12 }
 0x273   : > { %v1736_v42 = vpop.permute.xlu1 %1735  ;;  %v1748_v63 = vpop.permute.xlu0 %1747  ;;  %v1731_v50 = vadd.f32 %v1729_v14, %v1719_v56  ;;  %v1732_v32 = vadd.f32 %v1730_v59, %v1720_v55 }
 0x274   : > { %v1737_v52 = vsel %vm4975_vm13, %v1736_v42, %v4974_v31  ;;  %v1738_v24 = vsel %vm4976_vm9, %v1734_v8, %v1736_v42 }
 0x275   : > { %v1739_v35 = vsel %vm279_vm14, %v1738_v24, 0.0  ;;  %v1740_v2 = vsel %vm2824_vm3, %v1737_v52, 0.0  ;;  %vm4981_vm3 = vcmp.lt.s32.totalorder %v2612_v15, 77 }
 0x276   : > { %v1743_v46 = vmul.f32 %v1742_v28, %v1739_v35  ;;  %v1744_v23 = vmul.f32 %v1742_v28, %v1740_v2  ;;  %vm4982_vm14 = vmmov %vm4981_vm3 }
 0x277   : > { %v1750_v5 = vpop.permute.xlu1 %1749  ;;  %v1762_v41 = vpop.permute.xlu0 %1761 }
 0x278   : > { %v1751_v17 = vsel %vm4978_vm12, %v1750_v5, %v4977_v29  ;;  %v1752_v0 = vsel %vm4979_vm1, %v1748_v63, %v1750_v5  ;;  %v1745_v44 = vadd.f32 %v1743_v46, %v1731_v50  ;;  %v1746_v60 = vadd.f32 %v1744_v23, %v1732_v32 }
 0x279   : > { %v1753_v33 = vsel %vm287_vm0, %v1752_v0, 0.0  ;;  %v1754_v58 = vsel %vm2842_vm7, %v1751_v17, 0.0 }
 0x27a   : > { %v1757_v9 = vmul.f32 %v1756_v49, %v1753_v33  ;;  %v1758_v10 = vmul.f32 %v1756_v49, %v1754_v58 }
 0x27b   : > { %v1764_v39 = vpop.permute.xlu1 %1763 }
 0x27c   : > { %v1765_v40 = vsel %vm4981_vm3, %v1764_v39, %v4980_v48  ;;  %v1766_v20 = vsel %vm4982_vm14, %v1762_v41, %v1764_v39  ;;  %v1759_v38 = vadd.f32 %v1757_v9, %v1745_v44  ;;  %v1760_v13 = vadd.f32 %v1758_v10, %v1746_v60 }
 0x27d   : > { %v1767_v30 = vsel %vm295_vm10, %v1766_v20, 0.0  ;;  %v1768_v11 = vsel %vm2868_vm2, %v1765_v40, 0.0 }
 0x27e   : > { %v1771_v27 = vmul.f32 %v1770_v22, %v1767_v30  ;;  %v1772_v61 = vmul.f32 %v1770_v22, %v1768_v11 }
 0x280   : > { %v1773_v37 = vadd.f32 %v1771_v27, %v1759_v38  ;;  %v1774_v3 = vadd.f32 %v1772_v61, %v1760_v13 }
 0x282   : > { %v1776_v34 = vadd.f32 %v1775_v47, %v1773_v37  ;;  %v1777_v6 = vadd.f32 %v1775_v47, %v1774_v3 }
 0x284   : > { %v1980_v12 = vmul.f32 -1.442695, %v1776_v34  ;;  %v1981_v45 = vmul.f32 -1.442695, %v1777_v6 }
 0x286   : > { %2055 = vpow2.f32 %v1980_v12 }
 0x287   : > { %2057 = vpow2.f32 %v1981_v45 }
 0x290   : > { %v2056_v15 = vpop.eup %2055 }
 0x291   : > { %v2058_v4 = vpop.eup %2057  ;;  %v1784_v8 = vadd.f32 1.0, %v2056_v15 }
 0x292   : > { %v1785_v54 = vadd.f32 1.0, %v2058_v4 }
 0x293   : > { %2059 = vrcp.f32 %v1784_v8 }
 0x294   : > { %2061 = vrcp.f32 %v1785_v54 }
 0x29d   : > { %v2060_v19 = vpop.eup %2059 }
 0x29e   : > { %v2062_v53 = vpop.eup %2061  ;;  %v1793_v16 = vrot.slane %v2060_v19, %v1792_v26 }
 0x29f   : > { %v1797_v57 = vrot.slane %v2062_v53, %v1792_v26 }
 0x2a1   : > { %v1800_v36 = vcombine.low %v1793_v16, %v1797_v57 }
 0x2a3   : > { %v1802_v43 = vmul.f32 %v2063_v18, %v1800_v36 }
 0x2a5   : > { %1803 = vst [vmem:[%s185_s12] sm:$0xff] %v1802_v43 }
 0x2a6 PF: > { %s15_s14 = sadd.s32 1, %s2089_s14  }
 0x2a7   : > { %p12_p1 = scmp.ge.s32.totalorder %s15_s14, 4  }
 0x2a9   :  { %14 = sbr.rel (!%p12_p1) target bundleno = 3 (0x3), region = 67 }
 0x2b0   :  { %1825 = vsyncpa [#allocation4], 1 }
 0x2b1   :  { %1827 = vsyncpa [#allocation4 + $0x1], 1 }

</bundles_post_ra>
